<compile_context>
chip_gen: v5e
topology: v5e:2x2
jax: 0.10.0
libtpu: 0.0.40
codegen_flags: <defaults>
</compile_context>

<pallas_src>
import functools

import jax
import jax.numpy as jnp
from jax.experimental import pallas as pl
from jax.experimental.pallas import tpu as pltpu


# --------------------------------------------------------------------------
# Pass 1: fused [W1 | alpha*Ws] matmul + cross-tile BatchNorm statistics
# --------------------------------------------------------------------------
def _pass1_kernel(hidden, tiles_per_part, real_n, needs_mask,
                  x_ref, w_ref, b_ref, h_ref, stats_ref):
    """
    x_ref:     (tm, F)           f32  flattened patch tile
    w_ref:     (F, hidden+Ep)    bf16 fused weight [W1 | alpha*Ws_pad] (grid const)
    b_ref:     (1, hidden+Ep)    f32  fused bias (skip lanes zero)
    h_ref:     (tm, hidden+Ep)   bf16 pre-BN activations + scaled skip (round trip)
    stats_ref: (2, hidden)       f32  per-part [sum(h); sum(h^2)], resident over j
    """
    c = pl.program_id(0)
    j = pl.program_id(1)

    xb = x_ref[...].astype(jnp.bfloat16)
    h = jnp.dot(xb, w_ref[...], preferred_element_type=jnp.float32) + b_ref[...]
    h_ref[...] = h.astype(jnp.bfloat16)        # bf16 round trip halves HBM traffic

    hb = h[:, :hidden]                         # BN-path lanes (stats from f32 h)
    if needs_mask:
        tm = hb.shape[0]
        tile_start = (c * tiles_per_part + j) * tm
        row = jax.lax.broadcasted_iota(jnp.int32, (tm, 1), 0) + tile_start
        hb = jnp.where(row < real_n, hb, 0.0)  # exclude zero-padded batch rows

    s = jnp.sum(hb, axis=0, keepdims=True)     # (1, hidden)
    s2 = jnp.sum(hb * hb, axis=0, keepdims=True)

    @pl.when(j == 0)
    def _init():
        stats_ref[0:1, :] = s
        stats_ref[1:2, :] = s2

    @pl.when(j != 0)
    def _acc():
        stats_ref[0:1, :] = stats_ref[0:1, :] + s
        stats_ref[1:2, :] = stats_ref[1:2, :] + s2


# --------------------------------------------------------------------------
# Pass 2: folded BN + GELU + Linear(512, Ep) + skip add (embed_dim store)
# --------------------------------------------------------------------------
def _pass2_kernel(hidden, inv_n,
                  h_ref, stats_ref, gamma_ref, beta_ref, w2_ref, bo_ref, o_ref):
    """
    h_ref:     (tm, hidden+Ep)    bf16
    stats_ref: (parts, 2, hidden) f32  per-part batch sums / sums-of-squares
    gamma_ref, beta_ref: (1, hidden) f32
    w2_ref:    (hidden, Ep)       bf16 (zero padded to Ep)
    bo_ref:    (1, Ep)            f32  = pad(b2 + alpha*bs)
    o_ref:     (tm, E)            f32  direct embed_dim-wide store
    """
    h = h_ref[...].astype(jnp.float32)
    hb = h[:, :hidden]
    hskip = h[:, hidden:]                      # already alpha-scaled; bias in bo

    st = stats_ref[0]                          # (2, hidden); reduce per-core partials
    for p in range(1, stats_ref.shape[0]):
        st = st + stats_ref[p]

    mean = st[0:1, :] * inv_n
    var = st[1:2, :] * inv_n - mean * mean     # biased batch variance (train mode)

    scale = gamma_ref[...] * jax.lax.rsqrt(var + jnp.float32(1e-5))
    shift = beta_ref[...] - mean * scale
    hn = hb * scale + shift                    # folded BN affine

    # Exact (erf) GELU, PyTorch default.
    g = 0.5 * hn * (1.0 + jax.lax.erf(hn * jnp.float32(0.7071067811865476)))

    emb = jnp.dot(g.astype(jnp.bfloat16), w2_ref[...],
                  preferred_element_type=jnp.float32)
    full = emb + bo_ref[...] + hskip           # (tm, Ep)
    o_ref[...] = full[:, :o_ref.shape[1]]      # drop the padded lanes at the store


# --------------------------------------------------------------------------
# Wrapper
# --------------------------------------------------------------------------
def _batch_tiling(n):
    """Returns (tile_rows, padded_batch)."""
    # Prefer a large exact divisor (no batch padding, no masked BN stats).
    for t in (1024, 512, 256, 128):
        if n % t == 0:
            return t, n
    # Otherwise zero-pad the batch to a multiple of the largest tile <= N
    # (min 16 keeps the bf16 (16, 128) sublane packing of the h round trip).
    for t in (512, 256, 128, 64, 32, 16):
        if n >= t:
            return t, -(-n // t) * t
    return 16, 16


@functools.partial(jax.jit, static_argnames=("embed_dim",))
def patch_embedder(x_nchw, params, embed_dim=400):
    """x_nchw: (N, C, P, P) float32. Returns (N, embed_dim) float32."""
    w_fused, b_fused, gamma, beta, w2p, b_out = params
    n = x_nchw.shape[0]
    x = x_nchw.reshape(n, -1).astype(jnp.float32)          # identical to nn.Flatten
    f = x.shape[1]
    hidden = gamma.shape[1]
    e_pad = w2p.shape[1]
    wide = w_fused.shape[1]                                # hidden + e_pad

    tm, n_pad = _batch_tiling(n)
    if n_pad != n:
        x = jnp.pad(x, ((0, n_pad - n), (0, 0)))
    n_tiles = n_pad // tm
    # Split pass-1's BN reduction into two partial accumulators when possible
    # so the leading "parallel" axis can use both v7x TensorCores.
    n_parts = 2 if (n_tiles >= 2 and n_tiles % 2 == 0) else 1
    tiles_per_part = n_tiles // n_parts

    const = dict(pipeline_mode=pl.Buffered(1))             # single-buffer constants
    vmem = 32 * 1024 * 1024

    # ---- pass 1: fused matmul + cross-tile BN statistics ----
    h_full, stats = pl.pallas_call(
        functools.partial(_pass1_kernel, hidden, tiles_per_part, n, n_pad != n),
        grid=(n_parts, tiles_per_part),
        in_specs=[
            pl.BlockSpec((tm, f), lambda c, j: (c * tiles_per_part + j, 0)),
            pl.BlockSpec((f, wide), lambda c, j: (0, 0), **const),
            pl.BlockSpec((1, wide), lambda c, j: (0, 0), **const),
        ],
        out_specs=(
            pl.BlockSpec((tm, wide), lambda c, j: (c * tiles_per_part + j, 0)),
            pl.BlockSpec((None, 2, hidden), lambda c, j: (c, 0, 0)),  # resident / j
        ),
        out_shape=(
            jax.ShapeDtypeStruct((n_pad, wide), jnp.bfloat16),
            jax.ShapeDtypeStruct((n_parts, 2, hidden), jnp.float32),
        ),
        compiler_params=pltpu.CompilerParams(
            dimension_semantics=("parallel", "arbitrary"),
            vmem_limit_bytes=vmem),
    )(x, w_fused, b_fused)

    # ---- pass 2: BN + GELU + Linear(512, Ep) + skip, embed_dim-wide store ----
    out_full = pl.pallas_call(
        functools.partial(_pass2_kernel, hidden, 1.0 / n),
        grid=(n_tiles,),
        in_specs=[
            pl.BlockSpec((tm, wide), lambda i: (i, 0)),
            pl.BlockSpec((n_parts, 2, hidden), lambda i: (0, 0, 0), **const),
            pl.BlockSpec((1, hidden), lambda i: (0, 0), **const),
            pl.BlockSpec((1, hidden), lambda i: (0, 0), **const),
            pl.BlockSpec((hidden, e_pad), lambda i: (0, 0), **const),
            pl.BlockSpec((1, e_pad), lambda i: (0, 0), **const),
        ],
        out_specs=pl.BlockSpec((tm, embed_dim), lambda i: (i, 0)),
        out_shape=jax.ShapeDtypeStruct((n_pad, embed_dim), jnp.float32),
        compiler_params=pltpu.CompilerParams(
            dimension_semantics=("parallel",),
            vmem_limit_bytes=vmem),
    )(h_full, stats, gamma, beta, w2p, b_out)

    return out_full if n_pad == n else out_full[:n]


# --------------------------------------------------------------------------
# Parameters
# --------------------------------------------------------------------------
def init_params(key, in_channel, patch_size, embed_dim=400, hidden=512):
    """Raw float32 params in math layout (fan_in, fan_out), like the PyTorch module."""
    f = in_channel * patch_size * patch_size
    ks = jax.random.split(key, 8)

    def lin(kw, kb, fan_in, fan_out):
        bound = 1.0 / jnp.sqrt(fan_in)
        w = jax.random.uniform(kw, (fan_in, fan_out), jnp.float32, -bound, bound)
        b = jax.random.uniform(kb, (1, fan_out), jnp.float32, -bound, bound)
        return w, b

    w1, b1 = lin(ks[0], ks[1], f, hidden)
    gamma = 1.0 + 0.05 * jax.random.normal(ks[2], (1, hidden), jnp.float32)
    beta = 0.05 * jax.random.normal(ks[3], (1, hidden), jnp.float32)
    w2, b2 = lin(ks[4], ks[5], hidden, embed_dim)
    ws, bs = lin(ks[6], ks[7], f, embed_dim)
    return (w1, b1, gamma, beta, w2, b2, ws, bs)


def prepare_params(raw, alpha=0.1):
    """One-time folding/padding/casting for the kernel (done at init, not per call):
       * pad embed_dim up to a multiple of 128 (400 -> 512),
       * fuse [W1 | alpha*Ws_pad] into one bf16 weight,
       * fold alpha and the skip bias into b_out = pad(b2 + alpha*bs),
       * cast weight matrices to bf16 (halves weight DMA).
    """
    w1, b1, gamma, beta, w2, b2, ws, bs = raw
    e = w2.shape[1]
    e_pad = ((e + 127) // 128) * 128
    pad = lambda a: jnp.pad(a, ((0, 0), (0, e_pad - e)))

    w_fused = jnp.concatenate([w1, alpha * pad(ws)], axis=1).astype(jnp.bfloat16)
    b_fused = jnp.concatenate([b1, jnp.zeros((1, e_pad), jnp.float32)], axis=1)
    w2p = pad(w2).astype(jnp.bfloat16)
    b_out = pad(b2 + alpha * bs)
    return (w_fused, b_fused, gamma, beta, w2p, b_out)


# --------------------------------------------------------------------------
# Reference (plain JAX, float32, mirrors the PyTorch forward in train mode)
# --------------------------------------------------------------------------
def reference(x_nchw, raw):
    w1, b1, gamma, beta, w2, b2, ws, bs = raw
    x = x_nchw.reshape(x_nchw.shape[0], -1).astype(jnp.float32)
    h = x @ w1 + b1
    mean = jnp.mean(h, axis=0, keepdims=True)
    var = jnp.mean((h - mean) ** 2, axis=0, keepdims=True)
    h = (h - mean) / jnp.sqrt(var + 1e-5) * gamma + beta
    h = 0.5 * h * (1.0 + jax.lax.erf(h / jnp.sqrt(2.0)))
    return h @ w2 + b2 + 0.1 * (x @ ws + bs)


# --------------------------------------------------------------------------
# Main
# --------------------------------------------------------------------------
if __name__ == "__main__":
    C, P, EMBED_DIM = 4, 16, 400       # flatten size F = 1024

    key = jax.random.PRNGKey(0)
    k_x, k_p, k_x2, k_x3 = jax.random.split(key, 4)
    raw = init_params(k_p, in_channel=C, patch_size=P, embed_dim=EMBED_DIM)
    params = prepare_params(raw)

    # Tolerance covers bf16 weights/activations + the bf16 h round trip
    # (f32 accumulation everywhere) vs. the all-f32 reference.
    ATOL = RTOL = 2.5e-2

    def check(x):
        out = jax.block_until_ready(patch_embedder(x, params, embed_dim=EMBED_DIM))
        ref = reference(x, raw)
        assert out.shape == ref.shape, (out.shape, ref.shape)
        assert jnp.allclose(out, ref, atol=ATOL, rtol=RTOL), float(
            jnp.max(jnp.abs(out - ref)))

    # Small batch: exercises batch padding (8 -> 16) + masked BN statistics.
    check(jax.random.normal(k_x, (8, C, P, P), jnp.float32))
    # Multi-tile batch: 3 tiles of 128, single stats partial, cross-tile BN.
    check(jax.random.normal(k_x2, (384, C, P, P), jnp.float32))
    # Large batch: 2 tiles of 1024, two BN-stat partials ("parallel" pass-1 axis).
    check(jax.random.normal(k_x3, (2048, C, P, P), jnp.float32))

    print("KERNEL_OK")
</pallas_src>

<mosaic_0001>
module attributes {stable_mosaic.version = 11 : i64} {
  func.func @_pass2_kernel(%arg0: i32, %arg1: memref<16x1024xbf16, #tpu.memory_space<vmem>>, %arg2: memref<1x2x512xf32, #tpu.memory_space<vmem>>, %arg3: memref<1x512xf32, #tpu.memory_space<vmem>>, %arg4: memref<1x512xf32, #tpu.memory_space<vmem>>, %arg5: memref<512x512xbf16, #tpu.memory_space<vmem>>, %arg6: memref<1x512xf32, #tpu.memory_space<vmem>>, %arg7: memref<16x400xf32, #tpu.memory_space<vmem>>) attributes {dimension_semantics = [#tpu.dimension_semantics<parallel>], iteration_bounds = array<i64: 1>, scalar_prefetch = 0 : i64, scratch_operands = 0 : i64, tpu.core_type = #tpu.core_type<tc>, window_params = [{transform_indices = @transform_0, window_bounds = array<i64: 16, 1024>}, {pipeline_mode = #tpu.pipeline_mode<synchronous>, transform_indices = @transform_1, window_bounds = array<i64: 1, 2, 512>}, {pipeline_mode = #tpu.pipeline_mode<synchronous>, transform_indices = @transform_2, window_bounds = array<i64: 1, 512>}, {pipeline_mode = #tpu.pipeline_mode<synchronous>, transform_indices = @transform_3, window_bounds = array<i64: 1, 512>}, {pipeline_mode = #tpu.pipeline_mode<synchronous>, transform_indices = @transform_4, window_bounds = array<i64: 512, 512>}, {pipeline_mode = #tpu.pipeline_mode<synchronous>, transform_indices = @transform_5, window_bounds = array<i64: 1, 512>}, {transform_indices = @transform_6, window_bounds = array<i64: 16, 400>}]} {
    %c0 = arith.constant 0 : index
    %c0_0 = arith.constant 0 : index
    %0 = vector.load %arg1[%c0, %c0_0] : memref<16x1024xbf16, #tpu.memory_space<vmem>>, vector<16x1024xbf16>
    %1 = arith.extf %0 : vector<16x1024xbf16> to vector<16x1024xf32>
    %2 = vector.extract_strided_slice %1 {offsets = [0, 0], sizes = [16, 512], strides = [1, 1]} : vector<16x1024xf32> to vector<16x512xf32>
    %3 = vector.extract_strided_slice %1 {offsets = [0, 512], sizes = [16, 512], strides = [1, 1]} : vector<16x1024xf32> to vector<16x512xf32>
    %c0_1 = arith.constant 0 : index
    %c0_2 = arith.constant 0 : index
    %c0_3 = arith.constant 0 : index
    %4 = vector.load %arg2[%c0_1, %c0_2, %c0_3] : memref<1x2x512xf32, #tpu.memory_space<vmem>>, vector<1x2x512xf32>
    %5 = vector.shape_cast %4 : vector<1x2x512xf32> to vector<2x512xf32>
    %6 = vector.extract_strided_slice %5 {offsets = [0, 0], sizes = [1, 512], strides = [1, 1]} : vector<2x512xf32> to vector<1x512xf32>
    %cst = arith.constant 1.250000e-01 : f32
    %7 = vector.broadcast %cst : f32 to vector<1x512xf32>
    %8 = arith.mulf %6, %7 : vector<1x512xf32>
    %9 = vector.extract_strided_slice %5 {offsets = [1, 0], sizes = [1, 512], strides = [1, 1]} : vector<2x512xf32> to vector<1x512xf32>
    %cst_4 = arith.constant 1.250000e-01 : f32
    %10 = vector.broadcast %cst_4 : f32 to vector<1x512xf32>
    %11 = arith.mulf %9, %10 : vector<1x512xf32>
    %12 = arith.mulf %8, %8 : vector<1x512xf32>
    %13 = arith.subf %11, %12 : vector<1x512xf32>
    %c0_5 = arith.constant 0 : index
    %c0_6 = arith.constant 0 : index
    %14 = vector.load %arg3[%c0_5, %c0_6] : memref<1x512xf32, #tpu.memory_space<vmem>>, vector<1x512xf32>
    %cst_7 = arith.constant 9.99999974E-6 : f32
    %15 = vector.broadcast %cst_7 : f32 to vector<1x512xf32>
    %16 = arith.addf %13, %15 : vector<1x512xf32>
    %17 = math.rsqrt %16 : vector<1x512xf32>
    %18 = arith.mulf %14, %17 : vector<1x512xf32>
    %c0_8 = arith.constant 0 : index
    %c0_9 = arith.constant 0 : index
    %19 = vector.load %arg4[%c0_8, %c0_9] : memref<1x512xf32, #tpu.memory_space<vmem>>, vector<1x512xf32>
    %20 = arith.mulf %8, %18 : vector<1x512xf32>
    %21 = arith.subf %19, %20 : vector<1x512xf32>
    %22 = vector.broadcast %18 : vector<1x512xf32> to vector<16x512xf32>
    %23 = arith.mulf %2, %22 : vector<16x512xf32>
    %24 = vector.broadcast %21 : vector<1x512xf32> to vector<16x512xf32>
    %25 = arith.addf %23, %24 : vector<16x512xf32>
    %cst_10 = arith.constant 5.000000e-01 : f32
    %26 = vector.broadcast %cst_10 : f32 to vector<16x512xf32>
    %27 = arith.mulf %26, %25 : vector<16x512xf32>
    %cst_11 = arith.constant 0.707106769 : f32
    %28 = vector.broadcast %cst_11 : f32 to vector<16x512xf32>
    %29 = arith.mulf %25, %28 : vector<16x512xf32>
    %30 = math.erf %29 : vector<16x512xf32>
    %cst_12 = arith.constant 1.000000e+00 : f32
    %31 = vector.broadcast %cst_12 : f32 to vector<16x512xf32>
    %32 = arith.addf %31, %30 : vector<16x512xf32>
    %33 = arith.mulf %27, %32 : vector<16x512xf32>
    %34 = arith.truncf %33 : vector<16x512xf32> to vector<16x512xbf16>
    %c0_13 = arith.constant 0 : index
    %c0_14 = arith.constant 0 : index
    %35 = vector.load %arg5[%c0_13, %c0_14] : memref<512x512xbf16, #tpu.memory_space<vmem>>, vector<512x512xbf16>
    %cst_15 = arith.constant dense<0.000000e+00> : vector<16x512xf32>
    %36 = tpu.matmul %34, %35, %cst_15 {dimension_numbers = #tpu.dot_dimension_numbers<[1], [0], [0], [1], [0, 0, 1, 1], [], []>} : vector<16x512xbf16>, vector<512x512xbf16>, vector<16x512xf32> -> vector<16x512xf32>
    %c0_16 = arith.constant 0 : index
    %c0_17 = arith.constant 0 : index
    %37 = vector.load %arg6[%c0_16, %c0_17] : memref<1x512xf32, #tpu.memory_space<vmem>>, vector<1x512xf32>
    %38 = vector.broadcast %37 : vector<1x512xf32> to vector<16x512xf32>
    %39 = arith.addf %36, %38 : vector<16x512xf32>
    %40 = arith.addf %39, %3 : vector<16x512xf32>
    %41 = vector.extract_strided_slice %40 {offsets = [0, 0], sizes = [16, 400], strides = [1, 1]} : vector<16x512xf32> to vector<16x400xf32>
    %c0_18 = arith.constant 0 : index
    %c0_19 = arith.constant 0 : index
    %42 = vector.load %arg7[%c0_18, %c0_19] : memref<16x400xf32, #tpu.memory_space<vmem>>, vector<16x400xf32>
    tpu.vector_store %arg7[%c0_18, %c0_19], %41 {strides = array<i32>} : memref<16x400xf32, #tpu.memory_space<vmem>>, vector<16x400xf32>,
    return
  }
  func.func @transform_0(%arg0: i32) -> (i32, i32) {
    %c0_i32 = arith.constant 0 : i32
    %c0_i32_0 = arith.constant 0 : i32
    return %arg0, %c0_i32 : i32, i32
  }
  func.func @transform_1(%arg0: i32) -> (i32, i32, i32) {
    %c0_i32 = arith.constant 0 : i32
    %c0_i32_0 = arith.constant 0 : i32
    %c0_i32_1 = arith.constant 0 : i32
    %c0_i32_2 = arith.constant 0 : i32
    return %c0_i32, %c0_i32_0, %c0_i32_1 : i32, i32, i32
  }
  func.func @transform_2(%arg0: i32) -> (i32, i32) {
    %c0_i32 = arith.constant 0 : i32
    %c0_i32_0 = arith.constant 0 : i32
    %c0_i32_1 = arith.constant 0 : i32
    return %c0_i32, %c0_i32_0 : i32, i32
  }
  func.func @transform_3(%arg0: i32) -> (i32, i32) {
    %c0_i32 = arith.constant 0 : i32
    %c0_i32_0 = arith.constant 0 : i32
    %c0_i32_1 = arith.constant 0 : i32
    return %c0_i32, %c0_i32_0 : i32, i32
  }
  func.func @transform_4(%arg0: i32) -> (i32, i32) {
    %c0_i32 = arith.constant 0 : i32
    %c0_i32_0 = arith.constant 0 : i32
    %c0_i32_1 = arith.constant 0 : i32
    return %c0_i32, %c0_i32_0 : i32, i32
  }
  func.func @transform_5(%arg0: i32) -> (i32, i32) {
    %c0_i32 = arith.constant 0 : i32
    %c0_i32_0 = arith.constant 0 : i32
    %c0_i32_1 = arith.constant 0 : i32
    return %c0_i32, %c0_i32_0 : i32, i32
  }
  func.func @transform_6(%arg0: i32) -> (i32, i32) {
    %c0_i32 = arith.constant 0 : i32
    %c0_i32_0 = arith.constant 0 : i32
    return %arg0, %c0_i32 : i32, i32
  }
}

module attributes {stable_mosaic.version = 11 : i64} {
  func.func @_pass1_kernel(%arg0: i32, %arg1: i32, %arg2: memref<16x1024xf32, #tpu.memory_space<vmem>>, %arg3: memref<1024x1024xbf16, #tpu.memory_space<vmem>>, %arg4: memref<1x1024xf32, #tpu.memory_space<vmem>>, %arg5: memref<16x1024xbf16, #tpu.memory_space<vmem>>, %arg6: memref<1x2x512xf32, #tpu.memory_space<vmem>>) attributes {dimension_semantics = [#tpu.dimension_semantics<parallel>, #tpu.dimension_semantics<arbitrary>], iteration_bounds = array<i64: 1, 1>, scalar_prefetch = 0 : i64, scratch_operands = 0 : i64, tpu.core_type = #tpu.core_type<tc>, window_params = [{transform_indices = @transform_0, window_bounds = array<i64: 16, 1024>}, {pipeline_mode = #tpu.pipeline_mode<synchronous>, transform_indices = @transform_1, window_bounds = array<i64: 1024, 1024>}, {pipeline_mode = #tpu.pipeline_mode<synchronous>, transform_indices = @transform_2, window_bounds = array<i64: 1, 1024>}, {transform_indices = @transform_3, window_bounds = array<i64: 16, 1024>}, {transform_indices = @transform_4, window_bounds = array<i64: 1, 2, 512>}]} {
    %c0 = arith.constant 0 : index
    %c0_0 = arith.constant 0 : index
    %0 = vector.load %arg2[%c0, %c0_0] : memref<16x1024xf32, #tpu.memory_space<vmem>>, vector<16x1024xf32>
    %1 = arith.truncf %0 : vector<16x1024xf32> to vector<16x1024xbf16>
    %c0_1 = arith.constant 0 : index
    %c0_2 = arith.constant 0 : index
    %2 = vector.load %arg3[%c0_1, %c0_2] : memref<1024x1024xbf16, #tpu.memory_space<vmem>>, vector<1024x1024xbf16>
    %cst = arith.constant dense<0.000000e+00> : vector<16x1024xf32>
    %3 = tpu.matmul %1, %2, %cst {dimension_numbers = #tpu.dot_dimension_numbers<[1], [0], [0], [1], [0, 0, 1, 1], [], []>} : vector<16x1024xbf16>, vector<1024x1024xbf16>, vector<16x1024xf32> -> vector<16x1024xf32>
    %c0_3 = arith.constant 0 : index
    %c0_4 = arith.constant 0 : index
    %4 = vector.load %arg4[%c0_3, %c0_4] : memref<1x1024xf32, #tpu.memory_space<vmem>>, vector<1x1024xf32>
    %5 = vector.broadcast %4 : vector<1x1024xf32> to vector<16x1024xf32>
    %6 = arith.addf %3, %5 : vector<16x1024xf32>
    %7 = arith.truncf %6 : vector<16x1024xf32> to vector<16x1024xbf16>
    %c0_5 = arith.constant 0 : index
    %c0_6 = arith.constant 0 : index
    %8 = vector.load %arg5[%c0_5, %c0_6] : memref<16x1024xbf16, #tpu.memory_space<vmem>>, vector<16x1024xbf16>
    tpu.vector_store %arg5[%c0_5, %c0_6], %7 {strides = array<i32>} : memref<16x1024xbf16, #tpu.memory_space<vmem>>, vector<16x1024xbf16>,
    %9 = vector.extract_strided_slice %6 {offsets = [0, 0], sizes = [16, 512], strides = [1, 1]} : vector<16x1024xf32> to vector<16x512xf32>
    %c1_i32 = arith.constant 1 : i32
    %10 = arith.muli %arg0, %c1_i32 : i32
    %11 = arith.addi %10, %arg1 : i32
    %c16_i32 = arith.constant 16 : i32
    %12 = arith.muli %11, %c16_i32 : i32
    %13 = tpu.iota {dimensions = array<i32: 0>} : vector<16x1xi32>
    %14 = vector.broadcast %12 : i32 to vector<16x1xi32>
    %15 = arith.addi %13, %14 : vector<16x1xi32>
    %c8_i32 = arith.constant 8 : i32
    %16 = vector.broadcast %c8_i32 : i32 to vector<16x1xi32>
    %17 = arith.cmpi slt, %15, %16 : vector<16x1xi32>
    %cst_7 = arith.constant 0.000000e+00 : f32
    %18 = vector.shape_cast %17 : vector<16x1xi1> to vector<16x1xi1>
    %19 = vector.broadcast %18 : vector<16x1xi1> to vector<16x512xi1>
    %20 = vector.broadcast %cst_7 : f32 to vector<16x512xf32>
    %21 = arith.select %19, %9, %20 : vector<16x512xi1>, vector<16x512xf32>
    %cst_8 = arith.constant dense<0.000000e+00> : vector<512xf32>
    %22 = vector.multi_reduction <add>, %21, %cst_8 [0] : vector<16x512xf32> to vector<512xf32>
    %23 = vector.shape_cast %22 : vector<512xf32> to vector<1x512xf32>
    %24 = arith.mulf %21, %21 : vector<16x512xf32>
    %cst_9 = arith.constant dense<0.000000e+00> : vector<512xf32>
    %25 = vector.multi_reduction <add>, %24, %cst_9 [0] : vector<16x512xf32> to vector<512xf32>
    %26 = vector.shape_cast %25 : vector<512xf32> to vector<1x512xf32>
    %c0_i32 = arith.constant 0 : i32
    %27 = arith.cmpi eq, %arg1, %c0_i32 : i32
    %28 = arith.extui %27 : i1 to i32
    %c0_i32_10 = arith.constant 0 : i32
    %29 = arith.cmpi ne, %28, %c0_i32_10 : i32
    scf.if %29 {
      %c0_13 = arith.constant 0 : index
      %c0_14 = arith.constant 0 : index
      %c0_15 = arith.constant 0 : index
      %33 = vector.load %arg6[%c0_13, %c0_14, %c0_15] : memref<1x2x512xf32, #tpu.memory_space<vmem>>, vector<1x1x512xf32>
      %34 = vector.shape_cast %33 : vector<1x1x512xf32> to vector<1x512xf32>
      %35 = vector.shape_cast %23 : vector<1x512xf32> to vector<1x1x512xf32>
      tpu.vector_store %arg6[%c0_13, %c0_14, %c0_15], %35 {strides = array<i32>} : memref<1x2x512xf32, #tpu.memory_space<vmem>>, vector<1x1x512xf32>,
      %c0_16 = arith.constant 0 : index
      %c1 = arith.constant 1 : index
      %c0_17 = arith.constant 0 : index
      %36 = vector.load %arg6[%c0_16, %c1, %c0_17] : memref<1x2x512xf32, #tpu.memory_space<vmem>>, vector<1x1x512xf32>
      %37 = vector.shape_cast %36 : vector<1x1x512xf32> to vector<1x512xf32>
      %38 = vector.shape_cast %26 : vector<1x512xf32> to vector<1x1x512xf32>
      tpu.vector_store %arg6[%c0_16, %c1, %c0_17], %38 {strides = array<i32>} : memref<1x2x512xf32, #tpu.memory_space<vmem>>, vector<1x1x512xf32>,
    } else {
    }
    %c0_i32_11 = arith.constant 0 : i32
    %30 = arith.cmpi ne, %arg1, %c0_i32_11 : i32
    %31 = arith.extui %30 : i1 to i32
    %c0_i32_12 = arith.constant 0 : i32
    %32 = arith.cmpi ne, %31, %c0_i32_12 : i32
    scf.if %32 {
      %c0_13 = arith.constant 0 : index
      %c0_14 = arith.constant 0 : index
      %c0_15 = arith.constant 0 : index
      %33 = vector.load %arg6[%c0_13, %c0_14, %c0_15] : memref<1x2x512xf32, #tpu.memory_space<vmem>>, vector<1x1x512xf32>
      %34 = vector.shape_cast %33 : vector<1x1x512xf32> to vector<1x512xf32>
      %35 = arith.addf %34, %23 : vector<1x512xf32>
      %c0_16 = arith.constant 0 : index
      %c0_17 = arith.constant 0 : index
      %c0_18 = arith.constant 0 : index
      %36 = vector.load %arg6[%c0_16, %c0_17, %c0_18] : memref<1x2x512xf32, #tpu.memory_space<vmem>>, vector<1x1x512xf32>
      %37 = vector.shape_cast %36 : vector<1x1x512xf32> to vector<1x512xf32>
      %38 = vector.shape_cast %35 : vector<1x512xf32> to vector<1x1x512xf32>
      tpu.vector_store %arg6[%c0_16, %c0_17, %c0_18], %38 {strides = array<i32>} : memref<1x2x512xf32, #tpu.memory_space<vmem>>, vector<1x1x512xf32>,
      %c0_19 = arith.constant 0 : index
      %c1 = arith.constant 1 : index
      %c0_20 = arith.constant 0 : index
      %39 = vector.load %arg6[%c0_19, %c1, %c0_20] : memref<1x2x512xf32, #tpu.memory_space<vmem>>, vector<1x1x512xf32>
      %40 = vector.shape_cast %39 : vector<1x1x512xf32> to vector<1x512xf32>
      %41 = arith.addf %40, %26 : vector<1x512xf32>
      %c0_21 = arith.constant 0 : index
      %c1_22 = arith.constant 1 : index
      %c0_23 = arith.constant 0 : index
      %42 = vector.load %arg6[%c0_21, %c1_22, %c0_23] : memref<1x2x512xf32, #tpu.memory_space<vmem>>, vector<1x1x512xf32>
      %43 = vector.shape_cast %42 : vector<1x1x512xf32> to vector<1x512xf32>
      %44 = vector.shape_cast %41 : vector<1x512xf32> to vector<1x1x512xf32>
      tpu.vector_store %arg6[%c0_21, %c1_22, %c0_23], %44 {strides = array<i32>} : memref<1x2x512xf32, #tpu.memory_space<vmem>>, vector<1x1x512xf32>,
    } else {
    }
    return
  }
  func.func @transform_0(%arg0: i32, %arg1: i32) -> (i32, i32) {
    %c1_i32 = arith.constant 1 : i32
    %0 = arith.muli %arg0, %c1_i32 : i32
    %1 = arith.addi %0, %arg1 : i32
    %c0_i32 = arith.constant 0 : i32
    %c0_i32_0 = arith.constant 0 : i32
    return %1, %c0_i32 : i32, i32
  }
  func.func @transform_1(%arg0: i32, %arg1: i32) -> (i32, i32) {
    %c0_i32 = arith.constant 0 : i32
    %c0_i32_0 = arith.constant 0 : i32
    %c0_i32_1 = arith.constant 0 : i32
    return %c0_i32, %c0_i32_0 : i32, i32
  }
  func.func @transform_2(%arg0: i32, %arg1: i32) -> (i32, i32) {
    %c0_i32 = arith.constant 0 : i32
    %c0_i32_0 = arith.constant 0 : i32
    %c0_i32_1 = arith.constant 0 : i32
    return %c0_i32, %c0_i32_0 : i32, i32
  }
  func.func @transform_3(%arg0: i32, %arg1: i32) -> (i32, i32) {
    %c1_i32 = arith.constant 1 : i32
    %0 = arith.muli %arg0, %c1_i32 : i32
    %1 = arith.addi %0, %arg1 : i32
    %c0_i32 = arith.constant 0 : i32
    %c0_i32_0 = arith.constant 0 : i32
    return %1, %c0_i32 : i32, i32
  }
  func.func @transform_4(%arg0: i32, %arg1: i32) -> (i32, i32, i32) {
    %c0_i32 = arith.constant 0 : i32
    %c0_i32_0 = arith.constant 0 : i32
    %c0_i32_1 = arith.constant 0 : i32
    return %arg0, %c0_i32, %c0_i32_0 : i32, i32, i32
  }
}

</mosaic_0001>

<bundles_post_ra>
// kernel: patch_embedder.3
= control target key start
LH: loop header
LB: loop body
LE: loop exit
PB: predicated region body
PF: predicated region fallthrough
CT: control target
= control target key end

     0   :  { %11 = vsyncpa [#allocation3], 0  ;;  %s2807_s0 = inlined_call_operand.vmem [shape: bf16[16,1024], index: 0, kind: input, shape index: {}]   ;;  %s2808_s1 = inlined_call_operand.vmem [shape: f32[1,2,512], index: 1, kind: input, shape index: {}]   ;;  %s2809_s2 = inlined_call_operand.hbm [shape: f32[1,512], index: 2, kind: input, shape index: {}]   ;;  %s2810_s3 = inlined_call_operand.hbm [shape: f32[1,512], index: 3, kind: input, shape index: {}]   ;;  %s2811_s4 = inlined_call_operand.hbm [shape: bf16[512,512], index: 4, kind: input, shape index: {}]   ;;  %s2812_s5 = inlined_call_operand.hbm [shape: f32[1,512], index: 5, kind: input, shape index: {}]   ;;  %s2813_s6 = inlined_call_operand.vmem [shape: f32[16,400], index: 6, kind: output, shape index: {}]  }
   0x1   :  { %12 = vsyncpa [#allocation5], 0  ;;  %s34_s23 = sshll.u32 %s2810_s3, 4  ;;  %s35_s23 = int_to_ptr.hbm [resolvable:$true] %s34_s23 }
   0x2   :  { %13 = vsyncpa [#allocation8], 0  ;;  %s2339_s24 = smov [#allocation4]   ;;  %s23_s28 = sshll.u32 %s2809_s2, 4  ;;  %s24_s28 = int_to_ptr.hbm [resolvable:$true] %s23_s28 }
   0x3   :  { %s36_s25 = sshll.u32 %s2339_s24, 4  ;;  %s2340_s29 = smov [#allocation2]   ;;  %s37_s25 = int_to_ptr.vmem [resolvable:$true] %s36_s25 }
   0x4   :  { %39 = dma.hbm_to_vmem [thread:$0]  %s35_s23, 64, %s37_s25, [#allocation5]  }
   0x5   :  { %s25_s30 = sshll.u32 %s2340_s29, 4  ;;  %s44_s9 = sshll.u32 %s2811_s4, 4  ;;  %s26_s30 = int_to_ptr.vmem [resolvable:$true] %s25_s30  ;;  %s45_s9 = int_to_ptr.hbm [resolvable:$true] %s44_s9 }
   0x6   :  { %28 = dma.hbm_to_vmem [thread:$0]  %s24_s28, 64, %s26_s30, [#allocation3]  }
   0x7   :  { %s2341_s3 = smov [#allocation6]   ;;  %s58_s13 = sshll.u32 %s2812_s5, 4  ;;  %s59_s13 = int_to_ptr.hbm [resolvable:$true] %s58_s13 }
   0x8   :  { %s46_s10 = sshll.u32 %s2341_s3, 4  ;;  %s2342_s14 = smov 256   ;;  %s47_s10 = int_to_ptr.vmem [resolvable:$true] %s46_s10 }
   0x9   :  { %s2343_s2 = smov 16   ;;  %s2344_s15 = smov [#allocation7]  }
   0xa   :  { %52 = dma.hbm_to_vmem [thread:$0]  %s45_s9, 16384, %s47_s10, [#allocation5], %s2342_s14, %s2342_s14, %s2343_s2  }
   0xb   :  { %s60_s16 = sshll.u32 %s2344_s15, 4  ;;  %s61_s16 = int_to_ptr.vmem [resolvable:$true] %s60_s16 }
   0xc   :  { %63 = dma.hbm_to_vmem [thread:$0]  %s59_s13, 64, %s61_s16, [#allocation8]  }
   0xd   :  { %2333 = dma.done.wait [#allocation3], 64  }
   0xe   :  { %2334 = vsyncadd [#allocation3], 4294967232 }
   0xf   :  { %2335 = dma.done.wait [#allocation5], 16448  }
  0x10   :  { %2336 = vsyncadd [#allocation5], 4294950848 }
  0x11   :  { %2337 = dma.done.wait [#allocation8], 64  }
  0x12   :  { %2338 = vsyncadd [#allocation8], 4294967232  ;;  %v1686_v0 = vld [vmem:[#allocation6 + $0xe0] sm:$0xf]  ;;  %v2114_v1 = vld [vmem:[#allocation6 + $0xec] sm:$0xf0] }
  0x13   :  { %v1814_v2 = vld [vmem:[#allocation6 + $0x1e0] sm:$0xf]  ;;  %v1687_v3 = vor.u32 %v2114_v1, %v1686_v0  ;;  %v2146_v4 = vld [vmem:[#allocation6 + $0x1ec] sm:$0xf0]  ;;  %vm141_vm3 = vcmask 1040384   ;;  %vm143_vm4 = vcmask 1042434  }
  0x14   :  { %v1942_v5 = vld [vmem:[#allocation6 + $0x2e0] sm:$0xf]  ;;  %v2178_v6 = vld [vmem:[#allocation6 + $0x2ec] sm:$0xf0]  ;;  %v1815_v7 = vor.u32 %v2146_v4, %v1814_v2  ;;  %vm145_vm5 = vcmask 1041408  }
  0x15   :  { %v1943_v8 = vor.u32 %v2178_v6, %v1942_v5  ;;  %v2070_v9 = vld [vmem:[#allocation6 + $0x3e0] sm:$0xf]  ;;  %v2210_v10 = vld [vmem:[#allocation6 + $0x3ec] sm:$0xf0]  ;;  %1316 = vmatpush.bf16.msra.mxu0 %v1687_v3 }
  0x16   :  { %v1670_v11 = vld [vmem:[#allocation6 + $0xc0] sm:$0xf]  ;;  %v2071_v12 = vor.u32 %v2210_v10, %v2070_v9  ;;  %v2110_v13 = vld [vmem:[#allocation6 + $0xcc] sm:$0xf0]  ;;  %1330 = vmatpush.bf16.msra.mxu1 %v1815_v7 }
  0x17   :  { %v1798_v14 = vld [vmem:[#allocation6 + $0x1c0] sm:$0xf]  ;;  %v2142_v15 = vld [vmem:[#allocation6 + $0x1cc] sm:$0xf0]  ;;  %1344 = vmatpush.bf16.msra.mxu2 %v1943_v8  ;;  %v1671_v16 = vor.u32 %v2110_v13, %v1670_v11 }
  0x18   :  { %v1799_v17 = vor.u32 %v2142_v15, %v1798_v14  ;;  %v1926_v18 = vld [vmem:[#allocation6 + $0x2c0] sm:$0xf]  ;;  %v2174_v19 = vld [vmem:[#allocation6 + $0x2cc] sm:$0xf0]  ;;  %1358 = vmatpush.bf16.msra.mxu3 %v2071_v12 }
  0x19   :  { %v2054_v20 = vld [vmem:[#allocation6 + $0x3c0] sm:$0xf]  ;;  %v1927_v21 = vor.u32 %v2174_v19, %v1926_v18  ;;  %v2206_v22 = vld [vmem:[#allocation6 + $0x3cc] sm:$0xf0]  ;;  %1317 = vmatpush.bf16.msra.mxu0 %v1671_v16 }
  0x1a   :  { %v1654_v23 = vld [vmem:[#allocation6 + $0xa0] sm:$0xf]  ;;  %v2106_v24 = vld [vmem:[#allocation6 + $0xac] sm:$0xf0]  ;;  %v2055_v25 = vor.u32 %v2206_v22, %v2054_v20  ;;  %1331 = vmatpush.bf16.msra.mxu1 %v1799_v17 }
  0x1b   :  { %v1782_v26 = vld [vmem:[#allocation6 + $0x1a0] sm:$0xf]  ;;  %v2138_v27 = vld [vmem:[#allocation6 + $0x1ac] sm:$0xf0]  ;;  %v1655_v29 = vor.u32 %v2106_v24, %v1654_v23  ;;  %1345 = vmatpush.bf16.msra.mxu2 %v1927_v21 }
  0x1c   :  { %v1910_v28 = vld [vmem:[#allocation6 + $0x2a0] sm:$0xf]  ;;  %v2170_v30 = vld [vmem:[#allocation6 + $0x2ac] sm:$0xf0]  ;;  %v1783_v33 = vor.u32 %v2138_v27, %v1782_v26  ;;  %1359 = vmatpush.bf16.msra.mxu3 %v2055_v25 }
  0x1d   :  { %v2038_v31 = vld [vmem:[#allocation6 + $0x3a0] sm:$0xf]  ;;  %v2202_v32 = vld [vmem:[#allocation6 + $0x3ac] sm:$0xf0]  ;;  %v1911_v34 = vor.u32 %v2170_v30, %v1910_v28  ;;  %1318 = vmatpush.bf16.msra.mxu0 %v1655_v29  ;;  %v2112_v28 = vld [vmem:[#allocation6 + $0xe4] sm:$0xf] }
  0x1e   :  { %v1638_v35 = vld [vmem:[#allocation6 + $0x80] sm:$0xf]  ;;  %v2102_v36 = vld [vmem:[#allocation6 + $0x8c] sm:$0xf0]  ;;  %v2039_v38 = vor.u32 %v2202_v32, %v2038_v31  ;;  %1332 = vmatpush.bf16.msra.mxu1 %v1783_v33  ;;  %v1688_v29 = vld [vmem:[#allocation6 + $0xf0] sm:$0xf0] }
  0x1f   :  { %v1766_v37 = vld [vmem:[#allocation6 + $0x180] sm:$0xf]  ;;  %v2134_v39 = vld [vmem:[#allocation6 + $0x18c] sm:$0xf0]  ;;  %v1639_v44 = vor.u32 %v2102_v36, %v1638_v35  ;;  %1346 = vmatpush.bf16.msra.mxu2 %v1911_v34  ;;  %v2144_v30 = vld [vmem:[#allocation6 + $0x1e4] sm:$0xf] }
  0x20   :  { %v1894_v40 = vld [vmem:[#allocation6 + $0x280] sm:$0xf]  ;;  %v2166_v41 = vld [vmem:[#allocation6 + $0x28c] sm:$0xf0]  ;;  %v1767_v45 = vor.u32 %v2134_v39, %v1766_v37  ;;  %1360 = vmatpush.bf16.msra.mxu3 %v2039_v38  ;;  %v1816_v32 = vld [vmem:[#allocation6 + $0x1f0] sm:$0xf0] }
  0x21   :  { %v2022_v42 = vld [vmem:[#allocation6 + $0x380] sm:$0xf]  ;;  %v2198_v43 = vld [vmem:[#allocation6 + $0x38c] sm:$0xf0]  ;;  %v1895_v46 = vor.u32 %v2166_v41, %v1894_v40  ;;  %1319 = vmatpush.bf16.msra.mxu0 %v1639_v44  ;;  %v2176_v33 = vld [vmem:[#allocation6 + $0x2e4] sm:$0xf]  ;;  %v1691_v40 = vor.u32 %v2112_v28, %v1688_v29  ;;  %v1819_v41 = vor.u32 %v2144_v30, %v1816_v32 }
  0x22   :  { %v1622_v47 = vld [vmem:[#allocation6 + $0x60] sm:$0xf]  ;;  %v2098_v48 = vld [vmem:[#allocation6 + $0x6c] sm:$0xf0]  ;;  %v2023_v50 = vor.u32 %v2198_v43, %v2022_v42  ;;  %1333 = vmatpush.bf16.msra.mxu1 %v1767_v45  ;;  %v1944_v34 = vld [vmem:[#allocation6 + $0x2f0] sm:$0xf0] }
  0x23   :  { %v1750_v49 = vld [vmem:[#allocation6 + $0x160] sm:$0xf]  ;;  %v2130_v51 = vld [vmem:[#allocation6 + $0x16c] sm:$0xf0]  ;;  %v1623_v56 = vor.u32 %v2098_v48, %v1622_v47  ;;  %1347 = vmatpush.bf16.msra.mxu2 %v1895_v46  ;;  %v2208_v37 = vld [vmem:[#allocation6 + $0x3e4] sm:$0xf]  ;;  %v1947_v42 = vor.u32 %v2176_v33, %v1944_v34 }
  0x24   :  { %v1878_v52 = vld [vmem:[#allocation6 + $0x260] sm:$0xf]  ;;  %v2162_v53 = vld [vmem:[#allocation6 + $0x26c] sm:$0xf0]  ;;  %v1751_v57 = vor.u32 %v2130_v51, %v1750_v49  ;;  %1361 = vmatpush.bf16.msra.mxu3 %v2023_v50  ;;  %v2072_v38 = vld [vmem:[#allocation6 + $0x3f0] sm:$0xf0] }
  0x25   :  { %v2006_v54 = vld [vmem:[#allocation6 + $0x360] sm:$0xf]  ;;  %v2194_v55 = vld [vmem:[#allocation6 + $0x36c] sm:$0xf0]  ;;  %v1879_v58 = vor.u32 %v2162_v53, %v1878_v52  ;;  %1320 = vmatpush.bf16.msra.mxu0 %v1623_v56  ;;  %v2108_v43 = vld [vmem:[#allocation6 + $0xc4] sm:$0xf]  ;;  %v2075_v46 = vor.u32 %v2208_v37, %v2072_v38 }
  0x26   :  { %v1606_v59 = vld [vmem:[#allocation6 + $0x40] sm:$0xf]  ;;  %v2094_v60 = vld [vmem:[#allocation6 + $0x4c] sm:$0xf0]  ;;  %v2007_v62 = vor.u32 %v2194_v55, %v2006_v54  ;;  %1334 = vmatpush.bf16.msra.mxu1 %v1751_v57  ;;  %v1672_v44 = vld [vmem:[#allocation6 + $0xd0] sm:$0xf0] }
  0x27   :  { %v1734_v61 = vld [vmem:[#allocation6 + $0x140] sm:$0xf]  ;;  %v2126_v63 = vld [vmem:[#allocation6 + $0x14c] sm:$0xf0]  ;;  %v1607_v4 = vor.u32 %v2094_v60, %v1606_v59  ;;  %1348 = vmatpush.bf16.msra.mxu2 %v1879_v58  ;;  %v2140_v45 = vld [vmem:[#allocation6 + $0x1c4] sm:$0xf]  ;;  %v1675_v52 = vor.u32 %v2108_v43, %v1672_v44 }
  0x28   :  { %v1862_v0 = vld [vmem:[#allocation6 + $0x240] sm:$0xf]  ;;  %v2158_v1 = vld [vmem:[#allocation6 + $0x24c] sm:$0xf0]  ;;  %v1735_v5 = vor.u32 %v2126_v63, %v1734_v61  ;;  %1362 = vmatpush.bf16.msra.mxu3 %v2007_v62  ;;  %v1800_v47 = vld [vmem:[#allocation6 + $0x1d0] sm:$0xf0] }
  0x29   :  { %v1990_v2 = vld [vmem:[#allocation6 + $0x340] sm:$0xf]  ;;  %v2190_v3 = vld [vmem:[#allocation6 + $0x34c] sm:$0xf0]  ;;  %v1863_v6 = vor.u32 %v2158_v1, %v1862_v0  ;;  %1321 = vmatpush.bf16.msra.mxu0 %v1607_v4  ;;  %v2172_v48 = vld [vmem:[#allocation6 + $0x2c4] sm:$0xf]  ;;  %v1803_v53 = vor.u32 %v2140_v45, %v1800_v47 }
  0x2a   :  { %v1590_v7 = vld [vmem:[#allocation6 + $0x20] sm:$0xf]  ;;  %v2090_v8 = vld [vmem:[#allocation6 + $0x2c] sm:$0xf0]  ;;  %v1991_v10 = vor.u32 %v2190_v3, %v1990_v2  ;;  %1335 = vmatpush.bf16.msra.mxu1 %v1735_v5  ;;  %v1928_v49 = vld [vmem:[#allocation6 + $0x2d0] sm:$0xf0] }
  0x2b   :  { %v1718_v9 = vld [vmem:[#allocation6 + $0x120] sm:$0xf]  ;;  %v2122_v11 = vld [vmem:[#allocation6 + $0x12c] sm:$0xf0]  ;;  %v1591_v16 = vor.u32 %v2090_v8, %v1590_v7  ;;  %1349 = vmatpush.bf16.msra.mxu2 %v1863_v6  ;;  %v2204_v50 = vld [vmem:[#allocation6 + $0x3c4] sm:$0xf]  ;;  %v1931_v54 = vor.u32 %v2172_v48, %v1928_v49 }
  0x2c   :  { %v1846_v12 = vld [vmem:[#allocation6 + $0x220] sm:$0xf]  ;;  %v2154_v13 = vld [vmem:[#allocation6 + $0x22c] sm:$0xf0]  ;;  %v1719_v19 = vor.u32 %v2122_v11, %v1718_v9  ;;  %1363 = vmatpush.bf16.msra.mxu3 %v1991_v10  ;;  %v2056_v51 = vld [vmem:[#allocation6 + $0x3d0] sm:$0xf0] }
  0x2d   :  { %v1974_v14 = vld [vmem:[#allocation6 + $0x320] sm:$0xf]  ;;  %v2186_v15 = vld [vmem:[#allocation6 + $0x32c] sm:$0xf0]  ;;  %v1847_v20 = vor.u32 %v2154_v13, %v1846_v12  ;;  %1322 = vmatpush.bf16.msra.mxu0 %v1591_v16  ;;  %v2104_v55 = vld [vmem:[#allocation6 + $0xa4] sm:$0xf]  ;;  %v2059_v58 = vor.u32 %v2204_v50, %v2056_v51 }
  0x2e   :  { %v1574_v17 = vld [vmem:[#allocation6] sm:$0xf]  ;;  %v2086_v18 = vld [vmem:[#allocation6 + $0xc] sm:$0xf0]  ;;  %v1975_v24 = vor.u32 %v2186_v15, %v1974_v14  ;;  %1336 = vmatpush.bf16.msra.mxu1 %v1719_v19  ;;  %v1656_v56 = vld [vmem:[#allocation6 + $0xb0] sm:$0xf0] }
  0x2f   :  { %v1702_v21 = vld [vmem:[#allocation6 + $0x100] sm:$0xf]  ;;  %v2118_v22 = vld [vmem:[#allocation6 + $0x10c] sm:$0xf0]  ;;  %v1575_v31 = vor.u32 %v2086_v18, %v1574_v17  ;;  %1350 = vmatpush.bf16.msra.mxu2 %v1847_v20  ;;  %v2136_v57 = vld [vmem:[#allocation6 + $0x1a4] sm:$0xf]  ;;  %v1659_v0 = vor.u32 %v2104_v55, %v1656_v56 }
  0x30   :  { %v1830_v23 = vld [vmem:[#allocation6 + $0x200] sm:$0xf]  ;;  %v2150_v25 = vld [vmem:[#allocation6 + $0x20c] sm:$0xf0]  ;;  %v1703_v35 = vor.u32 %v2118_v22, %v1702_v21  ;;  %1364 = vmatpush.bf16.msra.mxu3 %v1975_v24  ;;  %v1784_v59 = vld [vmem:[#allocation6 + $0x1b0] sm:$0xf0] }
  0x31   :  { %v1958_v26 = vld [vmem:[#allocation6 + $0x300] sm:$0xf]  ;;  %v2182_v27 = vld [vmem:[#allocation6 + $0x30c] sm:$0xf0]  ;;  %v1831_v36 = vor.u32 %v2150_v25, %v1830_v23  ;;  %1323 = vmatpush.bf16.msra.mxu0 %v1575_v31  ;;  %v2168_v60 = vld [vmem:[#allocation6 + $0x2a4] sm:$0xf]  ;;  %v1787_v1 = vor.u32 %v2136_v57, %v1784_v59 }
  0x32   :  { %v1959_v39 = vor.u32 %v2182_v27, %v1958_v26  ;;  %1337 = vmatpush.bf16.msra.mxu1 %v1703_v35  ;;  %v1912_v61 = vld [vmem:[#allocation6 + $0x2b0] sm:$0xf0]  ;;  %v2200_v62 = vld [vmem:[#allocation6 + $0x3a4] sm:$0xf] }
  0x33   :  { %1351 = vmatpush.bf16.msra.mxu2 %v1831_v36  ;;  %v2040_v63 = vld [vmem:[#allocation6 + $0x3b0] sm:$0xf0]  ;;  %v1915_v2 = vor.u32 %v2168_v60, %v1912_v61  ;;  %v2100_v3 = vld [vmem:[#allocation6 + $0x84] sm:$0xf] }
  0x34   :  { %1365 = vmatpush.bf16.msra.mxu3 %v1959_v39  ;;  %v1640_v4 = vld [vmem:[#allocation6 + $0x90] sm:$0xf0]  ;;  %v2132_v5 = vld [vmem:[#allocation6 + $0x184] sm:$0xf]  ;;  %v2043_v6 = vor.u32 %v2200_v62, %v2040_v63 }
  0x35   :  { %1372 = vmatpush.bf16.msrb.mxu0 %v1691_v40  ;;  %v1768_v7 = vld [vmem:[#allocation6 + $0x190] sm:$0xf0]  ;;  %v2164_v8 = vld [vmem:[#allocation6 + $0x284] sm:$0xf]  ;;  %v1643_v12 = vor.u32 %v2100_v3, %v1640_v4 }
  0x36   :  { %1386 = vmatpush.bf16.msrb.mxu1 %v1819_v41  ;;  %v1896_v9 = vld [vmem:[#allocation6 + $0x290] sm:$0xf0]  ;;  %v2196_v10 = vld [vmem:[#allocation6 + $0x384] sm:$0xf]  ;;  %v1771_v14 = vor.u32 %v2132_v5, %v1768_v7 }
  0x37   :  { %1400 = vmatpush.bf16.msrb.mxu2 %v1947_v42  ;;  %v2024_v11 = vld [vmem:[#allocation6 + $0x390] sm:$0xf0]  ;;  %v2096_v13 = vld [vmem:[#allocation6 + $0x64] sm:$0xf]  ;;  %v1899_v15 = vor.u32 %v2164_v8, %v1896_v9 }
  0x38   :  { %1414 = vmatpush.bf16.msrb.mxu3 %v2075_v46  ;;  %v1624_v16 = vld [vmem:[#allocation6 + $0x70] sm:$0xf0]  ;;  %v2128_v17 = vld [vmem:[#allocation6 + $0x164] sm:$0xf]  ;;  %v2027_v19 = vor.u32 %v2196_v10, %v2024_v11 }
  0x39   :  { %1373 = vmatpush.bf16.msrb.mxu0 %v1675_v52  ;;  %v1752_v18 = vld [vmem:[#allocation6 + $0x170] sm:$0xf0]  ;;  %v2160_v20 = vld [vmem:[#allocation6 + $0x264] sm:$0xf]  ;;  %v1627_v26 = vor.u32 %v2096_v13, %v1624_v16  ;;  %v2345_v13 = vmov 857870592  }
  0x3a   :  { %1387 = vmatpush.bf16.msrb.mxu1 %v1803_v53  ;;  %v1880_v21 = vld [vmem:[#allocation6 + $0x270] sm:$0xf0]  ;;  %v2192_v23 = vld [vmem:[#allocation6 + $0x364] sm:$0xf]  ;;  %v1755_v27 = vor.u32 %v2128_v17, %v1752_v18 }
  0x3b   :  { %1401 = vmatpush.bf16.msrb.mxu2 %v1931_v54  ;;  %v104_v22 = vld [vmem:[%s2808_s1] sm:$0xff]  ;;  %v1883_v28 = vor.u32 %v2160_v20, %v1880_v21  ;;  %v2092_v29 = vld [vmem:[#allocation6 + $0x44] sm:$0xf] }
  0x3c   :  { %1415 = vmatpush.bf16.msrb.mxu3 %v2059_v58  ;;  %v2008_v24 = vld [vmem:[#allocation6 + $0x370] sm:$0xf0]  ;;  %v2396_v25 = vmul.f32 0.125, %v104_v22  ;;  %v2124_v31 = vld [vmem:[#allocation6 + $0x144] sm:$0xf] }
  0x3d   :  { %1374 = vmatpush.bf16.msrb.mxu0 %v1659_v0  ;;  %v1608_v30 = vld [vmem:[#allocation6 + $0x50] sm:$0xf0]  ;;  %v2011_v33 = vor.u32 %v2192_v23, %v2008_v24  ;;  %v2156_v35 = vld [vmem:[#allocation6 + $0x244] sm:$0xf] }
  0x3e   :  { %1388 = vmatpush.bf16.msrb.mxu1 %v1787_v1  ;;  %v106_v32 = vmul.f32 %v2396_v25, %v2396_v25  ;;  %v1736_v34 = vld [vmem:[#allocation6 + $0x150] sm:$0xf0]  ;;  %v2188_v37 = vld [vmem:[#allocation6 + $0x344] sm:$0xf]  ;;  %v1611_v40 = vor.u32 %v2092_v29, %v1608_v30 }
  0x3f   :  { %1402 = vmatpush.bf16.msrb.mxu2 %v1915_v2  ;;  %v1864_v36 = vld [vmem:[#allocation6 + $0x250] sm:$0xf0]  ;;  %v1739_v41 = vor.u32 %v2124_v31, %v1736_v34  ;;  %v2088_v43 = vld [vmem:[#allocation6 + $0x24] sm:$0xf] }
  0x40   :  { %1416 = vmatpush.bf16.msrb.mxu3 %v2043_v6  ;;  %v1992_v38 = vld [vmem:[#allocation6 + $0x350] sm:$0xf0]  ;;  %v108_v39 = vrot.slane %v106_v32, 7  ;;  %v1867_v42 = vor.u32 %v2156_v35, %v1864_v36  ;;  %v2120_v45 = vld [vmem:[#allocation6 + $0x124] sm:$0xf] }
  0x41   :  { %1375 = vmatpush.bf16.msrb.mxu0 %v1643_v12  ;;  %v1592_v44 = vld [vmem:[#allocation6 + $0x30] sm:$0xf0]  ;;  %v1995_v47 = vor.u32 %v2188_v37, %v1992_v38  ;;  %v2152_v49 = vld [vmem:[#allocation6 + $0x224] sm:$0xf] }
  0x42   :  { %1389 = vmatpush.bf16.msrb.mxu1 %v1771_v14  ;;  %v110_v46 = vsub.f32 %v2396_v25, %v108_v39  ;;  %v1720_v48 = vld [vmem:[#allocation6 + $0x130] sm:$0xf0]  ;;  %v2184_v51 = vld [vmem:[#allocation6 + $0x324] sm:$0xf]  ;;  %v1595_v54 = vor.u32 %v2088_v43, %v1592_v44  ;;  %v132_v14 = vunpack.c.l.s4 %v2345_v13 }
  0x43   :  { %1403 = vmatpush.bf16.msrb.mxu2 %v1899_v15  ;;  %v1848_v50 = vld [vmem:[#allocation6 + $0x230] sm:$0xf0]  ;;  %v1723_v55 = vor.u32 %v2120_v45, %v1720_v48  ;;  %v2084_v57 = vld [vmem:[#allocation6 + $0x4] sm:$0xf]  ;;  %v111_v15 = vld [vmem:[#allocation2] sm:$0xf] }
  0x44   :  { %1417 = vmatpush.bf16.msrb.mxu3 %v2027_v19  ;;  %v1976_v52 = vld [vmem:[#allocation6 + $0x330] sm:$0xf0]  ;;  %v112_v53 = vadd.f32 1e-05, %v110_v46  ;;  %v1851_v56 = vor.u32 %v2152_v49, %v1848_v50  ;;  %v2116_v59 = vld [vmem:[#allocation6 + $0x104] sm:$0xf]  ;;  %v133_v16 = vunpack.c.0.s8 %v132_v14 }
  0x45   :  { %1376 = vmatpush.bf16.msrb.mxu0 %v1627_v26  ;;  %v1576_v58 = vld [vmem:[#allocation6 + $0x10] sm:$0xf0]  ;;  %v1979_v60 = vor.u32 %v2184_v51, %v1976_v52  ;;  %v2148_v62 = vld [vmem:[#allocation6 + $0x204] sm:$0xf]  ;;  %v2440_v51 = vld [vmem:[%s2807_s0 + $0x8] sm:$0xff] }
  0x46   :  { %1390 = vmatpush.bf16.msrb.mxu1 %v1755_v27  ;;  %2219 = vrsqrt.f32 %v112_v53  ;;  %v1704_v61 = vld [vmem:[#allocation6 + $0x110] sm:$0xf0]  ;;  %v2180_v0 = vld [vmem:[#allocation6 + $0x304] sm:$0xf]  ;;  %v1579_v2 = vor.u32 %v2084_v57, %v1576_v58  ;;  %vm119_vm0 = vweird.f32 %v112_v53  ;;  %v90_v58 = vunpack.c.l.bf16 %v2440_v51 }
  0x47   :  { %1404 = vmatpush.bf16.msrb.mxu2 %v1883_v28  ;;  %v1832_v63 = vld [vmem:[#allocation6 + $0x210] sm:$0xf0]  ;;  %v1707_v3 = vor.u32 %v2116_v59, %v1704_v61  ;;  %v2462_v61 = vld [vmem:[%s2807_s0 + $0x28] sm:$0xff] }
  0x48   :  { %1418 = vmatpush.bf16.msrb.mxu3 %v2011_v33  ;;  %v1960_v1 = vld [vmem:[#allocation6 + $0x310] sm:$0xf0]  ;;  %v1835_v4 = vor.u32 %v2148_v62, %v1832_v63  ;;  %v129_v33 = vld [vmem:[#allocation4] sm:$0xf] }
  0x49   :  { %1377 = vmatpush.bf16.msrb.mxu0 %v1611_v40  ;;  %v1963_v5 = vor.u32 %v2180_v0, %v1960_v1  ;;  %v80_v18 = vld [vmem:[%s2807_s0] sm:$0xff] }
  0x4a   :  { %1391 = vmatpush.bf16.msrb.mxu1 %v1739_v41  ;;  %v84_v20 = vld [vmem:[%s2807_s0 + $0x20] sm:$0xff]  ;;  %v88_v22 = vunpack.c.l.bf16 %v80_v18  ;;  %v89_v27 = vunpack.c.h.bf16 %v80_v18 }
  0x4b   :  { %1405 = vmatpush.bf16.msrb.mxu2 %v1867_v42  ;;  %v96_v23 = vunpack.c.l.bf16 %v84_v20  ;;  %v97_v28 = vunpack.c.h.bf16 %v84_v20 }
  0x4c   :  { %1419 = vmatpush.bf16.msrb.mxu3 %v1995_v47  ;;  %v2220_v6 = vpop.eup %2219 }
  0x4d   :  { %1378 = vmatpush.bf16.msrb.mxu0 %v1595_v54  ;;  %v114_v7 = vmul.f32 %v2220_v6, %v112_v53  ;;  %vm120_vm1 = vweird.f32 %v2220_v6 }
  0x4e   :  { %1392 = vmatpush.bf16.msrb.mxu1 %v1723_v55  ;;  %vm121_vm2 = vmor %vm119_vm0, %vm120_vm1 }
  0x4f   :  { %1406 = vmatpush.bf16.msrb.mxu2 %v1851_v56  ;;  %v115_v8 = vmul.f32 %v2220_v6, %v114_v7 }
  0x50   :  { %1420 = vmatpush.bf16.msrb.mxu3 %v1979_v60 }
  0x51   :  { %1379 = vmatpush.bf16.msrb.mxu0 %v1579_v2  ;;  %v116_v9 = vmul.f32 0.5, %v115_v8 }
  0x52   :  { %1393 = vmatpush.bf16.msrb.mxu1 %v1707_v3 }
  0x53   :  { %1407 = vmatpush.bf16.msrb.mxu2 %v1835_v4  ;;  %v117_v10 = vsub.f32 1.5, %v116_v9  ;;  %v98_v9 = vunpack.c.l.bf16 %v2462_v61 }
  0x54   :  { %1421 = vmatpush.bf16.msrb.mxu3 %v1963_v5 }
  0x55   :  { %v118_v11 = vmul.f32 %v2220_v6, %v117_v10 }
  0x57   :  { %v122_v12 = vsel %vm121_vm2, %v2220_v6, %v118_v11 }
  0x58   :  { %124 = vst [vmem:[#allocation1] sm:$0xff] %v122_v12 }
  0x5f   :  { %v126_v17 = vld [vmem:[#allocation1 + $0x1] ss:$2 sm:$0xff] }
  0x60   :  { %v2404_v19 = vmul.f32 %v126_v17, %v111_v15 }
  0x62   :  { %v134_v21 = vperm.slane %v2404_v19, %v133_v16  ;;  %v149_v26 = vperm.slane %v2404_v19, 0  ;;  %v150_v32 = vperm.slane %v2404_v19, 1  ;;  %v151_v62 = vperm.slane %v2404_v19, 2 }
  0x64   :  { %v136_v24 = vmul.f32 %v134_v21, %v2396_v25  ;;  %v157_v37 = vmul.f32 %v149_v26, %v88_v22  ;;  %v161_v25 = vmul.f32 %v149_v26, %v96_v23  ;;  %v158_v39 = vmul.f32 %v150_v32, %v89_v27 }
  0x65   :  { %v162_v40 = vmul.f32 %v150_v32, %v97_v28  ;;  %v159_v13 = vmul.f32 %v151_v62, %v90_v58  ;;  %v163_v27 = vmul.f32 %v151_v62, %v98_v9 }
  0x66   :  { %v138_v29 = vrot.slane %v136_v24, 1  ;;  %v139_v30 = vrot.slane %v136_v24, 2  ;;  %v140_v31 = vrot.slane %v136_v24, 3 }
  0x68   :  { %v142_v34 = vsel %vm141_vm3, %v136_v24, %v138_v29  ;;  %v144_v35 = vsel %vm143_vm4, %v139_v30, %v140_v31 }
  0x69   :  { %v146_v36 = vsel %vm145_vm5, %v142_v34, %v144_v35 }
  0x6a   :  { %v2413_v38 = vsub.f32 %v129_v33, %v146_v36 }
  0x6c   :  { %v166_v41 = vperm.slane %v2413_v38, 0  ;;  %v167_v42 = vperm.slane %v2413_v38, 1  ;;  %v168_v63 = vperm.slane %v2413_v38, 2 }
  0x6e   :  { %v2417_v43 = vadd.f32 %v166_v41, %v157_v37  ;;  %v2419_v44 = vadd.f32 %v166_v41, %v161_v25  ;;  %v2421_v45 = vadd.f32 %v167_v42, %v158_v39  ;;  %v2423_v46 = vadd.f32 %v167_v42, %v162_v40 }
  0x6f   :  { %v2481_v31 = vadd.f32 %v168_v63, %v159_v13 }
  0x70   :  { %v2426_v47 = vmul.f32 0.70710677, %v2417_v43  ;;  %v2429_v48 = vmul.f32 0.70710677, %v2419_v44  ;;  %v2432_v49 = vmul.f32 0.70710677, %v2421_v45 }
  0x71   :  { %v2435_v50 = vmul.f32 0.70710677, %v2423_v46  ;;  %v2493_v58 = vmul.f32 0.70710677, %v2481_v31 }
  0x72   :  { %v198_v52 = vmul.f32 %v2426_v47, %v2426_v47  ;;  %v358_v53 = vmul.f32 %v2429_v48, %v2429_v48  ;;  %v238_v54 = vmul.f32 %v2432_v49, %v2432_v49 }
  0x73   :  { %v398_v55 = vmul.f32 %v2435_v50, %v2435_v50 }
  0x74   :  { %v2450_v56 = vmin.f32 %v198_v52, 16.0  ;;  %v2452_v57 = vmin.f32 %v358_v53, 16.0  ;;  %v2455_v59 = vmin.f32 %v238_v54, 16.0 }
  0x75   :  { %v2457_v60 = vmin.f32 %v398_v55, 16.0  ;;  %v2490_v55 = vadd.f32 %v168_v63, %v163_v27 }
  0x76   :  { %v200_v0 = vmul.f32 2.1237322e-06, %v2450_v56  ;;  %v211_v1 = vmul.f32 3.8918573e-05, %v2450_v56  ;;  %v360_v2 = vmul.f32 2.1237322e-06, %v2452_v57 }
  0x77   :  { %v371_v3 = vmul.f32 3.8918573e-05, %v2452_v57  ;;  %v240_v4 = vmul.f32 2.1237322e-06, %v2455_v59  ;;  %v251_v5 = vmul.f32 3.8918573e-05, %v2455_v59 }
  0x78   :  { %v201_v6 = vadd.f32 0.00028619796, %v200_v0  ;;  %v212_v7 = vadd.f32 0.001143296, %v211_v1  ;;  %v361_v8 = vadd.f32 0.00028619796, %v360_v2 }
  0x79   :  { %v372_v10 = vadd.f32 0.001143296, %v371_v3  ;;  %v241_v11 = vadd.f32 0.00028619796, %v240_v4  ;;  %v252_v12 = vadd.f32 0.001143296, %v251_v5 }
  0x7a   :  { %v202_v14 = vmul.f32 %v201_v6, %v2450_v56  ;;  %v213_v15 = vmul.f32 %v212_v7, %v2450_v56  ;;  %v362_v16 = vmul.f32 %v361_v8, %v2452_v57  ;;  %v400_v17 = vmul.f32 2.1237322e-06, %v2457_v60 }
  0x7b   :  { %v373_v18 = vmul.f32 %v372_v10, %v2452_v57  ;;  %v242_v20 = vmul.f32 %v241_v11, %v2455_v59  ;;  %v253_v21 = vmul.f32 %v252_v12, %v2455_v59  ;;  %v411_v22 = vmul.f32 3.8918573e-05, %v2457_v60 }
  0x7c   :  { %v203_v23 = vadd.f32 0.0036580483, %v202_v14  ;;  %v214_v24 = vadd.f32 0.014752088, %v213_v15  ;;  %v363_v26 = vadd.f32 0.0036580483, %v362_v16 }
  0x7d   :  { %v374_v28 = vadd.f32 0.014752088, %v373_v18  ;;  %v243_v29 = vadd.f32 0.0036580483, %v242_v20  ;;  %v254_v30 = vadd.f32 0.014752088, %v253_v21 }
  0x7e   :  { %v204_v32 = vmul.f32 %v203_v23, %v2450_v56  ;;  %v215_v33 = vmul.f32 %v214_v24, %v2450_v56  ;;  %v364_v34 = vmul.f32 %v363_v26, %v2452_v57  ;;  %v401_v35 = vadd.f32 0.00028619796, %v400_v17 }
  0x7f   :  { %v375_v36 = vmul.f32 %v374_v28, %v2452_v57  ;;  %v244_v37 = vmul.f32 %v243_v29, %v2455_v59  ;;  %v255_v25 = vmul.f32 %v254_v30, %v2455_v59  ;;  %v412_v39 = vadd.f32 0.001143296, %v411_v22 }
  0x80   :  { %v205_v40 = vadd.f32 0.05243302, %v204_v32  ;;  %v216_v41 = vadd.f32 0.112945676, %v215_v33  ;;  %v365_v42 = vadd.f32 0.05243302, %v364_v34  ;;  %v402_v52 = vmul.f32 %v401_v35, %v2457_v60 }
  0x81   :  { %v376_v53 = vadd.f32 0.112945676, %v375_v36  ;;  %v245_v54 = vadd.f32 0.05243302, %v244_v37  ;;  %v256_v2 = vadd.f32 0.112945676, %v255_v25  ;;  %v413_v6 = vmul.f32 %v412_v39, %v2457_v60 }
  0x82   :  { %v206_v62 = vmul.f32 %v205_v40, %v2450_v56  ;;  %v217_v0 = vmul.f32 %v216_v41, %v2450_v56  ;;  %v366_v1 = vmul.f32 %v365_v42, %v2452_v57  ;;  %v403_v5 = vadd.f32 0.0036580483, %v402_v52 }
  0x83   :  { %v377_v3 = vmul.f32 %v376_v53, %v2452_v57  ;;  %v246_v4 = vmul.f32 %v245_v54, %v2455_v59  ;;  %v257_v9 = vmul.f32 %v256_v2, %v2455_v59  ;;  %v414_v13 = vadd.f32 0.014752088, %v413_v6 }
  0x84   :  { %v207_v7 = vadd.f32 0.18741608, %v206_v62  ;;  %v218_v63 = vadd.f32 0.4994258, %v217_v0  ;;  %v367_v8 = vadd.f32 0.18741608, %v366_v1  ;;  %v404_v12 = vmul.f32 %v403_v5, %v2457_v60 }
  0x85   :  { %v378_v10 = vadd.f32 0.4994258, %v377_v3  ;;  %v247_v11 = vadd.f32 0.18741608, %v246_v4  ;;  %v258_v17 = vadd.f32 0.4994258, %v257_v9  ;;  %v415_v21 = vmul.f32 %v414_v13, %v2457_v60 }
  0x86   :  { %v208_v14 = vmul.f32 %v207_v7, %v2450_v56  ;;  %v219_v15 = vmul.f32 %v218_v63, %v2450_v56  ;;  %v368_v16 = vmul.f32 %v367_v8, %v2452_v57  ;;  %v405_v20 = vadd.f32 0.05243302, %v404_v12 }
  0x87   :  { %v379_v18 = vmul.f32 %v378_v10, %v2452_v57  ;;  %v2509_v22 = vmul.f32 0.70710677, %v2490_v55  ;;  %v2512_v23 = vmul.f32 0.5, %v2417_v43  ;;  %v248_v26 = vmul.f32 %v247_v11, %v2455_v59 }
  0x88   :  { %v220_v24 = vadd.f32 1.0, %v219_v15  ;;  %v278_v56 = vmul.f32 %v2493_v58, %v2493_v58  ;;  %v259_v28 = vmul.f32 %v258_v17, %v2455_v59  ;;  %v406_v57 = vmul.f32 %v405_v20, %v2457_v60 }
  0x89   :  { %v380_v27 = vadd.f32 1.0, %v379_v18  ;;  %v416_v29 = vadd.f32 0.112945676, %v415_v21  ;;  %v2520_v30 = vmul.f32 0.5, %v2419_v44  ;;  %v209_v32 = vadd.f32 1.1283791, %v208_v14 }
  0x8a   :  { %2221 = vrcp.f32 %v220_v24  ;;  %v369_v33 = vadd.f32 1.1283791, %v368_v16  ;;  %v230_v43 = vand.u32 2147483647, %v220_v24  ;;  %v232_v34 = vand.u32 2147483648, %v220_v24 }
  0x8b   :  { %2223 = vrcp.f32 %v380_v27  ;;  %v438_v35 = vmul.f32 %v2509_v22, %v2509_v22  ;;  %v249_v36 = vadd.f32 1.1283791, %v248_v26  ;;  %v2524_v37 = vmin.f32 %v278_v56, 16.0 }
  0x8c   :  { %v91_v59 = vunpack.c.h.bf16 %v2440_v51  ;;  %v99_v25 = vunpack.c.h.bf16 %v2462_v61  ;;  %v390_v39 = vand.u32 2147483647, %v380_v27  ;;  %v2528_v40 = vadd.f32 1.0, %v259_v28 }
  0x8d   :  { %v407_v44 = vadd.f32 0.18741608, %v406_v57  ;;  %v417_v41 = vmul.f32 %v416_v29, %v2457_v60  ;;  %v210_v42 = vmul.f32 %v209_v32, %v2426_v47  ;;  %vm226_vm6 = vweird.f32 %v220_v24 }
  0x8e   :  { %v370_v52 = vmul.f32 %v369_v33, %v2429_v48  ;;  %vm386_vm7 = vweird.f32 %v380_v27  ;;  %vm2533_vm8 = vcmp.eq.f32.partialorder %v230_v43, 8.507059e+37  ;;  %v233_v54 = vor.u32 1.1754944e-38, %v232_v34 }
  0x8f   :  { %v392_v62 = vand.u32 2147483648, %v380_v27  ;;  %2225 = vrcp.f32 %v2528_v40  ;;  %v2539_v1 = vmul.f32 %v249_v36, %v2432_v49  ;;  %v418_v2 = vadd.f32 0.4994258, %v417_v41 }
  0x90   :  { %v2222_v0 = vpop.eup %2221  ;;  %v280_v3 = vmul.f32 2.1237322e-06, %v2524_v37  ;;  %v291_v47 = vmul.f32 3.8918573e-05, %v2524_v37  ;;  %vm2543_vm9 = vcmp.eq.f32.partialorder %v390_v39, 8.507059e+37  ;;  %v408_v7 = vmul.f32 %v407_v44, %v2457_v60 }
  0x91   :  { %v2224_v4 = vpop.eup %2223  ;;  %v222_v48 = vmul.f32 %v2222_v0, %v220_v24  ;;  %v270_v6 = vand.u32 2147483647, %v2528_v40  ;;  %vm227_vm10 = vweird.f32 %v2222_v0  ;;  %v272_v49 = vand.u32 2147483648, %v2528_v40 }
  0x92   :  { %v382_v63 = vmul.f32 %v2224_v4, %v380_v27  ;;  %v419_v8 = vmul.f32 %v418_v2, %v2457_v60  ;;  %v281_v10 = vadd.f32 0.00028619796, %v280_v3  ;;  %v292_v11 = vadd.f32 0.001143296, %v291_v47  ;;  %vm2557_vm12 = vmor %vm226_vm6, %vm227_vm10 }
  0x93   :  { %v223_v9 = vsub.f32 1.0, %v222_v48  ;;  %v2551_v12 = vmin.f32 %v438_v35, 16.0  ;;  %vm387_vm11 = vweird.f32 %v2224_v4  ;;  %v393_v14 = vor.u32 1.1754944e-38, %v392_v62 }
  0x94   :  { %v383_v13 = vsub.f32 1.0, %v382_v63  ;;  %v420_v15 = vadd.f32 1.0, %v419_v8  ;;  %v409_v18 = vadd.f32 1.1283791, %v408_v7  ;;  %v293_v20 = vmul.f32 %v292_v11, %v2524_v37  ;;  %vm2564_vm13 = vmor %vm386_vm7, %vm387_vm11 }
  0x95   :  { %v2226_v16 = vpop.eup %2225  ;;  %v224_v17 = vmul.f32 %v2222_v0, %v223_v9  ;;  %v440_v21 = vmul.f32 2.1237322e-06, %v2551_v12  ;;  %v282_v28 = vmul.f32 %v281_v10, %v2524_v37  ;;  %vm266_vm14 = vweird.f32 %v2528_v40 }
  0x96   :  { %v384_v26 = vmul.f32 %v2224_v4, %v383_v13  ;;  %v262_v56 = vmul.f32 %v2226_v16, %v2528_v40  ;;  %2227 = vrcp.f32 %v420_v15  ;;  %vm2569_vm15 = vcmp.eq.f32.partialorder %v270_v6, 8.507059e+37 }
  0x97   :  { %v225_v57 = vadd.f32 %v2222_v0, %v224_v17  ;;  %v273_v32 = vor.u32 1.1754944e-38, %v272_v49  ;;  %vm267_vm0 = vweird.f32 %v2226_v16  ;;  %v294_v34 = vadd.f32 0.014752088, %v293_v20 }
  0x98   :  { %v385_v33 = vadd.f32 %v2224_v4, %v384_v26  ;;  %v263_v43 = vsub.f32 1.0, %v262_v56  ;;  %v410_v27 = vmul.f32 %v409_v18, %v2435_v50  ;;  %vm426_vm1 = vweird.f32 %v420_v15  ;;  %vm2584_vm2 = vmor %vm266_vm14, %vm267_vm0 }
  0x99   :  { %v229_v35 = vsel %vm2557_vm12, %v2222_v0, %v225_v57  ;;  %v441_v36 = vadd.f32 0.00028619796, %v440_v21  ;;  %v283_v62 = vadd.f32 0.0036580483, %v282_v28  ;;  %v430_v50 = vand.u32 2147483647, %v420_v15 }
  0x9a   :  { %v234_v39 = vsel %vm2533_vm8, %v233_v54, %v229_v35  ;;  %v389_v44 = vsel %vm2564_vm13, %v2224_v4, %v385_v33  ;;  %v264_v41 = vmul.f32 %v2226_v16, %v263_v43  ;;  %v295_v47 = vmul.f32 %v294_v34, %v2524_v37 }
  0x9b   :  { %v235_v2 = vmul.f32 %v234_v39, %v210_v42  ;;  %v394_v3 = vsel %vm2543_vm9, %v393_v14, %v389_v44  ;;  %v432_v6 = vand.u32 2147483648, %v420_v15  ;;  %v442_v4 = vmul.f32 %v441_v36, %v2551_v12 }
  0x9c   :  { %v2228_v53 = vpop.eup %2227  ;;  %v395_v54 = vmul.f32 %v394_v3, %v370_v52  ;;  %v265_v48 = vadd.f32 %v2226_v16, %v264_v41  ;;  %v296_v63 = vadd.f32 0.112945676, %v295_v47  ;;  %v451_v5 = vmul.f32 3.8918573e-05, %v2551_v12 }
  0x9d   :  { %v1564_v7 = vclamps-f32 %v235_v2, 1.0  ;;  %v422_v42 = vmul.f32 %v2228_v53, %v420_v15  ;;  %vm427_vm3 = vweird.f32 %v2228_v53  ;;  %v284_v8 = vmul.f32 %v283_v62, %v2524_v37 }
  0x9e   :  { %v1568_v49 = vclamps-f32 %v395_v54, 1.0  ;;  %v269_v40 = vsel %vm2584_vm2, %v2226_v16, %v265_v48  ;;  %v297_v11 = vmul.f32 %v296_v63, %v2524_v37  ;;  %v443_v17 = vadd.f32 0.0036580483, %v442_v4  ;;  %vm2603_vm4 = vmor %vm426_vm1, %vm427_vm3 }
  0x9f   :  { %v518_v9 = vadd.f32 1.0, %v1564_v7  ;;  %v274_v52 = vsel %vm2569_vm15, %v273_v32, %v269_v40  ;;  %v423_v10 = vsub.f32 1.0, %v422_v42  ;;  %v152_v18 = vperm.slane %v2404_v19, 3 }
  0xa0   :  { %v522_v13 = vadd.f32 1.0, %v1568_v49  ;;  %v275_v14 = vmul.f32 %v274_v52, %v2539_v1  ;;  %v298_v16 = vadd.f32 0.4994258, %v297_v11  ;;  %v452_v60 = vadd.f32 0.001143296, %v451_v5 }
  0xa1   :  { %v526_v20 = vmul.f32 %v518_v9, %v2512_v23  ;;  %v424_v21 = vmul.f32 %v2228_v53, %v423_v10  ;;  %vm431_vm5 = vcmp.eq.f32.partialorder %v430_v50, 8.507059e+37  ;;  %v433_v28 = vor.u32 1.1754944e-38, %v432_v6 }
  0xa2   :  { %v530_v26 = vmul.f32 %v522_v13, %v2520_v30  ;;  %v285_v57 = vadd.f32 0.05243302, %v284_v8  ;;  %v1565_v1 = vclamps-f32 %v275_v14, 1.0  ;;  %v299_v19 = vmul.f32 %v298_v16, %v2524_v37 }
  0xa3   :  { %v425_v29 = vadd.f32 %v2228_v53, %v424_v21  ;;  %v453_v23 = vmul.f32 %v452_v60, %v2551_v12  ;;  %v444_v32 = vmul.f32 %v443_v17, %v2551_v12  ;;  %v183_v43 = vmul.f32 0.5, %v2421_v45 }
  0xa4   :  { %v2609_v24 = vpack.c.bf16 %v530_v26, %v526_v20  ;;  %v2614_v15 = vadd.f32 1.0, %v299_v19  ;;  %v286_v35 = vmul.f32 %v285_v57, %v2524_v37  ;;  %v160_v36 = vmul.f32 %v152_v18, %v91_v59 }
  0xa5   :  { %v429_v30 = vsel %vm2603_vm4, %v2228_v53, %v425_v29  ;;  %v454_v33 = vadd.f32 0.014752088, %v453_v23  ;;  %v519_v44 = vadd.f32 1.0, %v1565_v1  ;;  %v164_v41 = vmul.f32 %v152_v18, %v99_v25 }
  0xa6   :  { %1324 = vmatmul.bf16.vlgmr.msra.gmra.mxu0 %v2609_v24  ;;  %v434_v34 = vsel %vm431_vm5, %v433_v28, %v429_v30  ;;  %2229 = vrcp.f32 %v2614_v15  ;;  %v445_v62 = vadd.f32 0.05243302, %v444_v32  ;;  %v169_v3 = vperm.slane %v2413_v38, 3 }
  0xa7   :  { %v435_v39 = vmul.f32 %v434_v34, %v410_v27  ;;  %v455_v2 = vmul.f32 %v454_v33, %v2551_v12  ;;  %v187_v45 = vmul.f32 0.5, %v2423_v46  ;;  %v527_v59 = vmul.f32 %v519_v44, %v183_v43 }
  0xa8   :  { %v2627_v47 = vadd.f32 %v169_v3, %v160_v36  ;;  %v287_v27 = vadd.f32 0.18741608, %v286_v35  ;;  %v2629_v53 = vadd.f32 %v169_v3, %v164_v41  ;;  %v446_v54 = vmul.f32 %v445_v62, %v2551_v12 }
  0xa9   :  { %v1569_v0 = vclamps-f32 %v435_v39, 1.0  ;;  %v456_v50 = vadd.f32 0.112945676, %v455_v2  ;;  %vm306_vm6 = vweird.f32 %v2614_v15  ;;  %v312_v52 = vand.u32 2147483648, %v2614_v15 }
  0xaa   :  { %v2634_v25 = vmul.f32 0.70710677, %v2627_v47  ;;  %v2637_v46 = vmul.f32 0.70710677, %v2629_v53  ;;  %v288_v63 = vmul.f32 %v287_v27, %v2524_v37  ;;  %v447_v40 = vadd.f32 0.18741608, %v446_v54 }
  0xab   :  { %v523_v51 = vadd.f32 1.0, %v1569_v0  ;;  %v457_v61 = vmul.f32 %v456_v50, %v2551_v12  ;;  %v310_v17 = vand.u32 2147483647, %v2614_v15  ;;  %v313_v57 = vor.u32 1.1754944e-38, %v312_v52  ;;  %v2115_v52 = vld [vmem:[#allocation6 + $0xf4] sm:$0xf0] }
  0xac   :  { %v2230_v48 = vpop.eup %2229  ;;  %v318_v7 = vmul.f32 %v2634_v25, %v2634_v25  ;;  %v478_v5 = vmul.f32 %v2637_v46, %v2637_v46  ;;  %v289_v60 = vadd.f32 1.1283791, %v288_v63  ;;  %v448_v26 = vmul.f32 %v447_v40, %v2551_v12 }
  0xad   :  { %v531_v38 = vmul.f32 %v523_v51, %v187_v45  ;;  %v302_v6 = vmul.f32 %v2230_v48, %v2614_v15  ;;  %v458_v4 = vadd.f32 0.4994258, %v457_v61  ;;  %vm307_vm7 = vweird.f32 %v2230_v48 }
  0xae   :  { %v2648_v9 = vmin.f32 %v318_v7, 16.0  ;;  %v2653_v10 = vmin.f32 %v478_v5, 16.0  ;;  %vm2660_vm8 = vmor %vm306_vm6, %vm307_vm7  ;;  %vm311_vm9 = vcmp.eq.f32.partialorder %v310_v17, 8.507059e+37  ;;  %v449_v33 = vadd.f32 1.1283791, %v448_v26 }
  0xaf   :  { %v2642_v42 = vpack.c.bf16 %v531_v38, %v527_v59  ;;  %v303_v49 = vsub.f32 1.0, %v302_v6  ;;  %v459_v8 = vmul.f32 %v458_v4, %v2551_v12  ;;  %v290_v12 = vmul.f32 %v289_v60, %v2493_v58  ;;  %v2103_v6 = vld [vmem:[#allocation6 + $0x94] sm:$0xf0] }
  0xb0   :  { %v320_v13 = vmul.f32 2.1237322e-06, %v2648_v9  ;;  %v331_v14 = vmul.f32 3.8918573e-05, %v2648_v9  ;;  %v480_v18 = vmul.f32 2.1237322e-06, %v2653_v10  ;;  %v450_v5 = vmul.f32 %v449_v33, %v2509_v22 }
  0xb1   :  { %1338 = vmatmul.bf16.vlgmr.msra.gmra.mxu1 %v2642_v42  ;;  %v304_v11 = vmul.f32 %v2230_v48, %v303_v49  ;;  %v460_v37 = vadd.f32 1.0, %v459_v8  ;;  %v491_v20 = vmul.f32 3.8918573e-05, %v2653_v10  ;;  %v1694_v8 = vld [vmem:[#allocation6 + $0xe8] sm:$0xf]  ;;  %vm1551_vm6 = vcmask 130048  }
  0xb2   :  { %v321_v56 = vadd.f32 0.00028619796, %v320_v13  ;;  %v332_v28 = vadd.f32 0.001143296, %v331_v14  ;;  %v481_v1 = vadd.f32 0.00028619796, %v480_v18  ;;  %v1695_v17 = vor.u32 %v2115_v52, %v1694_v8 }
  0xb3   :  { %v305_v21 = vadd.f32 %v2230_v48, %v304_v11  ;;  %2231 = vrcp.f32 %v460_v37  ;;  %v492_v29 = vadd.f32 0.001143296, %v491_v20  ;;  %v470_v39 = vand.u32 2147483647, %v460_v37  ;;  %v1822_v11 = vld [vmem:[#allocation6 + $0x1e8] sm:$0xf] }
  0xb4   :  { %v322_v23 = vmul.f32 %v321_v56, %v2648_v9  ;;  %v333_v32 = vmul.f32 %v332_v28, %v2648_v9  ;;  %v482_v30 = vmul.f32 %v481_v1, %v2653_v10  ;;  %v472_v2 = vand.u32 2147483648, %v460_v37  ;;  %v2147_v18 = vld [vmem:[#allocation6 + $0x1f4] sm:$0xf0]  ;;  %1428 = vmatpush.bf16.msra.mxu0 %v1695_v17 }
  0xb5   :  { %v309_v19 = vsel %vm2660_vm8, %v2230_v48, %v305_v21  ;;  %v493_v15 = vmul.f32 %v492_v29, %v2653_v10  ;;  %vm466_vm10 = vweird.f32 %v460_v37  ;;  %vm2677_vm12 = vcmp.eq.f32.partialorder %v470_v39, 8.507059e+37  ;;  %v2111_v1 = vld [vmem:[#allocation6 + $0xd4] sm:$0xf0]  ;;  %v1806_v29 = vld [vmem:[#allocation6 + $0x1c8] sm:$0xf] }
  0xb6   :  { %1380 = vmatmul.bf16.vlgmr.msrb.gmra.mxu0 %v2609_v24  ;;  %v323_v43 = vadd.f32 0.0036580483, %v322_v23  ;;  %v334_v34 = vadd.f32 0.014752088, %v333_v32  ;;  %v314_v36 = vsel %vm311_vm9, %v313_v57, %v309_v19  ;;  %v483_v44 = vadd.f32 0.0036580483, %v482_v30 }
  0xb7   :  { %v494_v41 = vadd.f32 0.014752088, %v493_v15  ;;  %v315_v50 = vmul.f32 %v314_v36, %v290_v12  ;;  %v473_v4 = vor.u32 1.1754944e-38, %v472_v2  ;;  %v1823_v21 = vor.u32 %v2147_v18, %v1822_v11  ;;  %v1678_v57 = vld [vmem:[#allocation6 + $0xc8] sm:$0xf] }
  0xb8   :  { %v324_v3 = vmul.f32 %v323_v43, %v2648_v9  ;;  %v335_v45 = vmul.f32 %v334_v34, %v2648_v9  ;;  %v484_v0 = vmul.f32 %v483_v44, %v2653_v10  ;;  %v184_v19 = vmul.f32 0.5, %v2481_v31  ;;  %v2143_v15 = vld [vmem:[#allocation6 + $0x1d4] sm:$0xf0]  ;;  %v1950_v31 = vld [vmem:[#allocation6 + $0x2e8] sm:$0xf] }
  0xb9   :  { %v2232_v35 = vpop.eup %2231  ;;  %v495_v58 = vmul.f32 %v494_v41, %v2653_v10  ;;  %1442 = vmatpush.bf16.msra.mxu1 %v1823_v21  ;;  %v188_v12 = vmul.f32 0.5, %v2490_v55  ;;  %v1679_v43 = vor.u32 %v2111_v1, %v1678_v57  ;;  %v1807_v34 = vor.u32 %v2143_v15, %v1806_v29  ;;  %v1662_v55 = vld [vmem:[#allocation6 + $0xa8] sm:$0xf]  ;;  %v2107_v2 = vld [vmem:[#allocation6 + $0xb4] sm:$0xf0] }
  0xba   :  { %v462_v62 = vmul.f32 %v2232_v35, %v460_v37  ;;  %vm467_vm11 = vweird.f32 %v2232_v35  ;;  %v325_v59 = vadd.f32 0.05243302, %v324_v3  ;;  %v336_v27 = vadd.f32 0.112945676, %v335_v45  ;;  %v1790_v3 = vld [vmem:[#allocation6 + $0x1a8] sm:$0xf] }
  0xbb   :  { %v485_v61 = vadd.f32 0.05243302, %v484_v0  ;;  %v496_v48 = vadd.f32 0.112945676, %v495_v58  ;;  %vm2681_vm13 = vmor %vm466_vm10, %vm467_vm11  ;;  %v1566_v37 = vclamps-f32 %v315_v50, 1.0  ;;  %1429 = vmatpush.bf16.msra.mxu0 %v1679_v43  ;;  %v1663_v50 = vor.u32 %v2107_v2, %v1662_v55 }
  0xbc   :  { %v463_v51 = vsub.f32 1.0, %v462_v62  ;;  %v326_v7 = vmul.f32 %v325_v59, %v2648_v9  ;;  %v337_v63 = vmul.f32 %v336_v27, %v2648_v9  ;;  %v2179_v62 = vld [vmem:[#allocation6 + $0x2f4] sm:$0xf0]  ;;  %v1824_v57 = vld [vmem:[#allocation6 + $0x1f8] sm:$0xf0] }
  0xbd   :  { %v486_v49 = vmul.f32 %v485_v61, %v2653_v10  ;;  %v497_v40 = vmul.f32 %v496_v48, %v2653_v10  ;;  %v520_v32 = vadd.f32 1.0, %v1566_v37  ;;  %1443 = vmatpush.bf16.msra.mxu1 %v1807_v34  ;;  %v1951_v59 = vor.u32 %v2179_v62, %v1950_v31  ;;  %v2175_v27 = vld [vmem:[#allocation6 + $0x2d4] sm:$0xf0]  ;;  %v1918_v37 = vld [vmem:[#allocation6 + $0x2a8] sm:$0xf] }
  0xbe   :  { %v464_v38 = vmul.f32 %v2232_v35, %v463_v51  ;;  %v338_v14 = vadd.f32 0.4994258, %v337_v63  ;;  %v327_v22 = vadd.f32 0.18741608, %v326_v7  ;;  %v2135_v8 = vld [vmem:[#allocation6 + $0x194] sm:$0xf0] }
  0xbf   :  { %v498_v20 = vadd.f32 0.4994258, %v497_v40  ;;  %v487_v26 = vadd.f32 0.18741608, %v486_v49  ;;  %v528_v41 = vmul.f32 %v520_v32, %v184_v19  ;;  %1430 = vmatpush.bf16.msra.mxu0 %v1663_v50  ;;  %v2099_v21 = vld [vmem:[#allocation6 + $0x74] sm:$0xf0] }
  0xc0   :  { %v465_v13 = vadd.f32 %v2232_v35, %v464_v38  ;;  %v339_v60 = vmul.f32 %v338_v14, %v2648_v9  ;;  %v328_v36 = vmul.f32 %v327_v22, %v2648_v9  ;;  %v2139_v9 = vld [vmem:[#allocation6 + $0x1b4] sm:$0xf0]  ;;  %v1646_v38 = vld [vmem:[#allocation6 + $0x88] sm:$0xf] }
  0xc1   :  { %1394 = vmatmul.bf16.vlgmr.msrb.gmra.mxu1 %v2642_v42  ;;  %v499_v28 = vmul.f32 %v498_v20, %v2653_v10  ;;  %v488_v39 = vmul.f32 %v487_v26, %v2653_v10  ;;  %v1934_v10 = vld [vmem:[#allocation6 + $0x2c8] sm:$0xf]  ;;  %v1791_v54 = vor.u32 %v2139_v9, %v1790_v3  ;;  %v1647_v40 = vor.u32 %v2103_v6, %v1646_v38  ;;  %v2131_v26 = vld [vmem:[#allocation6 + $0x174] sm:$0xf0] }
  0xc2   :  { %v469_v16 = vsel %vm2681_vm13, %v2232_v35, %v465_v13  ;;  %v2698_v30 = vadd.f32 1.0, %v339_v60  ;;  %v329_v0 = vadd.f32 1.1283791, %v328_v36  ;;  %v2171_v13 = vld [vmem:[#allocation6 + $0x2b4] sm:$0xf0]  ;;  %v1935_v18 = vor.u32 %v2175_v27, %v1934_v10 }
  0xc3   :  { %v474_v56 = vsel %vm2677_vm12, %v473_v4, %v469_v16  ;;  %v2701_v33 = vadd.f32 1.0, %v499_v28  ;;  %v489_v58 = vadd.f32 1.1283791, %v488_v39  ;;  %v1774_v4 = vld [vmem:[#allocation6 + $0x188] sm:$0xf]  ;;  %1444 = vmatpush.bf16.msra.mxu1 %v1791_v54  ;;  %1431 = vmatpush.bf16.msra.mxu0 %v1647_v40  ;;  %v1919_v43 = vor.u32 %v2171_v13, %v1918_v37 }
  0xc4   :  { %v475_v23 = vmul.f32 %v474_v56, %v450_v5  ;;  %2233 = vrcp.f32 %v2698_v30  ;;  %v350_v51 = vand.u32 2147483647, %v2698_v30  ;;  %vm346_vm14 = vweird.f32 %v2698_v30  ;;  %v1630_v20 = vld [vmem:[#allocation6 + $0x68] sm:$0xf]  ;;  %v2127_v62 = vld [vmem:[#allocation6 + $0x154] sm:$0xf0] }
  0xc5   :  { %2235 = vrcp.f32 %v2701_v33  ;;  %v352_v5 = vand.u32 2147483648, %v2698_v30  ;;  %v510_v49 = vand.u32 2147483647, %v2701_v33  ;;  %v512_v11 = vand.u32 2147483648, %v2701_v33  ;;  %v1758_v60 = vld [vmem:[#allocation6 + $0x168] sm:$0xf] }
  0xc6   :  { %v1570_v35 = vclamps-f32 %v475_v23, 1.0  ;;  %v1775_v14 = vor.u32 %v2135_v8, %v1774_v4  ;;  %vm506_vm0 = vweird.f32 %v2701_v33  ;;  %v1631_v22 = vor.u32 %v2099_v21, %v1630_v20  ;;  %v1614_v34 = vld [vmem:[#allocation6 + $0x48] sm:$0xf]  ;;  %v2091_v50 = vld [vmem:[#allocation6 + $0x34] sm:$0xf0] }
  0xc7   :  { %vm2725_vm3 = vcmp.eq.f32.partialorder %v350_v51, 8.507059e+37  ;;  %v1759_v1 = vor.u32 %v2131_v26, %v1758_v60  ;;  %v353_v29 = vor.u32 1.1754944e-38, %v352_v5  ;;  %vm2736_vm5 = vcmp.eq.f32.partialorder %v510_v49, 8.507059e+37  ;;  %v1742_v36 = vld [vmem:[#allocation6 + $0x148] sm:$0xf] }
  0xc8   :  { %v524_v44 = vadd.f32 1.0, %v1570_v35  ;;  %1445 = vmatpush.bf16.msra.mxu1 %v1775_v14  ;;  %v330_v15 = vmul.f32 %v329_v0, %v2634_v25  ;;  %v2095_v35 = vld [vmem:[#allocation6 + $0x54] sm:$0xf0]  ;;  %v490_v39 = vmul.f32 %v489_v58, %v2637_v46  ;;  %v1902_v31 = vld [vmem:[#allocation6 + $0x288] sm:$0xf]  ;;  %1432 = vmatpush.bf16.msra.mxu0 %v1631_v22  ;;  %v1743_v2 = vor.u32 %v2127_v62, %v1742_v36 }
  0xc9   :  { %v1598_v58 = vld [vmem:[#allocation6 + $0x28] sm:$0xf]  ;;  %v2163_v10 = vld [vmem:[#allocation6 + $0x274] sm:$0xf0]  ;;  %v189_v4 = vmul.f32 0.5, %v2629_v53 }
  0xca   :  { %v532_v45 = vmul.f32 %v524_v44, %v188_v12  ;;  %v2234_v61 = vpop.eup %2233  ;;  %v2167_v44 = vld [vmem:[#allocation6 + $0x294] sm:$0xf0]  ;;  %v1726_v9 = vld [vmem:[#allocation6 + $0x128] sm:$0xf]  ;;  %v1599_v27 = vor.u32 %v2091_v50, %v1598_v58  ;;  %v2113_v53 = vld [vmem:[#allocation6 + $0xec] sm:$0xf] }
  0xcb   :  { %v2236_v7 = vpop.eup %2235  ;;  %v342_v63 = vmul.f32 %v2234_v61, %v2698_v30  ;;  %vm347_vm15 = vweird.f32 %v2234_v61  ;;  %v513_v30 = vor.u32 1.1754944e-38, %v512_v11  ;;  %v1903_v0 = vor.u32 %v2167_v44, %v1902_v31  ;;  %v2123_v54 = vld [vmem:[#allocation6 + $0x134] sm:$0xf0]  ;;  %v1870_v49 = vld [vmem:[#allocation6 + $0x248] sm:$0xf] }
  0xcc   :  { %v2708_v48 = vpack.c.bf16 %v532_v45, %v528_v41  ;;  %v502_v52 = vmul.f32 %v2236_v7, %v2701_v33  ;;  %vm507_vm1 = vweird.f32 %v2236_v7  ;;  %vm2721_vm2 = vmor %vm346_vm14, %vm347_vm15  ;;  %v1615_v41 = vor.u32 %v2095_v35, %v1614_v34  ;;  %1446 = vmatpush.bf16.msra.mxu1 %v1759_v1  ;;  %v2211_v5 = vld [vmem:[#allocation6 + $0x3f4] sm:$0xf0]  ;;  %v1582_v11 = vld [vmem:[#allocation6 + $0x8] sm:$0xf] }
  0xcd   :  { %v343_v17 = vsub.f32 1.0, %v342_v63  ;;  %vm2732_vm4 = vmor %vm506_vm0, %vm507_vm1  ;;  %v1727_v6 = vor.u32 %v2123_v54, %v1726_v9  ;;  %v2078_v63 = vld [vmem:[#allocation6 + $0x3e8] sm:$0xf]  ;;  %v2159_v40 = vld [vmem:[#allocation6 + $0x254] sm:$0xf0] }
  0xce   :  { %1352 = vmatmul.bf16.vlgmr.msra.gmra.mxu2 %v2708_v48  ;;  %v503_v16 = vsub.f32 1.0, %v502_v52  ;;  %1433 = vmatpush.bf16.msra.mxu0 %v1615_v41  ;;  %v2087_v37 = vld [vmem:[#allocation6 + $0x14] sm:$0xf0]  ;;  %v2079_v22 = vor.u32 %v2211_v5, %v2078_v63  ;;  %v2062_v60 = vld [vmem:[#allocation6 + $0x3c8] sm:$0xf]  ;;  %v1871_v26 = vor.u32 %v2159_v40, %v1870_v49 }
  0xcf   :  { %1456 = vmatpush.bf16.msra.mxu2 %v1951_v59  ;;  %v344_v56 = vmul.f32 %v2234_v61, %v343_v17  ;;  %v1886_v59 = vld [vmem:[#allocation6 + $0x268] sm:$0xf]  ;;  %v1583_v14 = vor.u32 %v2087_v37, %v1582_v11  ;;  %v2145_v28 = vld [vmem:[#allocation6 + $0x1ec] sm:$0xf]  ;;  %v2155_v23 = vld [vmem:[#allocation6 + $0x234] sm:$0xf0] }
  0xd0   :  { %v504_v19 = vmul.f32 %v2236_v7, %v503_v16  ;;  %1447 = vmatpush.bf16.msra.mxu1 %v1743_v2  ;;  %v1887_v52 = vor.u32 %v2163_v10, %v1886_v59  ;;  %v1710_v17 = vld [vmem:[#allocation6 + $0x108] sm:$0xf]  ;;  %v1696_v16 = vld [vmem:[#allocation6 + $0xf8] sm:$0xf0]  ;;  %v1827_v32 = vor.u32 %v2145_v28, %v1824_v57  ;;  %v2151_v44 = vld [vmem:[#allocation6 + $0x214] sm:$0xf0] }
  0xd1   :  { %v345_v12 = vadd.f32 %v2234_v61, %v344_v56  ;;  %v1699_v56 = vor.u32 %v2113_v53, %v1696_v16  ;;  %v1808_v35 = vld [vmem:[#allocation6 + $0x1d8] sm:$0xf0]  ;;  %v1838_v31 = vld [vmem:[#allocation6 + $0x208] sm:$0xf]  ;;  %v2105_v62 = vld [vmem:[#allocation6 + $0xac] sm:$0xf] }
  0xd2   :  { %v505_v33 = vadd.f32 %v2236_v7, %v504_v19  ;;  %1434 = vmatpush.bf16.msra.mxu0 %v1599_v27  ;;  %v1854_v19 = vld [vmem:[#allocation6 + $0x228] sm:$0xf]  ;;  %v2137_v2 = vld [vmem:[#allocation6 + $0x1ac] sm:$0xf]  ;;  %v2199_v9 = vld [vmem:[#allocation6 + $0x394] sm:$0xf0] }
  0xd3   :  { %1457 = vmatpush.bf16.msra.mxu2 %v1935_v18  ;;  %v349_v55 = vsel %vm2721_vm2, %v2234_v61, %v345_v12  ;;  %v185_v61 = vmul.f32 0.5, %v2627_v47  ;;  %v2119_v47 = vld [vmem:[#allocation6 + $0x114] sm:$0xf0]  ;;  %v2141_v12 = vld [vmem:[#allocation6 + $0x1cc] sm:$0xf] }
  0xd4   :  { %v354_v25 = vsel %vm2725_vm3, %v353_v29, %v349_v55  ;;  %v509_v3 = vsel %vm2732_vm4, %v2236_v7, %v505_v33  ;;  %1448 = vmatpush.bf16.msra.mxu1 %v1727_v6  ;;  %v1711_v20 = vor.u32 %v2119_v47, %v1710_v17  ;;  %v2207_v29 = vld [vmem:[#allocation6 + $0x3d4] sm:$0xf0]  ;;  %v1855_v33 = vor.u32 %v2155_v23, %v1854_v19  ;;  %v1664_v55 = vld [vmem:[#allocation6 + $0xb8] sm:$0xf0]  ;;  %v2030_v50 = vld [vmem:[#allocation6 + $0x388] sm:$0xf] }
  0xd5   :  { %v355_v45 = vmul.f32 %v354_v25, %v330_v15  ;;  %v514_v46 = vsel %vm2736_vm5, %v513_v30, %v509_v3  ;;  %v2109_v30 = vld [vmem:[#allocation6 + $0xcc] sm:$0xf]  ;;  %v1680_v15 = vld [vmem:[#allocation6 + $0xd8] sm:$0xf0]  ;;  %v2063_v36 = vor.u32 %v2207_v29, %v2062_v60  ;;  %v1811_v41 = vor.u32 %v2141_v12, %v1808_v35  ;;  %v2014_v5 = vld [vmem:[#allocation6 + $0x368] sm:$0xf] }
  0xd6   :  { %v515_v51 = vmul.f32 %v514_v46, %v490_v39  ;;  %1435 = vmatpush.bf16.msra.mxu0 %v1583_v14  ;;  %v1683_v34 = vor.u32 %v2109_v30, %v1680_v15  ;;  %v2203_v39 = vld [vmem:[#allocation6 + $0x3b4] sm:$0xf0]  ;;  %v2177_v25 = vld [vmem:[#allocation6 + $0x2ec] sm:$0xf]  ;;  %v1952_v3 = vld [vmem:[#allocation6 + $0x2f8] sm:$0xf0]  ;;  %v2031_v63 = vor.u32 %v2199_v9, %v2030_v50 }
  0xd7   :  { %1458 = vmatpush.bf16.msra.mxu2 %v1919_v43  ;;  %v1567_v38 = vclamps-f32 %v355_v45, 1.0  ;;  %v2046_v43 = vld [vmem:[#allocation6 + $0x3a8] sm:$0xf]  ;;  %v1667_v45 = vor.u32 %v2105_v62, %v1664_v55  ;;  %v1792_v46 = vld [vmem:[#allocation6 + $0x1b8] sm:$0xf0]  ;;  %v1955_v59 = vor.u32 %v2177_v25, %v1952_v3 }
  0xd8   :  { %v1571_v7 = vclamps-f32 %v515_v51, 1.0  ;;  %1449 = vmatpush.bf16.msra.mxu1 %v1711_v20  ;;  %v2047_v58 = vor.u32 %v2203_v39, %v2046_v43  ;;  %v1839_v51 = vor.u32 %v2151_v44, %v1838_v31  ;;  %v2101_v10 = vld [vmem:[#allocation6 + $0x8c] sm:$0xf]  ;;  %v1648_v27 = vld [vmem:[#allocation6 + $0x98] sm:$0xf0] }
  0xd9   :  { %v521_v8 = vadd.f32 1.0, %v1567_v38  ;;  %1436 = vmatmul.bf16.vlgmr.msra.gmra.mxu0 %v2609_v24  ;;  %v2133_v54 = vld [vmem:[#allocation6 + $0x18c] sm:$0xf]  ;;  %v1936_v38 = vld [vmem:[#allocation6 + $0x2d8] sm:$0xf0]  ;;  %v1651_v6 = vor.u32 %v2101_v10, %v1648_v27 }
  0xda   :  { %v525_v13 = vadd.f32 1.0, %v1571_v7  ;;  %1484 = vmatpush.bf16.msrb.mxu0 %v1699_v56  ;;  %v2195_v49 = vld [vmem:[#allocation6 + $0x374] sm:$0xf0]  ;;  %v2129_v11 = vld [vmem:[#allocation6 + $0x16c] sm:$0xf] }
  0xdb   :  { %1459 = vmatpush.bf16.msra.mxu2 %v1903_v0  ;;  %v529_v18 = vmul.f32 %v521_v8, %v185_v61  ;;  %1450 = vmatmul.bf16.vlgmr.msra.gmra.mxu1 %v2642_v42  ;;  %v1795_v0 = vor.u32 %v2137_v2, %v1792_v46  ;;  %v2173_v61 = vld [vmem:[#allocation6 + $0x2cc] sm:$0xf]  ;;  %v1760_v17 = vld [vmem:[#allocation6 + $0x178] sm:$0xf0]  ;;  %v1998_v20 = vld [vmem:[#allocation6 + $0x348] sm:$0xf] }
  0xdc   :  { %v533_v21 = vmul.f32 %v525_v13, %v189_v4  ;;  %1498 = vmatpush.bf16.msrb.mxu1 %v1827_v32  ;;  %v1776_v4 = vld [vmem:[#allocation6 + $0x198] sm:$0xf0]  ;;  %v1939_v40 = vor.u32 %v2173_v61, %v1936_v38  ;;  %v2097_v8 = vld [vmem:[#allocation6 + $0x6c] sm:$0xf]  ;;  %v1763_v47 = vor.u32 %v2129_v11, %v1760_v17  ;;  %v1982_v23 = vld [vmem:[#allocation6 + $0x328] sm:$0xf] }
  0xdd   :  { %v1779_v7 = vor.u32 %v2133_v54, %v1776_v4  ;;  %v2169_v37 = vld [vmem:[#allocation6 + $0x2ac] sm:$0xf]  ;;  %v1920_v13 = vld [vmem:[#allocation6 + $0x2b8] sm:$0xf0]  ;;  %v2187_v32 = vld [vmem:[#allocation6 + $0x334] sm:$0xf0] }
  0xde   :  { %1408 = vmatmul.bf16.vlgmr.msrb.gmra.mxu2 %v2708_v48  ;;  %v2753_v1 = vpack.c.bf16 %v533_v21, %v529_v18  ;;  %1485 = vmatpush.bf16.msrb.mxu0 %v1683_v34  ;;  %v2015_v18 = vor.u32 %v2195_v49, %v2014_v5  ;;  %v2191_v21 = vld [vmem:[#allocation6 + $0x354] sm:$0xf0]  ;;  %v1923_v53 = vor.u32 %v2169_v37, %v1920_v13  ;;  %v2093_v16 = vld [vmem:[#allocation6 + $0x4c] sm:$0xf]  ;;  %v1904_v56 = vld [vmem:[#allocation6 + $0x298] sm:$0xf0] }
  0xdf   :  { %1460 = vmatpush.bf16.msra.mxu2 %v1887_v52  ;;  %v1632_v52 = vld [vmem:[#allocation6 + $0x78] sm:$0xf0]  ;;  %v2125_v60 = vld [vmem:[#allocation6 + $0x14c] sm:$0xf]  ;;  %v1999_v19 = vor.u32 %v2191_v21, %v1998_v20  ;;  %v1983_v44 = vor.u32 %v2187_v32, %v1982_v23  ;;  %v82_v32 = vld [vmem:[%s2807_s0 + $0x10] sm:$0xff] }
  0xe0   :  { %1366 = vmatmul.bf16.vlgmr.msra.gmra.mxu3 %v2753_v1  ;;  %1499 = vmatpush.bf16.msrb.mxu1 %v1811_v41  ;;  %v1635_v14 = vor.u32 %v2097_v8, %v1632_v52  ;;  %v1744_v57 = vld [vmem:[#allocation6 + $0x158] sm:$0xf0]  ;;  %v2089_v15 = vld [vmem:[#allocation6 + $0x2c] sm:$0xf]  ;;  %v2183_v41 = vld [vmem:[#allocation6 + $0x314] sm:$0xf0] }
  0xe1   :  { %1470 = vmatpush.bf16.msra.mxu3 %v2079_v22  ;;  %v1616_v22 = vld [vmem:[#allocation6 + $0x58] sm:$0xf0]  ;;  %v1747_v29 = vor.u32 %v2125_v60, %v1744_v57  ;;  %v2121_v43 = vld [vmem:[#allocation6 + $0x12c] sm:$0xf] }
  0xe2   :  { %1486 = vmatpush.bf16.msrb.mxu0 %v1667_v45  ;;  %v1619_v28 = vor.u32 %v2093_v16, %v1616_v22  ;;  %v1600_v12 = vld [vmem:[#allocation6 + $0x38] sm:$0xf0]  ;;  %v2161_v34 = vld [vmem:[#allocation6 + $0x26c] sm:$0xf] }
  0xe3   :  { %1461 = vmatpush.bf16.msra.mxu2 %v1871_v26  ;;  %v2165_v26 = vld [vmem:[#allocation6 + $0x28c] sm:$0xf]  ;;  %v1888_v35 = vld [vmem:[#allocation6 + $0x278] sm:$0xf0] }
  0xe4   :  { %1500 = vmatpush.bf16.msrb.mxu1 %v1795_v0  ;;  %v1907_v30 = vor.u32 %v2165_v26, %v1904_v56  ;;  %v1728_v39 = vld [vmem:[#allocation6 + $0x138] sm:$0xf0]  ;;  %v2209_v62 = vld [vmem:[#allocation6 + $0x3ec] sm:$0xf]  ;;  %v1891_v2 = vor.u32 %v2161_v34, %v1888_v35  ;;  %v2765_v26 = vld [vmem:[#allocation7] sm:$0xf] }
  0xe5   :  { %1471 = vmatpush.bf16.msra.mxu3 %v2063_v36  ;;  %v1603_v36 = vor.u32 %v2089_v15, %v1600_v12  ;;  %v1731_v31 = vor.u32 %v2121_v43, %v1728_v39  ;;  %v2080_v55 = vld [vmem:[#allocation6 + $0x3f8] sm:$0xf0]  ;;  %v2085_v25 = vld [vmem:[#allocation6 + $0xc] sm:$0xf]  ;;  %v668_v56 = vperm.slane %v2765_v26, 0  ;;  %v92_v43 = vunpack.c.l.bf16 %v82_v32 }
  0xe6   :  { %1487 = vmatpush.bf16.msrb.mxu0 %v1651_v6  ;;  %v1584_v3 = vld [vmem:[#allocation6 + $0x18] sm:$0xf0]  ;;  %v2117_v45 = vld [vmem:[#allocation6 + $0x10c] sm:$0xf]  ;;  %v669_v39 = vperm.slane %v2765_v26, 1 }
  0xe7   :  { %1462 = vmatpush.bf16.msra.mxu2 %v1855_v33  ;;  %v1966_v33 = vld [vmem:[#allocation6 + $0x308] sm:$0xf]  ;;  %v2157_v46 = vld [vmem:[#allocation6 + $0x24c] sm:$0xf]  ;;  %v1872_v0 = vld [vmem:[#allocation6 + $0x258] sm:$0xf0] }
  0xe8   :  { %1501 = vmatpush.bf16.msrb.mxu1 %v1779_v7  ;;  %v1712_v50 = vld [vmem:[#allocation6 + $0x118] sm:$0xf0]  ;;  %v2205_v10 = vld [vmem:[#allocation6 + $0x3cc] sm:$0xf]  ;;  %v1875_v27 = vor.u32 %v2157_v46, %v1872_v0 }
  0xe9   :  { %1472 = vmatpush.bf16.msra.mxu3 %v2047_v58  ;;  %v1587_v58 = vor.u32 %v2085_v25, %v1584_v3  ;;  %v1715_v9 = vor.u32 %v2117_v45, %v1712_v50  ;;  %v2064_v54 = vld [vmem:[#allocation6 + $0x3d8] sm:$0xf0]  ;;  %v2153_v61 = vld [vmem:[#allocation6 + $0x22c] sm:$0xf] }
  0xea   :  { %1488 = vmatpush.bf16.msrb.mxu0 %v1635_v14  ;;  %v1856_v38 = vld [vmem:[#allocation6 + $0x238] sm:$0xf0]  ;;  %v2067_v6 = vor.u32 %v2205_v10, %v2064_v54  ;;  %v2201_v4 = vld [vmem:[#allocation6 + $0x3ac] sm:$0xf] }
  0xeb   :  { %1463 = vmatpush.bf16.msra.mxu2 %v1839_v51  ;;  %v1967_v51 = vor.u32 %v2183_v41, %v1966_v33  ;;  %v1859_v7 = vor.u32 %v2153_v61, %v1856_v38  ;;  %v2149_v5 = vld [vmem:[#allocation6 + $0x20c] sm:$0xf]  ;;  %v1840_v49 = vld [vmem:[#allocation6 + $0x218] sm:$0xf0]  ;;  %v670_v38 = vperm.slane %v2765_v26, 2 }
  0xec   :  { %1502 = vmatpush.bf16.msrb.mxu1 %v1763_v47  ;;  %v1843_v8 = vor.u32 %v2149_v5, %v1840_v49  ;;  %v2197_v52 = vld [vmem:[#allocation6 + $0x38c] sm:$0xf]  ;;  %v2032_v11 = vld [vmem:[#allocation6 + $0x398] sm:$0xf0] }
  0xed   :  { %1473 = vmatpush.bf16.msra.mxu3 %v2031_v63  ;;  %v2048_v63 = vld [vmem:[#allocation6 + $0x3b8] sm:$0xf0]  ;;  %v2035_v37 = vor.u32 %v2197_v52, %v2032_v11  ;;  %v2193_v13 = vld [vmem:[#allocation6 + $0x36c] sm:$0xf] }
  0xee   :  { %1464 = vmatmul.bf16.vlgmr.msra.gmra.mxu2 %v2708_v48  ;;  %1489 = vmatpush.bf16.msrb.mxu0 %v1619_v28  ;;  %v2016_v14 = vld [vmem:[#allocation6 + $0x378] sm:$0xf0] }
  0xef   :  { %1512 = vmatpush.bf16.msrb.mxu2 %v1955_v59  ;;  %v2083_v59 = vor.u32 %v2209_v62, %v2080_v55  ;;  %v2019_v17 = vor.u32 %v2193_v13, %v2016_v14  ;;  %v2000_v47 = vld [vmem:[#allocation6 + $0x358] sm:$0xf0]  ;;  %v83_v13 = vld [vmem:[%s2807_s0 + $0x18] sm:$0xff] }
  0xf0   :  { %1422 = vmatmul.bf16.vlgmr.msrb.gmra.mxu3 %v2753_v1  ;;  %1503 = vmatpush.bf16.msrb.mxu1 %v1747_v29  ;;  %v1984_v20 = vld [vmem:[#allocation6 + $0x338] sm:$0xf0] }
  0xf1   :  { %1474 = vmatpush.bf16.msra.mxu3 %v2015_v18  ;;  %v2185_v18 = vld [vmem:[#allocation6 + $0x32c] sm:$0xf]  ;;  %v1968_v16 = vld [vmem:[#allocation6 + $0x318] sm:$0xf0] }
  0xf2   :  { %1490 = vmatpush.bf16.msrb.mxu0 %v1603_v36  ;;  %v1987_v21 = vor.u32 %v2185_v18, %v1984_v20 }
  0xf3   :  { %1513 = vmatpush.bf16.msrb.mxu2 %v1939_v40  ;;  %v2051_v40 = vor.u32 %v2201_v4, %v2048_v63 }
  0xf4   :  { %1504 = vmatpush.bf16.msrb.mxu1 %v1731_v31 }
  0xf5   :  { %1475 = vmatpush.bf16.msra.mxu3 %v1999_v19 }
  0xf6   :  { %1491 = vmatpush.bf16.msrb.mxu0 %v1587_v58 }
  0xf7   :  { %1514 = vmatpush.bf16.msrb.mxu2 %v1923_v53  ;;  %v2181_v53 = vld [vmem:[#allocation6 + $0x30c] sm:$0xf] }
  0xf8   :  { %1505 = vmatpush.bf16.msrb.mxu1 %v1715_v9  ;;  %v1971_v22 = vor.u32 %v2181_v53, %v1968_v16  ;;  %v87_v16 = vld [vmem:[%s2807_s0 + $0x38] sm:$0xff] }
  0xf9   :  { %1476 = vmatpush.bf16.msra.mxu3 %v1983_v44  ;;  %1492 = vmatmul.bf16.vlgmr.msrb.gmra.mxu0 %v2609_v24  ;;  %v2189_v24 = vld [vmem:[#allocation6 + $0x34c] sm:$0xf]  ;;  %v86_v44 = vld [vmem:[%s2807_s0 + $0x30] sm:$0xff] }
  0xfa   :  { %v100_v25 = vunpack.c.l.bf16 %v86_v44  ;;  %v101_v5 = vunpack.c.h.bf16 %v86_v44  ;;  %v103_v44 = vunpack.c.h.bf16 %v87_v16 }
  0xfb   :  { %1515 = vmatpush.bf16.msrb.mxu2 %v1907_v30  ;;  %1506 = vmatmul.bf16.vlgmr.msrb.gmra.mxu1 %v2642_v42  ;;  %v2003_v42 = vor.u32 %v2189_v24, %v2000_v47  ;;  %v94_v47 = vunpack.c.l.bf16 %v83_v13 }
  0xfd   :  { %1477 = vmatpush.bf16.msra.mxu3 %v1967_v51 }
  0xff   :  { %1516 = vmatpush.bf16.msrb.mxu2 %v1891_v2 }
 0x100   :  { %1478 = vmatmul.bf16.vlgmr.msra.gmra.mxu3 %v2753_v1 }
 0x101   :  { %1526 = vmatpush.bf16.msrb.mxu3 %v2083_v59  ;;  %v93_v59 = vunpack.c.h.bf16 %v82_v32 }
 0x103   :  { %1517 = vmatpush.bf16.msrb.mxu2 %v1875_v27 }
 0x105   :  { %1527 = vmatpush.bf16.msrb.mxu3 %v2067_v6 }
 0x107   :  { %1518 = vmatpush.bf16.msrb.mxu2 %v1859_v7 }
 0x109   :  { %1528 = vmatpush.bf16.msrb.mxu3 %v2051_v40 }
 0x10b   :  { %1519 = vmatpush.bf16.msrb.mxu2 %v1843_v8 }
 0x10d   :  { %1529 = vmatpush.bf16.msrb.mxu3 %v2035_v37 }
 0x10e   :  { %1520 = vmatmul.bf16.vlgmr.msrb.gmra.mxu2 %v2708_v48 }
 0x111   :  { %1530 = vmatpush.bf16.msrb.mxu3 %v2019_v17 }
 0x115   :  { %1531 = vmatpush.bf16.msrb.mxu3 %v2003_v42 }
 0x119   :  { %1532 = vmatpush.bf16.msrb.mxu3 %v1987_v21 }
 0x11d   :  { %1533 = vmatpush.bf16.msrb.mxu3 %v1971_v22 }
 0x120   :  { %1534 = vmatmul.bf16.vlgmr.msrb.gmra.mxu3 %v2753_v1 }
 0x123   :  { %v1325_v60 = vpop.f32.mrf.mxu0 }
 0x124   :  { %v1326_v29 = vadd.f32 %v1325_v60, %v668_v56  ;;  %v102_v60 = vunpack.c.l.bf16 %v87_v16 }
 0x12b   :  { %v1327_v57 = vpop.f32.mrf.mxu0 }
 0x12c   :  { %v1328_v1 = vadd.f32 %v1327_v57, %v668_v56  ;;  %v671_v57 = vperm.slane %v2765_v26, 3 }
 0x12e   :  { %v1339_v48 = vpop.f32.mrf.mxu1 }
 0x12f   :  { %v1340_v23 = vadd.f32 %v1339_v48, %v1326_v29 }
 0x133   :  { %v1381_v15 = vpop.f32.mrf.mxu0 }
 0x134   :  { %v1382_v55 = vadd.f32 %v1381_v15, %v669_v39 }
 0x136   :  { %v1341_v19 = vpop.f32.mrf.mxu1 }
 0x137   :  { %v1342_v31 = vadd.f32 %v1341_v19, %v1328_v1 }
 0x13b   :  { %v1383_v2 = vpop.f32.mrf.mxu0 }
 0x13c   :  { %v1384_v9 = vadd.f32 %v1383_v2, %v669_v39 }
 0x13e   :  { %v1395_v35 = vpop.f32.mrf.mxu1 }
 0x13f   :  { %v1396_v46 = vadd.f32 %v1395_v35, %v1382_v55 }
 0x146   :  { %v1397_v0 = vpop.f32.mrf.mxu1 }
 0x147   :  { %v1398_v61 = vadd.f32 %v1397_v0, %v1384_v9 }
 0x151   :  { %v1353_v28 = vpop.f32.mrf.mxu2 }
 0x152   :  { %v1354_v12 = vadd.f32 %v1353_v28, %v1340_v23 }
 0x156   :  { %v1437_v27 = vpop.f32.mrf.mxu0 }
 0x157   :  { %v1438_v63 = vadd.f32 %v1437_v27, %v670_v38 }
 0x158   :  { %v1451_v4 = vpop.f32.mrf.mxu1 }
 0x159   :  { %v1355_v30 = vpop.f32.mrf.mxu2  ;;  %v1452_v52 = vadd.f32 %v1451_v4, %v1438_v63 }
 0x15a   :  { %v1356_v62 = vadd.f32 %v1355_v30, %v1342_v31 }
 0x15e   :  { %v1439_v11 = vpop.f32.mrf.mxu0 }
 0x15f   :  { %v1440_v17 = vadd.f32 %v1439_v11, %v670_v38 }
 0x160   :  { %v1453_v24 = vpop.f32.mrf.mxu1 }
 0x161   :  { %v1409_v41 = vpop.f32.mrf.mxu2  ;;  %v1454_v20 = vadd.f32 %v1453_v24, %v1440_v17 }
 0x162   :  { %v1410_v50 = vadd.f32 %v1409_v41, %v1396_v46 }
 0x163   :  { %v1367_v34 = vpop.f32.mrf.mxu3 }
 0x164   :  { %v1368_v36 = vadd.f32 %v1367_v34, %v1354_v12 }
 0x166   :  { %v1540_v33 = vadd.f32 %v1368_v36, %v92_v43  ;;  %v95_v43 = vunpack.c.h.bf16 %v83_v13 }
 0x168   :  { %1548 = vst [vmem:[%s2813_s6] sm:$0xff] %v1540_v33 }
 0x169   :  { %v1411_v51 = vpop.f32.mrf.mxu2 }
 0x16a   :  { %v1412_v7 = vadd.f32 %v1411_v51, %v1398_v61 }
 0x16b   :  { %v1369_v3 = vpop.f32.mrf.mxu3 }
 0x16c   :  { %v1370_v45 = vadd.f32 %v1369_v3, %v1356_v62 }
 0x16e   :  { %v1544_v58 = vadd.f32 %v1370_v45, %v100_v25 }
 0x170   :  { %1553 = vst [vmem:[%s2813_s6 + $0x20] sm:$0xff] %v1544_v58 }
 0x171   :  { %v1465_v40 = vpop.f32.mrf.mxu2 }
 0x172   :  { %v1466_v14 = vadd.f32 %v1465_v40, %v1452_v52 }
 0x173   :  { %v1423_v10 = vpop.f32.mrf.mxu3 }
 0x174   :  { %v1424_v54 = vadd.f32 %v1423_v10, %v1410_v50 }
 0x176   :  { %v1541_v6 = vadd.f32 %v1424_v54, %v93_v59  ;;  %v1493_v29 = vpop.f32.mrf.mxu0 }
 0x177   :  { %v1494_v19 = vadd.f32 %v1493_v29, %v671_v57 }
 0x178   :  { %1549 = vst [vmem:[%s2813_s6 + $0x8] sm:$0xff] %v1541_v6  ;;  %v1507_v23 = vpop.f32.mrf.mxu1 }
 0x179   :  { %v1467_v21 = vpop.f32.mrf.mxu2  ;;  %v1508_v30 = vadd.f32 %v1507_v23, %v1494_v19 }
 0x17a   :  { %v1468_v22 = vadd.f32 %v1467_v21, %v1454_v20 }
 0x17b   :  { %v1425_v49 = vpop.f32.mrf.mxu3 }
 0x17c   :  { %v1426_v8 = vadd.f32 %v1425_v49, %v1412_v7 }
 0x17e   :  { %v1545_v37 = vadd.f32 %v1426_v8, %v101_v5  ;;  %v1495_v15 = vpop.f32.mrf.mxu0 }
 0x17f   :  { %v1496_v1 = vadd.f32 %v1495_v15, %v671_v57 }
 0x180   :  { %1554 = vst [vmem:[%s2813_s6 + $0x28] sm:$0xff] %v1545_v37  ;;  %v1509_v36 = vpop.f32.mrf.mxu1 }
 0x181   :  { %v1510_v31 = vadd.f32 %v1509_v36, %v1496_v1 }
 0x183   :  { %v1479_v42 = vpop.f32.mrf.mxu3 }
 0x184   :  { %v1480_v18 = vadd.f32 %v1479_v42, %v1466_v14 }
 0x186   :  { %v1542_v53 = vadd.f32 %v1480_v18, %v94_v47 }
 0x188   :  { %1550 = vst [vmem:[%s2813_s6 + $0x10] sm:$0xff] %v1542_v53 }
 0x18b   :  { %v1481_v48 = vpop.f32.mrf.mxu3 }
 0x18c   :  { %v1482_v56 = vadd.f32 %v1481_v48, %v1468_v22 }
 0x18e   :  { %v1546_v28 = vadd.f32 %v1482_v56, %v102_v60 }
 0x190   :  { %1555 = vst [vmem:[%s2813_s6 + $0x30] sm:$0xff] %v1546_v28 }
 0x191   :  { %v1521_v32 = vpop.f32.mrf.mxu2 }
 0x192   :  { %v1522_v12 = vadd.f32 %v1521_v32, %v1508_v30 }
 0x199   :  { %v1523_v39 = vpop.f32.mrf.mxu2 }
 0x19a   :  { %v1524_v26 = vadd.f32 %v1523_v39, %v1510_v31 }
 0x1a3   :  { %v1535_v34 = vpop.f32.mrf.mxu3 }
 0x1a4   :  { %v1536_v35 = vadd.f32 %v1535_v34, %v1522_v12 }
 0x1a6   :  { %v1543_v33 = vadd.f32 %v1536_v35, %v95_v43 }
 0x1a8   :  { %1552 = vst.msk [vmem:[%s2813_s6 + $0x18] sm:$0xff] %vm1551_vm6, %v1543_v33 }
 0x1ab   :  { %v1537_v41 = vpop.f32.mrf.mxu3 }
 0x1ac   :  { %v1538_v62 = vadd.f32 %v1537_v41, %v1524_v26 }
 0x1ae   :  { %v1547_v55 = vadd.f32 %v1538_v62, %v103_v44 }
 0x1b0   :  { %1556 = vst.msk [vmem:[%s2813_s6 + $0x38] sm:$0xff] %vm1551_vm6, %v1547_v55 }
 0x1b1   :  { %1561 = vsyncpa [#allocation3], 1 }
 0x1b2   :  { %1562 = vsyncpa [#allocation5], 1 }
 0x1b3   :  { %1563 = vsyncpa [#allocation8], 1 }

// kernel: patch_embedder.2
= control target key start
LH: loop header
LB: loop body
LE: loop exit
PB: predicated region body
PF: predicated region fallthrough
CT: control target
= control target key end

     0   :  { %10 = vsyncpa [#allocation3], 0  ;;  %s7355_s0 = inlined_call_operand.vmem [shape: f32[16,1024], index: 0, kind: input, shape index: {}]   ;;  %s7356_s1 = inlined_call_operand.hbm [shape: bf16[1024,1024], index: 1, kind: input, shape index: {}]   ;;  %s7357_s2 = inlined_call_operand.hbm [shape: f32[1,1024], index: 2, kind: input, shape index: {}]   ;;  %s7358_s3 = inlined_call_operand.vmem [shape: bf16[16,1024], index: 3, kind: output, shape index: {0}]   ;;  %s7359_s4 = inlined_call_operand.vmem [shape: f32[1,2,512], index: 4, kind: output, shape index: {1}]  }
   0x1   :  { %s27_s17 = sshll.u32 %s7356_s1, 4  ;;  %s28_s17 = int_to_ptr.hbm [resolvable:$true] %s27_s17 }
   0x2   :  { %11 = vsyncpa [#allocation5], 0  ;;  %s6936_s18 = smov [#allocation2]   ;;  %s41_s22 = sshll.u32 %s7357_s2, 4  ;;  %s42_s22 = int_to_ptr.hbm [resolvable:$true] %s41_s22 }
   0x3   :  { %s29_s19 = sshll.u32 %s6936_s18, 4  ;;  %s6937_s23 = smov 512   ;;  %s30_s19 = int_to_ptr.vmem [resolvable:$true] %s29_s19 }
   0x4   :  { %s6938_s24 = smov 32   ;;  %s6939_s25 = smov [#allocation4]  }
   0x5   :  { %35 = dma.hbm_to_vmem [thread:$0]  %s28_s17, 65536, %s30_s19, [#allocation3], %s6937_s23, %s6937_s23, %s6938_s24  }
   0x6   :  { %s43_s26 = sshll.u32 %s6939_s25, 4  ;;  %s44_s26 = int_to_ptr.vmem [resolvable:$true] %s43_s26 }
   0x7   :  { %46 = dma.hbm_to_vmem [thread:$0]  %s42_s22, 128, %s44_s26, [#allocation5]  }
   0x8   :  { %6932 = dma.done.wait [#allocation3], 65536  }
   0x9   :  { %6933 = vsyncadd [#allocation3], 4294901760 }
   0xa   :  { %6934 = dma.done.wait [#allocation5], 128  }
   0xb   :  { %6935 = vsyncadd [#allocation5], 4294967168  ;;  %v4541_v0 = vld [vmem:[#allocation2 + $0x1c0] sm:$0xf]  ;;  %vm4210_vm0 = vcmask 1040384   ;;  %vm4212_vm1 = vcmask 1042434  }
   0xc   :  { %v6426_v1 = vld [vmem:[#allocation2 + $0x1dc] sm:$0xf0]  ;;  %vm4214_vm2 = vcmask 1041408  }
   0xd   :  { %v4797_v2 = vld [vmem:[#allocation2 + $0x3c0] sm:$0xf]  ;;  %v4542_v3 = vor.u32 %v6426_v1, %v4541_v0 }
   0xe   :  { %v6490_v4 = vld [vmem:[#allocation2 + $0x3dc] sm:$0xf0] }
   0xf   :  { %v5053_v5 = vld [vmem:[#allocation2 + $0x5c0] sm:$0xf]  ;;  %v4798_v7 = vor.u32 %v6490_v4, %v4797_v2  ;;  %3201 = vmatpush.bf16.msra.mxu0 %v4542_v3 }
  0x10   :  { %v6554_v6 = vld [vmem:[#allocation2 + $0x5dc] sm:$0xf0] }
  0x11   :  { %v5054_v8 = vor.u32 %v6554_v6, %v5053_v5  ;;  %v5309_v9 = vld [vmem:[#allocation2 + $0x7c0] sm:$0xf]  ;;  %3215 = vmatpush.bf16.msra.mxu1 %v4798_v7 }
  0x12   :  { %v6618_v10 = vld [vmem:[#allocation2 + $0x7dc] sm:$0xf0] }
  0x13   :  { %v4509_v11 = vld [vmem:[#allocation2 + $0x180] sm:$0xf]  ;;  %v5310_v12 = vor.u32 %v6618_v10, %v5309_v9  ;;  %3229 = vmatpush.bf16.msra.mxu2 %v5054_v8 }
  0x14   :  { %v6418_v13 = vld [vmem:[#allocation2 + $0x19c] sm:$0xf0] }
  0x15   :  { %v4765_v14 = vld [vmem:[#allocation2 + $0x380] sm:$0xf]  ;;  %v4510_v16 = vor.u32 %v6418_v13, %v4509_v11  ;;  %3243 = vmatpush.bf16.msra.mxu3 %v5310_v12 }
  0x16   :  { %v6482_v15 = vld [vmem:[#allocation2 + $0x39c] sm:$0xf0] }
  0x17   :  { %v4766_v17 = vor.u32 %v6482_v15, %v4765_v14  ;;  %v5021_v18 = vld [vmem:[#allocation2 + $0x580] sm:$0xf]  ;;  %3202 = vmatpush.bf16.msra.mxu0 %v4510_v16 }
  0x18   :  { %v6546_v19 = vld [vmem:[#allocation2 + $0x59c] sm:$0xf0] }
  0x19   :  { %v5277_v20 = vld [vmem:[#allocation2 + $0x780] sm:$0xf]  ;;  %v5022_v21 = vor.u32 %v6546_v19, %v5021_v18  ;;  %3216 = vmatpush.bf16.msra.mxu1 %v4766_v17 }
  0x1a   :  { %v6610_v22 = vld [vmem:[#allocation2 + $0x79c] sm:$0xf0] }
  0x1b   :  { %v4477_v23 = vld [vmem:[#allocation2 + $0x140] sm:$0xf]  ;;  %v5278_v25 = vor.u32 %v6610_v22, %v5277_v20  ;;  %3230 = vmatpush.bf16.msra.mxu2 %v5022_v21 }
  0x1c   :  { %v6410_v24 = vld [vmem:[#allocation2 + $0x15c] sm:$0xf0] }
  0x1d   :  { %v4733_v26 = vld [vmem:[#allocation2 + $0x340] sm:$0xf]  ;;  %v4478_v29 = vor.u32 %v6410_v24, %v4477_v23  ;;  %3244 = vmatpush.bf16.msra.mxu3 %v5278_v25 }
  0x1e   :  { %v6474_v27 = vld [vmem:[#allocation2 + $0x35c] sm:$0xf0] }
  0x1f   :  { %v4989_v28 = vld [vmem:[#allocation2 + $0x540] sm:$0xf]  ;;  %v4734_v33 = vor.u32 %v6474_v27, %v4733_v26  ;;  %3203 = vmatpush.bf16.msra.mxu0 %v4478_v29 }
  0x20   :  { %v6538_v30 = vld [vmem:[#allocation2 + $0x55c] sm:$0xf0] }
  0x21   :  { %v5245_v31 = vld [vmem:[#allocation2 + $0x740] sm:$0xf]  ;;  %v4990_v34 = vor.u32 %v6538_v30, %v4989_v28  ;;  %3217 = vmatpush.bf16.msra.mxu1 %v4734_v33 }
  0x22   :  { %v6602_v32 = vld [vmem:[#allocation2 + $0x75c] sm:$0xf0] }
  0x23   :  { %v4445_v35 = vld [vmem:[#allocation2 + $0x100] sm:$0xf]  ;;  %v5246_v38 = vor.u32 %v6602_v32, %v5245_v31  ;;  %3231 = vmatpush.bf16.msra.mxu2 %v4990_v34 }
  0x24   :  { %v6402_v36 = vld [vmem:[#allocation2 + $0x11c] sm:$0xf0] }
  0x25   :  { %v4701_v37 = vld [vmem:[#allocation2 + $0x300] sm:$0xf]  ;;  %v4446_v44 = vor.u32 %v6402_v36, %v4445_v35  ;;  %3245 = vmatpush.bf16.msra.mxu3 %v5246_v38 }
  0x26   :  { %v6466_v39 = vld [vmem:[#allocation2 + $0x31c] sm:$0xf0] }
  0x27   :  { %v4957_v40 = vld [vmem:[#allocation2 + $0x500] sm:$0xf]  ;;  %v4702_v45 = vor.u32 %v6466_v39, %v4701_v37  ;;  %3204 = vmatpush.bf16.msra.mxu0 %v4446_v44 }
  0x28   :  { %v6530_v41 = vld [vmem:[#allocation2 + $0x51c] sm:$0xf0] }
  0x29   :  { %v5213_v42 = vld [vmem:[#allocation2 + $0x700] sm:$0xf]  ;;  %v4958_v46 = vor.u32 %v6530_v41, %v4957_v40  ;;  %3218 = vmatpush.bf16.msra.mxu1 %v4702_v45 }
  0x2a   :  { %v6594_v43 = vld [vmem:[#allocation2 + $0x71c] sm:$0xf0] }
  0x2b   :  { %v4413_v47 = vld [vmem:[#allocation2 + $0xc0] sm:$0xf]  ;;  %v5214_v50 = vor.u32 %v6594_v43, %v5213_v42  ;;  %3232 = vmatpush.bf16.msra.mxu2 %v4958_v46 }
  0x2c   :  { %v6394_v48 = vld [vmem:[#allocation2 + $0xdc] sm:$0xf0] }
  0x2d   :  { %v4669_v49 = vld [vmem:[#allocation2 + $0x2c0] sm:$0xf]  ;;  %v4414_v56 = vor.u32 %v6394_v48, %v4413_v47  ;;  %3246 = vmatpush.bf16.msra.mxu3 %v5214_v50 }
  0x2e   :  { %v6458_v51 = vld [vmem:[#allocation2 + $0x2dc] sm:$0xf0] }
  0x2f   :  { %v4925_v52 = vld [vmem:[#allocation2 + $0x4c0] sm:$0xf]  ;;  %v4670_v57 = vor.u32 %v6458_v51, %v4669_v49  ;;  %3205 = vmatpush.bf16.msra.mxu0 %v4414_v56 }
  0x30   :  { %v6522_v53 = vld [vmem:[#allocation2 + $0x4dc] sm:$0xf0] }
  0x31   :  { %v5181_v54 = vld [vmem:[#allocation2 + $0x6c0] sm:$0xf]  ;;  %v4926_v58 = vor.u32 %v6522_v53, %v4925_v52  ;;  %3219 = vmatpush.bf16.msra.mxu1 %v4670_v57 }
  0x32   :  { %v6586_v55 = vld [vmem:[#allocation2 + $0x6dc] sm:$0xf0] }
  0x33   :  { %v4381_v59 = vld [vmem:[#allocation2 + $0x80] sm:$0xf]  ;;  %v5182_v62 = vor.u32 %v6586_v55, %v5181_v54  ;;  %3233 = vmatpush.bf16.msra.mxu2 %v4926_v58  ;;  %v89_v54 = vld [vmem:[%s7355_s0 + $0x10] sm:$0xff] }
  0x34   :  { %v6386_v60 = vld [vmem:[#allocation2 + $0x9c] sm:$0xf0] }
  0x35   :  { %v4637_v61 = vld [vmem:[#allocation2 + $0x280] sm:$0xf]  ;;  %v4382_v4 = vor.u32 %v6386_v60, %v4381_v59  ;;  %3247 = vmatpush.bf16.msra.mxu3 %v5182_v62  ;;  %v97_v59 = vld [vmem:[%s7355_s0 + $0x50] sm:$0xff] }
  0x36   :  { %v6450_v63 = vld [vmem:[#allocation2 + $0x29c] sm:$0xf0] }
  0x37   :  { %v4893_v0 = vld [vmem:[#allocation2 + $0x480] sm:$0xf]  ;;  %v4638_v5 = vor.u32 %v6450_v63, %v4637_v61  ;;  %3206 = vmatpush.bf16.msra.mxu0 %v4382_v4 }
  0x38   :  { %v6514_v1 = vld [vmem:[#allocation2 + $0x49c] sm:$0xf0] }
  0x39   :  { %v5149_v2 = vld [vmem:[#allocation2 + $0x680] sm:$0xf]  ;;  %v4894_v6 = vor.u32 %v6514_v1, %v4893_v0  ;;  %3220 = vmatpush.bf16.msra.mxu1 %v4638_v5  ;;  %v6985_v1 = vpack.c.bf16 %v97_v59, %v89_v54 }
  0x3a   :  { %v6578_v3 = vld [vmem:[#allocation2 + $0x69c] sm:$0xf0] }
  0x3b   :  { %v4349_v7 = vld [vmem:[#allocation2 + $0x40] sm:$0xf]  ;;  %v5150_v10 = vor.u32 %v6578_v3, %v5149_v2  ;;  %3234 = vmatpush.bf16.msra.mxu2 %v4894_v6  ;;  %v88_v6 = vld [vmem:[%s7355_s0 + $0x8] sm:$0xff] }
  0x3c   :  { %v6378_v8 = vld [vmem:[#allocation2 + $0x5c] sm:$0xf0] }
  0x3d   :  { %v4605_v9 = vld [vmem:[#allocation2 + $0x240] sm:$0xf]  ;;  %v4350_v16 = vor.u32 %v6378_v8, %v4349_v7  ;;  %3248 = vmatpush.bf16.msra.mxu3 %v5150_v10  ;;  %v96_v7 = vld [vmem:[%s7355_s0 + $0x48] sm:$0xff]  ;;  %v90_v8 = vld [vmem:[%s7355_s0 + $0x18] sm:$0xff] }
  0x3e   :  { %v6442_v11 = vld [vmem:[#allocation2 + $0x25c] sm:$0xf0]  ;;  %v6998_v10 = vpack.c.bf16 %v96_v7, %v88_v6 }
  0x3f   :  { %v4861_v12 = vld [vmem:[#allocation2 + $0x440] sm:$0xf]  ;;  %v4606_v19 = vor.u32 %v6442_v11, %v4605_v9  ;;  %3207 = vmatpush.bf16.msra.mxu0 %v4350_v16  ;;  %v98_v11 = vld [vmem:[%s7355_s0 + $0x58] sm:$0xff] }
  0x40   :  { %v6506_v13 = vld [vmem:[#allocation2 + $0x45c] sm:$0xf0] }
  0x41   :  { %v5117_v14 = vld [vmem:[#allocation2 + $0x640] sm:$0xf]  ;;  %v4862_v20 = vor.u32 %v6506_v13, %v4861_v12  ;;  %3221 = vmatpush.bf16.msra.mxu1 %v4606_v19 }
  0x42   :  { %v6570_v15 = vld [vmem:[#allocation2 + $0x65c] sm:$0xf0] }
  0x43   :  { %v4317_v17 = vld [vmem:[#allocation2] sm:$0xf]  ;;  %v5118_v24 = vor.u32 %v6570_v15, %v5117_v14  ;;  %3235 = vmatpush.bf16.msra.mxu2 %v4862_v20 }
  0x44   :  { %v6370_v18 = vld [vmem:[#allocation2 + $0x1c] sm:$0xf0] }
  0x45   :  { %v4573_v21 = vld [vmem:[#allocation2 + $0x200] sm:$0xf]  ;;  %v4318_v31 = vor.u32 %v6370_v18, %v4317_v17  ;;  %3249 = vmatpush.bf16.msra.mxu3 %v5118_v24  ;;  %v7003_v17 = vpack.c.bf16 %v98_v11, %v90_v8 }
  0x46   :  { %v6434_v22 = vld [vmem:[#allocation2 + $0x21c] sm:$0xf0] }
  0x47   :  { %v4829_v23 = vld [vmem:[#allocation2 + $0x400] sm:$0xf]  ;;  %v4574_v35 = vor.u32 %v6434_v22, %v4573_v21  ;;  %3208 = vmatpush.bf16.msra.mxu0 %v4318_v31 }
  0x48   :  { %v6498_v25 = vld [vmem:[#allocation2 + $0x41c] sm:$0xf0] }
  0x49   :  { %v5085_v26 = vld [vmem:[#allocation2 + $0x600] sm:$0xf]  ;;  %v4830_v36 = vor.u32 %v6498_v25, %v4829_v23  ;;  %3222 = vmatpush.bf16.msra.mxu1 %v4574_v35 }
  0x4a   :  { %v6562_v27 = vld [vmem:[#allocation2 + $0x61c] sm:$0xf0] }
  0x4b   :  { %v5565_v28 = vld [vmem:[#allocation2 + $0x9c0] sm:$0xf]  ;;  %v5086_v39 = vor.u32 %v6562_v27, %v5085_v26  ;;  %3236 = vmatpush.bf16.msra.mxu2 %v4830_v36 }
  0x4c   :  { %v6682_v29 = vld [vmem:[#allocation2 + $0x9dc] sm:$0xf0]  ;;  %3223 = vmatmul.bf16.vlgmr.msra.gmra.mxu1 %v6998_v10 }
  0x4d   :  { %v5821_v30 = vld [vmem:[#allocation2 + $0xbc0] sm:$0xf]  ;;  %v5566_v40 = vor.u32 %v6682_v29, %v5565_v28  ;;  %3250 = vmatpush.bf16.msra.mxu3 %v5086_v39 }
  0x4e   :  { %v6746_v32 = vld [vmem:[#allocation2 + $0xbdc] sm:$0xf0]  ;;  %3237 = vmatmul.bf16.vlgmr.msra.gmra.mxu2 %v6985_v1 }
  0x4f   :  { %v6077_v33 = vld [vmem:[#allocation2 + $0xdc0] sm:$0xf]  ;;  %v5822_v43 = vor.u32 %v6746_v32, %v5821_v30  ;;  %3257 = vmatpush.bf16.msrb.mxu0 %v5566_v40 }
  0x50   :  { %v6810_v34 = vld [vmem:[#allocation2 + $0xddc] sm:$0xf0]  ;;  %3251 = vmatmul.bf16.vlgmr.msra.gmra.mxu3 %v7003_v17 }
  0x51   :  { %v6333_v37 = vld [vmem:[#allocation2 + $0xfc0] sm:$0xf]  ;;  %v6078_v44 = vor.u32 %v6810_v34, %v6077_v33  ;;  %3271 = vmatpush.bf16.msrb.mxu1 %v5822_v43 }
  0x52   :  { %v6874_v38 = vld [vmem:[#allocation2 + $0xfdc] sm:$0xf0] }
  0x53   :  { %v5533_v41 = vld [vmem:[#allocation2 + $0x980] sm:$0xf]  ;;  %v6334_v48 = vor.u32 %v6874_v38, %v6333_v37  ;;  %3285 = vmatpush.bf16.msrb.mxu2 %v6078_v44 }
  0x54   :  { %v6674_v42 = vld [vmem:[#allocation2 + $0x99c] sm:$0xf0] }
  0x55   :  { %v5789_v45 = vld [vmem:[#allocation2 + $0xb80] sm:$0xf]  ;;  %v5534_v55 = vor.u32 %v6674_v42, %v5533_v41  ;;  %3299 = vmatpush.bf16.msrb.mxu3 %v6334_v48 }
  0x56   :  { %v6738_v46 = vld [vmem:[#allocation2 + $0xb9c] sm:$0xf0] }
  0x57   :  { %v6045_v47 = vld [vmem:[#allocation2 + $0xd80] sm:$0xf]  ;;  %v5790_v60 = vor.u32 %v6738_v46, %v5789_v45  ;;  %3258 = vmatpush.bf16.msrb.mxu0 %v5534_v55 }
  0x58   :  { %v6802_v49 = vld [vmem:[#allocation2 + $0xd9c] sm:$0xf0] }
  0x59   :  { %v6301_v50 = vld [vmem:[#allocation2 + $0xf80] sm:$0xf]  ;;  %v6046_v61 = vor.u32 %v6802_v49, %v6045_v47  ;;  %3272 = vmatpush.bf16.msrb.mxu1 %v5790_v60 }
  0x5a   :  { %v6866_v51 = vld [vmem:[#allocation2 + $0xf9c] sm:$0xf0] }
  0x5b   :  { %v87_v52 = vld [vmem:[%s7355_s0] sm:$0xff]  ;;  %v6302_v2 = vor.u32 %v6866_v51, %v6301_v50  ;;  %3286 = vmatpush.bf16.msrb.mxu2 %v6046_v61 }
  0x5c   :  { %v95_v53 = vld [vmem:[%s7355_s0 + $0x40] sm:$0xff] }
  0x5d   :  { %v5501_v56 = vld [vmem:[#allocation2 + $0x940] sm:$0xf]  ;;  %v6980_v58 = vpack.c.bf16 %v95_v53, %v87_v52  ;;  %3300 = vmatpush.bf16.msrb.mxu3 %v6302_v2 }
  0x5e   :  { %v6666_v57 = vld [vmem:[#allocation2 + $0x95c] sm:$0xf0] }
  0x5f   :  { %v5757_v62 = vld [vmem:[#allocation2 + $0xb40] sm:$0xf]  ;;  %3209 = vmatmul.bf16.vlgmr.msra.gmra.mxu0 %v6980_v58  ;;  %v5502_v9 = vor.u32 %v6666_v57, %v5501_v56 }
  0x60   :  { %v6730_v63 = vld [vmem:[#allocation2 + $0xb5c] sm:$0xf0] }
  0x61   :  { %v6013_v0 = vld [vmem:[#allocation2 + $0xd40] sm:$0xf]  ;;  %v5758_v12 = vor.u32 %v6730_v63, %v5757_v62  ;;  %3259 = vmatpush.bf16.msrb.mxu0 %v5502_v9  ;;  %v6422_v9 = vld [vmem:[#allocation2 + $0x1c4] sm:$0xf] }
  0x62   :  { %v6794_v3 = vld [vmem:[#allocation2 + $0xd5c] sm:$0xf0] }
  0x63   :  { %v6269_v4 = vld [vmem:[#allocation2 + $0xf40] sm:$0xf]  ;;  %v6014_v13 = vor.u32 %v6794_v3, %v6013_v0  ;;  %3273 = vmatpush.bf16.msrb.mxu1 %v5758_v12  ;;  %v4543_v12 = vld [vmem:[#allocation2 + $0x1e0] sm:$0xf0] }
  0x64   :  { %v6858_v5 = vld [vmem:[#allocation2 + $0xf5c] sm:$0xf0] }
  0x65   :  { %v5469_v14 = vld [vmem:[#allocation2 + $0x900] sm:$0xf]  ;;  %v6270_v18 = vor.u32 %v6858_v5, %v6269_v4  ;;  %3287 = vmatpush.bf16.msrb.mxu2 %v6014_v13  ;;  %v6486_v13 = vld [vmem:[#allocation2 + $0x3c4] sm:$0xf] }
  0x66   :  { %v6658_v15 = vld [vmem:[#allocation2 + $0x91c] sm:$0xf0] }
  0x67   :  { %v5725_v16 = vld [vmem:[#allocation2 + $0xb00] sm:$0xf]  ;;  %v5470_v24 = vor.u32 %v6658_v15, %v5469_v14  ;;  %3301 = vmatpush.bf16.msrb.mxu3 %v6270_v18  ;;  %v4799_v14 = vld [vmem:[#allocation2 + $0x3e0] sm:$0xf0] }
  0x68   :  { %v6722_v19 = vld [vmem:[#allocation2 + $0xb1c] sm:$0xf0]  ;;  %v6550_v15 = vld [vmem:[#allocation2 + $0x5c4] sm:$0xf] }
  0x69   :  { %v5981_v20 = vld [vmem:[#allocation2 + $0xd00] sm:$0xf]  ;;  %v5726_v25 = vor.u32 %v6722_v19, %v5725_v16  ;;  %3260 = vmatpush.bf16.msrb.mxu0 %v5470_v24  ;;  %v5055_v16 = vld [vmem:[#allocation2 + $0x5e0] sm:$0xf0] }
  0x6a   :  { %v6786_v21 = vld [vmem:[#allocation2 + $0xd1c] sm:$0xf0]  ;;  %v6614_v18 = vld [vmem:[#allocation2 + $0x7c4] sm:$0xf] }
  0x6b   :  { %v6237_v22 = vld [vmem:[#allocation2 + $0xf00] sm:$0xf]  ;;  %v5982_v26 = vor.u32 %v6786_v21, %v5981_v20  ;;  %3274 = vmatpush.bf16.msrb.mxu1 %v5726_v25  ;;  %v5311_v20 = vld [vmem:[#allocation2 + $0x7e0] sm:$0xf0]  ;;  %v93_v25 = vld [vmem:[%s7355_s0 + $0x30] sm:$0xff] }
  0x6c   :  { %v6850_v23 = vld [vmem:[#allocation2 + $0xf1c] sm:$0xf0] }
  0x6d   :  { %v5437_v27 = vld [vmem:[#allocation2 + $0x8c0] sm:$0xf]  ;;  %v6238_v30 = vor.u32 %v6850_v23, %v6237_v22  ;;  %3288 = vmatpush.bf16.msrb.mxu2 %v5982_v26  ;;  %v101_v26 = vld [vmem:[%s7355_s0 + $0x70] sm:$0xff] }
  0x6e   :  { %v6650_v28 = vld [vmem:[#allocation2 + $0x8dc] sm:$0xf0] }
  0x6f   :  { %v5693_v29 = vld [vmem:[#allocation2 + $0xac0] sm:$0xf]  ;;  %v5438_v36 = vor.u32 %v6650_v28, %v5437_v27  ;;  %3302 = vmatpush.bf16.msrb.mxu3 %v6238_v30  ;;  %v92_v27 = vld [vmem:[%s7355_s0 + $0x28] sm:$0xff] }
  0x70   :  { %v6714_v31 = vld [vmem:[#allocation2 + $0xadc] sm:$0xf0]  ;;  %v100_v30 = vld [vmem:[%s7355_s0 + $0x68] sm:$0xff] }
  0x71   :  { %v5949_v32 = vld [vmem:[#allocation2 + $0xcc0] sm:$0xf]  ;;  %v5694_v37 = vor.u32 %v6714_v31, %v5693_v29  ;;  %3261 = vmatpush.bf16.msrb.mxu0 %v5438_v36  ;;  %v4546_v29 = vor.u32 %v6422_v9, %v4543_v12  ;;  %v94_v31 = vld [vmem:[%s7355_s0 + $0x38] sm:$0xff]  ;;  %v4511_v36 = vld [vmem:[#allocation2 + $0x1a0] sm:$0xf0] }
  0x72   :  { %v6778_v33 = vld [vmem:[#allocation2 + $0xcdc] sm:$0xf0]  ;;  %v5215_v9 = vld [vmem:[#allocation2 + $0x720] sm:$0xf0] }
  0x73   :  { %v6205_v34 = vld [vmem:[#allocation2 + $0xec0] sm:$0xf]  ;;  %v5950_v38 = vor.u32 %v6778_v33, %v5949_v32  ;;  %3275 = vmatpush.bf16.msrb.mxu1 %v5694_v37  ;;  %v102_v32 = vld [vmem:[%s7355_s0 + $0x78] sm:$0xff]  ;;  %v4802_v33 = vor.u32 %v6486_v13, %v4799_v14  ;;  %v6478_v37 = vld [vmem:[#allocation2 + $0x384] sm:$0xf] }
  0x74   :  { %v6842_v35 = vld [vmem:[#allocation2 + $0xedc] sm:$0xf0]  ;;  %v6390_v14 = vld [vmem:[#allocation2 + $0xc4] sm:$0xf] }
  0x75   :  { %v5405_v39 = vld [vmem:[#allocation2 + $0x880] sm:$0xf]  ;;  %v6206_v42 = vor.u32 %v6842_v35, %v6205_v34  ;;  %3289 = vmatpush.bf16.msrb.mxu2 %v5950_v38  ;;  %v5058_v34 = vor.u32 %v6550_v15, %v5055_v16  ;;  %v6414_v35 = vld [vmem:[#allocation2 + $0x184] sm:$0xf]  ;;  %v5314_v38 = vor.u32 %v6614_v18, %v5311_v20 }
  0x76   :  { %v6642_v40 = vld [vmem:[#allocation2 + $0x89c] sm:$0xf0]  ;;  %v4415_v15 = vld [vmem:[#allocation2 + $0xe0] sm:$0xf0] }
  0x77   :  { %v5661_v41 = vld [vmem:[#allocation2 + $0xa80] sm:$0xf]  ;;  %v5406_v48 = vor.u32 %v6642_v40, %v5405_v39  ;;  %3303 = vmatpush.bf16.msrb.mxu3 %v6206_v42  ;;  %v4767_v40 = vld [vmem:[#allocation2 + $0x3a0] sm:$0xf0] }
  0x78   :  { %v6706_v43 = vld [vmem:[#allocation2 + $0xa9c] sm:$0xf0]  ;;  %v5023_v42 = vld [vmem:[#allocation2 + $0x5a0] sm:$0xf0] }
  0x79   :  { %v5917_v44 = vld [vmem:[#allocation2 + $0xc80] sm:$0xf]  ;;  %v5662_v50 = vor.u32 %v6706_v43, %v5661_v41  ;;  %3262 = vmatpush.bf16.msrb.mxu0 %v5406_v48  ;;  %v6542_v41 = vld [vmem:[#allocation2 + $0x584] sm:$0xf]  ;;  %v7033_v43 = vpack.c.bf16 %v101_v26, %v93_v25  ;;  %v4514_v48 = vor.u32 %v6414_v35, %v4511_v36 }
  0x7a   :  { %v6770_v45 = vld [vmem:[#allocation2 + $0xc9c] sm:$0xf0]  ;;  %v6454_v16 = vld [vmem:[#allocation2 + $0x2c4] sm:$0xf] }
  0x7b   :  { %v6173_v46 = vld [vmem:[#allocation2 + $0xe80] sm:$0xf]  ;;  %v5918_v51 = vor.u32 %v6770_v45, %v5917_v44  ;;  %3276 = vmatpush.bf16.msrb.mxu1 %v5662_v50  ;;  %v7035_v44 = vpack.c.bf16 %v100_v30, %v92_v27  ;;  %v6606_v45 = vld [vmem:[#allocation2 + $0x784] sm:$0xf]  ;;  %v5026_v50 = vor.u32 %v6542_v41, %v5023_v42 }
  0x7c   :  { %v6834_v47 = vld [vmem:[#allocation2 + $0xe9c] sm:$0xf0]  ;;  %v6518_v20 = vld [vmem:[#allocation2 + $0x4c4] sm:$0xf] }
  0x7d   :  { %v5373_v49 = vld [vmem:[#allocation2 + $0x840] sm:$0xf]  ;;  %v6174_v55 = vor.u32 %v6834_v47, %v6173_v46  ;;  %3290 = vmatpush.bf16.msrb.mxu2 %v5918_v51  ;;  %v5279_v46 = vld [vmem:[#allocation2 + $0x7a0] sm:$0xf0]  ;;  %v7037_v47 = vpack.c.bf16 %v102_v32, %v94_v31 }
  0x7e   :  { %v6634_v52 = vld [vmem:[#allocation2 + $0x85c] sm:$0xf0]  ;;  %v6406_v51 = vld [vmem:[#allocation2 + $0x144] sm:$0xf] }
  0x7f   :  { %v5629_v53 = vld [vmem:[#allocation2 + $0xa40] sm:$0xf]  ;;  %v5374_v63 = vor.u32 %v6634_v52, %v5373_v49  ;;  %3304 = vmatpush.bf16.msrb.mxu3 %v6174_v55  ;;  %v4770_v49 = vor.u32 %v6478_v37, %v4767_v40  ;;  %v4479_v52 = vld [vmem:[#allocation2 + $0x160] sm:$0xf0] }
  0x80   :  { %v6698_v54 = vld [vmem:[#allocation2 + $0xa5c] sm:$0xf0]  ;;  %v4735_v55 = vld [vmem:[#allocation2 + $0x360] sm:$0xf0] }
  0x81   :  { %v5885_v56 = vld [vmem:[#allocation2 + $0xc40] sm:$0xf]  ;;  %v5630_v5 = vor.u32 %v6698_v54, %v5629_v53  ;;  %3263 = vmatpush.bf16.msrb.mxu0 %v5374_v63  ;;  %v6470_v53 = vld [vmem:[#allocation2 + $0x344] sm:$0xf]  ;;  %v5282_v54 = vor.u32 %v6606_v45, %v5279_v46 }
  0x82   :  { %v6762_v57 = vld [vmem:[#allocation2 + $0xc5c] sm:$0xf0]  ;;  %v6382_v27 = vld [vmem:[#allocation2 + $0x84] sm:$0xf] }
  0x83   :  { %v6141_v59 = vld [vmem:[#allocation2 + $0xe40] sm:$0xf]  ;;  %v5886_v6 = vor.u32 %v6762_v57, %v5885_v56  ;;  %3277 = vmatpush.bf16.msrb.mxu1 %v5630_v5  ;;  %v6534_v56 = vld [vmem:[#allocation2 + $0x544] sm:$0xf] }
  0x84   :  { %v6826_v60 = vld [vmem:[#allocation2 + $0xe5c] sm:$0xf0]  ;;  %v4991_v57 = vld [vmem:[#allocation2 + $0x560] sm:$0xf0] }
  0x85   :  { %v5341_v61 = vld [vmem:[#allocation2 + $0x800] sm:$0xf]  ;;  %v6142_v11 = vor.u32 %v6826_v60, %v6141_v59  ;;  %3291 = vmatpush.bf16.msrb.mxu2 %v5886_v6  ;;  %v6598_v59 = vld [vmem:[#allocation2 + $0x744] sm:$0xf]  ;;  %v4994_v63 = vor.u32 %v6534_v56, %v4991_v57 }
  0x86   :  { %v6626_v62 = vld [vmem:[#allocation2 + $0x81c] sm:$0xf0]  ;;  %v5247_v60 = vld [vmem:[#allocation2 + $0x760] sm:$0xf0] }
  0x87   :  { %v5597_v0 = vld [vmem:[#allocation2 + $0xa00] sm:$0xf]  ;;  %v5342_v19 = vor.u32 %v6626_v62, %v5341_v61  ;;  %3305 = vmatpush.bf16.msrb.mxu3 %v6142_v11  ;;  %v4482_v61 = vor.u32 %v6406_v51, %v4479_v52  ;;  %v4738_v62 = vor.u32 %v6470_v53, %v4735_v55  ;;  %v4703_v5 = vld [vmem:[#allocation2 + $0x320] sm:$0xf0] }
  0x88   :  { %v6690_v2 = vld [vmem:[#allocation2 + $0xa1c] sm:$0xf0]  ;;  %v6526_v6 = vld [vmem:[#allocation2 + $0x504] sm:$0xf] }
  0x89   :  { %v5853_v3 = vld [vmem:[#allocation2 + $0xc00] sm:$0xf]  ;;  %v5598_v23 = vor.u32 %v6690_v2, %v5597_v0  ;;  %3264 = vmatpush.bf16.msrb.mxu0 %v5342_v19  ;;  %v6398_v0 = vld [vmem:[#allocation2 + $0x104] sm:$0xf] }
  0x8a   :  { %v6754_v4 = vld [vmem:[#allocation2 + $0xc1c] sm:$0xf0]  ;;  %v4447_v2 = vld [vmem:[#allocation2 + $0x120] sm:$0xf0] }
  0x8b   :  { %v6109_v7 = vld [vmem:[#allocation2 + $0xe00] sm:$0xf]  ;;  %v5854_v24 = vor.u32 %v6754_v4, %v5853_v3  ;;  %3278 = vmatpush.bf16.msrb.mxu1 %v5598_v23  ;;  %v6462_v3 = vld [vmem:[#allocation2 + $0x304] sm:$0xf]  ;;  %v5250_v4 = vor.u32 %v6598_v59, %v5247_v60  ;;  %v4450_v11 = vor.u32 %v6398_v0, %v4447_v2 }
  0x8c   :  { %v6818_v8 = vld [vmem:[#allocation2 + $0xe1c] sm:$0xf0]  ;;  %v4706_v12 = vor.u32 %v6462_v3, %v4703_v5  ;;  %v4671_v19 = vld [vmem:[#allocation2 + $0x2e0] sm:$0xf0] }
  0x8d   :  { %v91_v21 = vld [vmem:[%s7355_s0 + $0x20] sm:$0xff]  ;;  %v6110_v28 = vor.u32 %v6818_v8, %v6109_v7  ;;  %3292 = vmatpush.bf16.msrb.mxu2 %v5854_v24  ;;  %3313 = vmatpush.bf16.msra.mxu0 %v4546_v29  ;;  %v4418_v24 = vor.u32 %v6390_v14, %v4415_v15  ;;  %v4674_v25 = vor.u32 %v6454_v16, %v4671_v19 }
  0x8e   :  { %v99_v22 = vld [vmem:[%s7355_s0 + $0x60] sm:$0xff]  ;;  %3279 = vmatmul.bf16.vlgmr.msrb.gmra.mxu1 %v7035_v44 }
  0x8f   :  { %v7031_v39 = vpack.c.bf16 %v99_v22, %v91_v21  ;;  %3306 = vmatpush.bf16.msrb.mxu3 %v6110_v28  ;;  %3327 = vmatpush.bf16.msra.mxu1 %v4802_v33  ;;  %v4959_v7 = vld [vmem:[#allocation2 + $0x520] sm:$0xf0] }
  0x90   :  { %3293 = vmatmul.bf16.vlgmr.msrb.gmra.mxu2 %v7033_v43  ;;  %v6590_v8 = vld [vmem:[#allocation2 + $0x704] sm:$0xf]  ;;  %v4962_v13 = vor.u32 %v6526_v6, %v4959_v7 }
  0x91   :  { %3341 = vmatpush.bf16.msra.mxu2 %v5058_v34  ;;  %3265 = vmatmul.bf16.vlgmr.msrb.gmra.mxu0 %v7031_v39  ;;  %v5218_v18 = vor.u32 %v6590_v8, %v5215_v9  ;;  %v4927_v21 = vld [vmem:[#allocation2 + $0x4e0] sm:$0xf0] }
  0x92   :  { %3307 = vmatmul.bf16.vlgmr.msrb.gmra.mxu3 %v7037_v47  ;;  %3314 = vmatpush.bf16.msra.mxu0 %v4514_v48  ;;  %v6582_v22 = vld [vmem:[#allocation2 + $0x6c4] sm:$0xf]  ;;  %v4930_v26 = vor.u32 %v6518_v20, %v4927_v21 }
  0x93   :  { %3355 = vmatpush.bf16.msra.mxu3 %v5314_v38  ;;  %3328 = vmatpush.bf16.msra.mxu1 %v4770_v49  ;;  %v5183_v23 = vld [vmem:[#allocation2 + $0x6e0] sm:$0xf0] }
  0x94   :  { %v4383_v28 = vld [vmem:[#allocation2 + $0xa0] sm:$0xf0]  ;;  %v5186_v30 = vor.u32 %v6582_v22, %v5183_v23 }
  0x95   :  { %3342 = vmatpush.bf16.msra.mxu2 %v5026_v50  ;;  %v6446_v29 = vld [vmem:[#allocation2 + $0x284] sm:$0xf]  ;;  %v4386_v36 = vor.u32 %v6382_v27, %v4383_v28 }
  0x96   :  { %3315 = vmatpush.bf16.msra.mxu0 %v4482_v61  ;;  %v4639_v31 = vld [vmem:[#allocation2 + $0x2a0] sm:$0xf0] }
  0x97   :  { %3356 = vmatpush.bf16.msra.mxu3 %v5282_v54  ;;  %3329 = vmatpush.bf16.msra.mxu1 %v4738_v62  ;;  %v6510_v32 = vld [vmem:[#allocation2 + $0x484] sm:$0xf]  ;;  %v4642_v37 = vor.u32 %v6446_v29, %v4639_v31 }
  0x98   :  { %v4895_v33 = vld [vmem:[#allocation2 + $0x4a0] sm:$0xf0] }
  0x99   :  { %3343 = vmatpush.bf16.msra.mxu2 %v4994_v63  ;;  %v6574_v34 = vld [vmem:[#allocation2 + $0x684] sm:$0xf]  ;;  %v4898_v38 = vor.u32 %v6510_v32, %v4895_v33 }
  0x9a   :  { %3316 = vmatpush.bf16.msra.mxu0 %v4450_v11  ;;  %v5151_v35 = vld [vmem:[#allocation2 + $0x6a0] sm:$0xf0] }
  0x9b   :  { %3357 = vmatpush.bf16.msra.mxu3 %v5250_v4  ;;  %3330 = vmatpush.bf16.msra.mxu1 %v4706_v12  ;;  %v6374_v40 = vld [vmem:[#allocation2 + $0x44] sm:$0xf]  ;;  %v5154_v45 = vor.u32 %v6574_v34, %v5151_v35 }
  0x9c   :  { %v4351_v41 = vld [vmem:[#allocation2 + $0x60] sm:$0xf0] }
  0x9d   :  { %3344 = vmatpush.bf16.msra.mxu2 %v4962_v13  ;;  %v6438_v42 = vld [vmem:[#allocation2 + $0x244] sm:$0xf]  ;;  %v4354_v52 = vor.u32 %v6374_v40, %v4351_v41 }
  0x9e   :  { %3317 = vmatpush.bf16.msra.mxu0 %v4418_v24  ;;  %v4607_v46 = vld [vmem:[#allocation2 + $0x260] sm:$0xf0] }
  0x9f   :  { %3358 = vmatpush.bf16.msra.mxu3 %v5218_v18  ;;  %3331 = vmatpush.bf16.msra.mxu1 %v4674_v25  ;;  %v6502_v48 = vld [vmem:[#allocation2 + $0x444] sm:$0xf]  ;;  %v4610_v55 = vor.u32 %v6438_v42, %v4607_v46 }
  0xa0   :  { %v4863_v49 = vld [vmem:[#allocation2 + $0x460] sm:$0xf0] }
  0xa1   :  { %3345 = vmatpush.bf16.msra.mxu2 %v4930_v26  ;;  %v6566_v50 = vld [vmem:[#allocation2 + $0x644] sm:$0xf]  ;;  %v4866_v56 = vor.u32 %v6502_v48, %v4863_v49 }
  0xa2   :  { %v5119_v51 = vld [vmem:[#allocation2 + $0x660] sm:$0xf0]  ;;  %3318 = vmatpush.bf16.msra.mxu0 %v4386_v36 }
  0xa3   :  { %3359 = vmatpush.bf16.msra.mxu3 %v5186_v30  ;;  %v6366_v53 = vld [vmem:[#allocation2 + $0x4] sm:$0xf]  ;;  %3332 = vmatpush.bf16.msra.mxu1 %v4642_v37  ;;  %v5122_v61 = vor.u32 %v6566_v50, %v5119_v51 }
  0xa4   :  { %v4319_v54 = vld [vmem:[#allocation2 + $0x20] sm:$0xf0] }
  0xa5   :  { %3346 = vmatpush.bf16.msra.mxu2 %v4898_v38  ;;  %v6430_v57 = vld [vmem:[#allocation2 + $0x204] sm:$0xf]  ;;  %v4322_v5 = vor.u32 %v6366_v53, %v4319_v54 }
  0xa6   :  { %v4575_v59 = vld [vmem:[#allocation2 + $0x220] sm:$0xf0]  ;;  %3319 = vmatpush.bf16.msra.mxu0 %v4354_v52 }
  0xa7   :  { %v6494_v60 = vld [vmem:[#allocation2 + $0x404] sm:$0xf]  ;;  %3360 = vmatpush.bf16.msra.mxu3 %v5154_v45  ;;  %3333 = vmatpush.bf16.msra.mxu1 %v4610_v55  ;;  %v4578_v9 = vor.u32 %v6430_v57, %v4575_v59 }
  0xa8   :  { %v4831_v62 = vld [vmem:[#allocation2 + $0x420] sm:$0xf0] }
  0xa9   :  { %v6558_v63 = vld [vmem:[#allocation2 + $0x604] sm:$0xf]  ;;  %3347 = vmatpush.bf16.msra.mxu2 %v4866_v56  ;;  %v4834_v11 = vor.u32 %v6494_v60, %v4831_v62 }
  0xaa   :  { %v5087_v0 = vld [vmem:[#allocation2 + $0x620] sm:$0xf0]  ;;  %3320 = vmatpush.bf16.msra.mxu0 %v4322_v5 }
  0xab   :  { %v6678_v2 = vld [vmem:[#allocation2 + $0x9c4] sm:$0xf]  ;;  %3361 = vmatpush.bf16.msra.mxu3 %v5122_v61  ;;  %v5090_v14 = vor.u32 %v6558_v63, %v5087_v0  ;;  %3334 = vmatpush.bf16.msra.mxu1 %v4578_v9 }
  0xac   :  { %v5567_v3 = vld [vmem:[#allocation2 + $0x9e0] sm:$0xf0] }
  0xad   :  { %v6742_v4 = vld [vmem:[#allocation2 + $0xbc4] sm:$0xf]  ;;  %v5570_v15 = vor.u32 %v6678_v2, %v5567_v3  ;;  %3348 = vmatpush.bf16.msra.mxu2 %v4834_v11  ;;  %3321 = vmatmul.bf16.vlgmr.msra.gmra.mxu0 %v6980_v58 }
  0xae   :  { %v5823_v6 = vld [vmem:[#allocation2 + $0xbe0] sm:$0xf0]  ;;  %3335 = vmatmul.bf16.vlgmr.msra.gmra.mxu1 %v6998_v10 }
  0xaf   :  { %v6806_v7 = vld [vmem:[#allocation2 + $0xdc4] sm:$0xf]  ;;  %v5826_v16 = vor.u32 %v6742_v4, %v5823_v6  ;;  %3362 = vmatpush.bf16.msra.mxu3 %v5090_v14  ;;  %3369 = vmatpush.bf16.msrb.mxu0 %v5570_v15 }
  0xb0   :  { %v6079_v8 = vld [vmem:[#allocation2 + $0xde0] sm:$0xf0]  ;;  %3349 = vmatmul.bf16.vlgmr.msra.gmra.mxu2 %v6985_v1 }
  0xb1   :  { %v6870_v12 = vld [vmem:[#allocation2 + $0xfc4] sm:$0xf]  ;;  %v6082_v18 = vor.u32 %v6806_v7, %v6079_v8  ;;  %3383 = vmatpush.bf16.msrb.mxu1 %v5826_v16 }
  0xb2   :  { %v6335_v13 = vld [vmem:[#allocation2 + $0xfe0] sm:$0xf0]  ;;  %3363 = vmatmul.bf16.vlgmr.msra.gmra.mxu3 %v7003_v17 }
  0xb3   :  { %v6670_v19 = vld [vmem:[#allocation2 + $0x984] sm:$0xf]  ;;  %v6338_v22 = vor.u32 %v6870_v12, %v6335_v13  ;;  %3397 = vmatpush.bf16.msrb.mxu2 %v6082_v18 }
  0xb4   :  { %v5535_v20 = vld [vmem:[#allocation2 + $0x9a0] sm:$0xf0] }
  0xb5   :  { %v6734_v21 = vld [vmem:[#allocation2 + $0xb84] sm:$0xf]  ;;  %v5538_v28 = vor.u32 %v6670_v19, %v5535_v20  ;;  %3411 = vmatpush.bf16.msrb.mxu3 %v6338_v22 }
  0xb6   :  { %v5791_v23 = vld [vmem:[#allocation2 + $0xba0] sm:$0xf0] }
  0xb7   :  { %v6798_v24 = vld [vmem:[#allocation2 + $0xd84] sm:$0xf]  ;;  %v5794_v29 = vor.u32 %v6734_v21, %v5791_v23  ;;  %3370 = vmatpush.bf16.msrb.mxu0 %v5538_v28 }
  0xb8   :  { %v6047_v25 = vld [vmem:[#allocation2 + $0xda0] sm:$0xf0] }
  0xb9   :  { %v6862_v26 = vld [vmem:[#allocation2 + $0xf84] sm:$0xf]  ;;  %v6050_v30 = vor.u32 %v6798_v24, %v6047_v25  ;;  %3384 = vmatpush.bf16.msrb.mxu1 %v5794_v29 }
  0xba   :  { %v6303_v27 = vld [vmem:[#allocation2 + $0xfa0] sm:$0xf0] }
  0xbb   :  { %v6662_v31 = vld [vmem:[#allocation2 + $0x944] sm:$0xf]  ;;  %v6306_v34 = vor.u32 %v6862_v26, %v6303_v27  ;;  %3398 = vmatpush.bf16.msrb.mxu2 %v6050_v30 }
  0xbc   :  { %v5503_v32 = vld [vmem:[#allocation2 + $0x960] sm:$0xf0] }
  0xbd   :  { %v6726_v33 = vld [vmem:[#allocation2 + $0xb44] sm:$0xf]  ;;  %v5506_v41 = vor.u32 %v6662_v31, %v5503_v32  ;;  %3412 = vmatpush.bf16.msrb.mxu3 %v6306_v34 }
  0xbe   :  { %v5759_v35 = vld [vmem:[#allocation2 + $0xb60] sm:$0xf0] }
  0xbf   :  { %v6790_v36 = vld [vmem:[#allocation2 + $0xd44] sm:$0xf]  ;;  %v5762_v42 = vor.u32 %v6726_v33, %v5759_v35  ;;  %3371 = vmatpush.bf16.msrb.mxu0 %v5506_v41 }
  0xc0   :  { %v6015_v37 = vld [vmem:[#allocation2 + $0xd60] sm:$0xf0] }
  0xc1   :  { %v6854_v38 = vld [vmem:[#allocation2 + $0xf44] sm:$0xf]  ;;  %v6018_v45 = vor.u32 %v6790_v36, %v6015_v37  ;;  %3385 = vmatpush.bf16.msrb.mxu1 %v5762_v42 }
  0xc2   :  { %v6271_v40 = vld [vmem:[#allocation2 + $0xf60] sm:$0xf0] }
  0xc3   :  { %v6654_v46 = vld [vmem:[#allocation2 + $0x904] sm:$0xf]  ;;  %v6274_v50 = vor.u32 %v6854_v38, %v6271_v40  ;;  %3399 = vmatpush.bf16.msrb.mxu2 %v6018_v45 }
  0xc4   :  { %v5471_v48 = vld [vmem:[#allocation2 + $0x920] sm:$0xf0] }
  0xc5   :  { %v6718_v49 = vld [vmem:[#allocation2 + $0xb04] sm:$0xf]  ;;  %v5474_v56 = vor.u32 %v6654_v46, %v5471_v48  ;;  %3413 = vmatpush.bf16.msrb.mxu3 %v6274_v50  ;;  %v4549_v48 = vld [vmem:[#allocation2 + $0x1c8] sm:$0xf] }
  0xc6   :  { %v5727_v51 = vld [vmem:[#allocation2 + $0xb20] sm:$0xf0]  ;;  %v4805_v50 = vld [vmem:[#allocation2 + $0x3c8] sm:$0xf] }
  0xc7   :  { %v6782_v52 = vld [vmem:[#allocation2 + $0xd04] sm:$0xf]  ;;  %v5730_v57 = vor.u32 %v6718_v49, %v5727_v51  ;;  %3372 = vmatpush.bf16.msrb.mxu0 %v5474_v56  ;;  %v6427_v49 = vld [vmem:[#allocation2 + $0x1e4] sm:$0xf0] }
  0xc8   :  { %v5983_v53 = vld [vmem:[#allocation2 + $0xd20] sm:$0xf0] }
  0xc9   :  { %v6846_v54 = vld [vmem:[#allocation2 + $0xf04] sm:$0xf]  ;;  %v5986_v59 = vor.u32 %v6782_v52, %v5983_v53  ;;  %3386 = vmatpush.bf16.msrb.mxu1 %v5730_v57  ;;  %v6491_v52 = vld [vmem:[#allocation2 + $0x3e4] sm:$0xf0] }
  0xca   :  { %v6239_v55 = vld [vmem:[#allocation2 + $0xf20] sm:$0xf0]  ;;  %v5061_v53 = vld [vmem:[#allocation2 + $0x5c8] sm:$0xf] }
  0xcb   :  { %v6646_v60 = vld [vmem:[#allocation2 + $0x8c4] sm:$0xf]  ;;  %v6242_v63 = vor.u32 %v6846_v54, %v6239_v55  ;;  %3400 = vmatpush.bf16.msrb.mxu2 %v5986_v59  ;;  %v6555_v54 = vld [vmem:[#allocation2 + $0x5e4] sm:$0xf0] }
  0xcc   :  { %v5439_v61 = vld [vmem:[#allocation2 + $0x8e0] sm:$0xf0]  ;;  %v5317_v57 = vld [vmem:[#allocation2 + $0x7c8] sm:$0xf] }
  0xcd   :  { %v6710_v62 = vld [vmem:[#allocation2 + $0xac4] sm:$0xf]  ;;  %v5442_v6 = vor.u32 %v6646_v60, %v5439_v61  ;;  %3414 = vmatpush.bf16.msrb.mxu3 %v6242_v63  ;;  %v6619_v59 = vld [vmem:[#allocation2 + $0x7e4] sm:$0xf0]  ;;  %v4550_v61 = vor.u32 %v6427_v49, %v4549_v48  ;;  %v5062_v63 = vor.u32 %v6555_v54, %v5061_v53 }
  0xce   :  { %v5695_v0 = vld [vmem:[#allocation2 + $0xae0] sm:$0xf0]  ;;  %v4933_v48 = vld [vmem:[#allocation2 + $0x4c8] sm:$0xf] }
  0xcf   :  { %v6774_v2 = vld [vmem:[#allocation2 + $0xcc4] sm:$0xf]  ;;  %v5698_v7 = vor.u32 %v6710_v62, %v5695_v0  ;;  %3373 = vmatpush.bf16.msrb.mxu0 %v5442_v6  ;;  %v4806_v62 = vor.u32 %v6491_v52, %v4805_v50  ;;  %v4517_v0 = vld [vmem:[#allocation2 + $0x188] sm:$0xf] }
  0xd0   :  { %v5951_v3 = vld [vmem:[#allocation2 + $0xce0] sm:$0xf0]  ;;  %v5029_v6 = vld [vmem:[#allocation2 + $0x588] sm:$0xf] }
  0xd1   :  { %v6838_v4 = vld [vmem:[#allocation2 + $0xec4] sm:$0xf]  ;;  %v5954_v8 = vor.u32 %v6774_v2, %v5951_v3  ;;  %3387 = vmatpush.bf16.msrb.mxu1 %v5698_v7  ;;  %v6419_v2 = vld [vmem:[#allocation2 + $0x1a4] sm:$0xf0] }
  0xd2   :  { %v6207_v5 = vld [vmem:[#allocation2 + $0xee0] sm:$0xf0]  ;;  %v4773_v3 = vld [vmem:[#allocation2 + $0x388] sm:$0xf] }
  0xd3   :  { %v6638_v9 = vld [vmem:[#allocation2 + $0x884] sm:$0xf]  ;;  %v6210_v13 = vor.u32 %v6838_v4, %v6207_v5  ;;  %3401 = vmatpush.bf16.msrb.mxu2 %v5954_v8  ;;  %v5318_v4 = vor.u32 %v6619_v59, %v5317_v57  ;;  %v6483_v5 = vld [vmem:[#allocation2 + $0x3a4] sm:$0xf0] }
  0xd4   :  { %v5407_v11 = vld [vmem:[#allocation2 + $0x8a0] sm:$0xf0]  ;;  %v6547_v7 = vld [vmem:[#allocation2 + $0x5a4] sm:$0xf0] }
  0xd5   :  { %v6702_v12 = vld [vmem:[#allocation2 + $0xa84] sm:$0xf]  ;;  %v5410_v20 = vor.u32 %v6638_v9, %v5407_v11  ;;  %3415 = vmatpush.bf16.msrb.mxu3 %v6210_v13  ;;  %v5285_v8 = vld [vmem:[#allocation2 + $0x788] sm:$0xf]  ;;  %v4518_v11 = vor.u32 %v6419_v2, %v4517_v0  ;;  %v5030_v13 = vor.u32 %v6547_v7, %v5029_v6 }
  0xd6   :  { %v5663_v14 = vld [vmem:[#allocation2 + $0xaa0] sm:$0xf0]  ;;  %v6611_v9 = vld [vmem:[#allocation2 + $0x7a4] sm:$0xf0] }
  0xd7   :  { %v6766_v15 = vld [vmem:[#allocation2 + $0xc84] sm:$0xf]  ;;  %v5666_v21 = vor.u32 %v6702_v12, %v5663_v14  ;;  %3374 = vmatpush.bf16.msrb.mxu0 %v5410_v20  ;;  %v4774_v12 = vor.u32 %v6483_v5, %v4773_v3  ;;  %v4485_v14 = vld [vmem:[#allocation2 + $0x148] sm:$0xf] }
  0xd8   :  { %v5919_v16 = vld [vmem:[#allocation2 + $0xca0] sm:$0xf0]  ;;  %v4997_v20 = vld [vmem:[#allocation2 + $0x548] sm:$0xf] }
  0xd9   :  { %v6830_v18 = vld [vmem:[#allocation2 + $0xe84] sm:$0xf]  ;;  %v5922_v22 = vor.u32 %v6766_v15, %v5919_v16  ;;  %3388 = vmatpush.bf16.msrb.mxu1 %v5666_v21  ;;  %v6411_v15 = vld [vmem:[#allocation2 + $0x164] sm:$0xf0] }
  0xda   :  { %v6175_v19 = vld [vmem:[#allocation2 + $0xea0] sm:$0xf0]  ;;  %v4741_v16 = vld [vmem:[#allocation2 + $0x348] sm:$0xf] }
  0xdb   :  { %v6630_v23 = vld [vmem:[#allocation2 + $0x844] sm:$0xf]  ;;  %v6178_v26 = vor.u32 %v6830_v18, %v6175_v19  ;;  %3402 = vmatpush.bf16.msrb.mxu2 %v5922_v22  ;;  %v5286_v18 = vor.u32 %v6611_v9, %v5285_v8  ;;  %v6475_v19 = vld [vmem:[#allocation2 + $0x364] sm:$0xf0] }
  0xdc   :  { %v5375_v24 = vld [vmem:[#allocation2 + $0x860] sm:$0xf0]  ;;  %v6539_v21 = vld [vmem:[#allocation2 + $0x564] sm:$0xf0] }
  0xdd   :  { %v6694_v25 = vld [vmem:[#allocation2 + $0xa44] sm:$0xf]  ;;  %v5378_v32 = vor.u32 %v6630_v23, %v5375_v24  ;;  %3416 = vmatpush.bf16.msrb.mxu3 %v6178_v26  ;;  %v5253_v22 = vld [vmem:[#allocation2 + $0x748] sm:$0xf]  ;;  %v4486_v24 = vor.u32 %v6411_v15, %v4485_v14  ;;  %v4998_v26 = vor.u32 %v6539_v21, %v4997_v20 }
  0xde   :  { %v5631_v27 = vld [vmem:[#allocation2 + $0xa60] sm:$0xf0]  ;;  %v6603_v23 = vld [vmem:[#allocation2 + $0x764] sm:$0xf0] }
  0xdf   :  { %v6758_v28 = vld [vmem:[#allocation2 + $0xc44] sm:$0xf]  ;;  %v5634_v35 = vor.u32 %v6694_v25, %v5631_v27  ;;  %3375 = vmatpush.bf16.msrb.mxu0 %v5378_v32  ;;  %v4742_v25 = vor.u32 %v6475_v19, %v4741_v16  ;;  %v4453_v27 = vld [vmem:[#allocation2 + $0x108] sm:$0xf] }
  0xe0   :  { %v5887_v29 = vld [vmem:[#allocation2 + $0xc60] sm:$0xf0]  ;;  %v4965_v32 = vld [vmem:[#allocation2 + $0x508] sm:$0xf] }
  0xe1   :  { %v6822_v30 = vld [vmem:[#allocation2 + $0xe44] sm:$0xf]  ;;  %v5890_v36 = vor.u32 %v6758_v28, %v5887_v29  ;;  %3389 = vmatpush.bf16.msrb.mxu1 %v5634_v35  ;;  %v6403_v28 = vld [vmem:[#allocation2 + $0x124] sm:$0xf0] }
  0xe2   :  { %v6143_v31 = vld [vmem:[#allocation2 + $0xe60] sm:$0xf0]  ;;  %v4709_v29 = vld [vmem:[#allocation2 + $0x308] sm:$0xf] }
  0xe3   :  { %v6622_v33 = vld [vmem:[#allocation2 + $0x804] sm:$0xf]  ;;  %v6146_v41 = vor.u32 %v6822_v30, %v6143_v31  ;;  %3403 = vmatpush.bf16.msrb.mxu2 %v5890_v36  ;;  %v5254_v30 = vor.u32 %v6603_v23, %v5253_v22  ;;  %v6467_v31 = vld [vmem:[#allocation2 + $0x324] sm:$0xf0]  ;;  %v4454_v36 = vor.u32 %v6403_v28, %v4453_v27 }
  0xe4   :  { %v5343_v34 = vld [vmem:[#allocation2 + $0x820] sm:$0xf0]  ;;  %v6595_v35 = vld [vmem:[#allocation2 + $0x724] sm:$0xf0] }
  0xe5   :  { %v6686_v37 = vld [vmem:[#allocation2 + $0xa04] sm:$0xf]  ;;  %v5346_v51 = vor.u32 %v6622_v33, %v5343_v34  ;;  %3417 = vmatpush.bf16.msrb.mxu3 %v6146_v41  ;;  %v6531_v33 = vld [vmem:[#allocation2 + $0x524] sm:$0xf0] }
  0xe6   :  { %v5599_v38 = vld [vmem:[#allocation2 + $0xa20] sm:$0xf0]  ;;  %v5221_v34 = vld [vmem:[#allocation2 + $0x708] sm:$0xf] }
  0xe7   :  { %v6750_v40 = vld [vmem:[#allocation2 + $0xc04] sm:$0xf]  ;;  %v5602_v55 = vor.u32 %v6686_v37, %v5599_v38  ;;  %3376 = vmatpush.bf16.msrb.mxu0 %v5346_v51  ;;  %v4710_v37 = vor.u32 %v6467_v31, %v4709_v29  ;;  %v4966_v38 = vor.u32 %v6531_v33, %v4965_v32  ;;  %v6395_v41 = vld [vmem:[#allocation2 + $0xe4] sm:$0xf0] }
  0xe8   :  { %v5855_v42 = vld [vmem:[#allocation2 + $0xc20] sm:$0xf0]  ;;  %v6523_v49 = vld [vmem:[#allocation2 + $0x4e4] sm:$0xf0] }
  0xe9   :  { %v6814_v45 = vld [vmem:[#allocation2 + $0xe04] sm:$0xf]  ;;  %v5858_v56 = vor.u32 %v6750_v40, %v5855_v42  ;;  %3390 = vmatpush.bf16.msrb.mxu1 %v5602_v55  ;;  %v4421_v40 = vld [vmem:[#allocation2 + $0xc8] sm:$0xf]  ;;  %v4934_v54 = vor.u32 %v6523_v49, %v4933_v48 }
  0xea   :  { %v6111_v46 = vld [vmem:[#allocation2 + $0xe20] sm:$0xf0]  ;;  %3377 = vmatmul.bf16.vlgmr.msrb.gmra.mxu0 %v7031_v39  ;;  %v4677_v42 = vld [vmem:[#allocation2 + $0x2c8] sm:$0xf]  ;;  %v4422_v52 = vor.u32 %v6395_v41, %v4421_v40 }
  0xeb   :  { %v6114_v60 = vor.u32 %v6814_v45, %v6111_v46  ;;  %3404 = vmatpush.bf16.msrb.mxu2 %v5858_v56  ;;  %3425 = vmatpush.bf16.msra.mxu0 %v4550_v61  ;;  %v5222_v45 = vor.u32 %v6595_v35, %v5221_v34  ;;  %v6459_v46 = vld [vmem:[#allocation2 + $0x2e4] sm:$0xf0] }
  0xec   :  { %3391 = vmatmul.bf16.vlgmr.msrb.gmra.mxu1 %v7035_v44  ;;  %v5189_v50 = vld [vmem:[#allocation2 + $0x6c8] sm:$0xf]  ;;  %v4678_v53 = vor.u32 %v6459_v46, %v4677_v42 }
  0xed   :  { %3418 = vmatpush.bf16.msrb.mxu3 %v6114_v60  ;;  %3439 = vmatpush.bf16.msra.mxu1 %v4806_v62  ;;  %v6587_v51 = vld [vmem:[#allocation2 + $0x6e4] sm:$0xf0] }
  0xee   :  { %3405 = vmatmul.bf16.vlgmr.msrb.gmra.mxu2 %v7033_v43  ;;  %v4389_v55 = vld [vmem:[#allocation2 + $0x88] sm:$0xf]  ;;  %v5190_v59 = vor.u32 %v6587_v51, %v5189_v50 }
  0xef   :  { %3453 = vmatpush.bf16.msra.mxu2 %v5062_v63  ;;  %3426 = vmatpush.bf16.msra.mxu0 %v4518_v11  ;;  %v6387_v56 = vld [vmem:[#allocation2 + $0xa4] sm:$0xf0] }
  0xf0   :  { %3419 = vmatmul.bf16.vlgmr.msrb.gmra.mxu3 %v7037_v47  ;;  %v4645_v57 = vld [vmem:[#allocation2 + $0x288] sm:$0xf]  ;;  %v4390_v2 = vor.u32 %v6387_v56, %v4389_v55 }
  0xf1   :  { %3467 = vmatpush.bf16.msra.mxu3 %v5318_v4  ;;  %3440 = vmatpush.bf16.msra.mxu1 %v4774_v12  ;;  %v6451_v60 = vld [vmem:[#allocation2 + $0x2a4] sm:$0xf0] }
  0xf2   :  { %v4901_v61 = vld [vmem:[#allocation2 + $0x488] sm:$0xf]  ;;  %v4646_v3 = vor.u32 %v6451_v60, %v4645_v57 }
  0xf3   :  { %3454 = vmatpush.bf16.msra.mxu2 %v5030_v13  ;;  %3427 = vmatpush.bf16.msra.mxu0 %v4486_v24  ;;  %v6515_v62 = vld [vmem:[#allocation2 + $0x4a4] sm:$0xf0] }
  0xf4   :  { %v5157_v63 = vld [vmem:[#allocation2 + $0x688] sm:$0xf]  ;;  %v4902_v4 = vor.u32 %v6515_v62, %v4901_v61 }
  0xf5   :  { %3468 = vmatpush.bf16.msra.mxu3 %v5286_v18  ;;  %3441 = vmatpush.bf16.msra.mxu1 %v4742_v25  ;;  %v6579_v0 = vld [vmem:[#allocation2 + $0x6a4] sm:$0xf0] }
  0xf6   :  { %v4357_v5 = vld [vmem:[#allocation2 + $0x48] sm:$0xf]  ;;  %v5158_v8 = vor.u32 %v6579_v0, %v5157_v63 }
  0xf7   :  { %3455 = vmatpush.bf16.msra.mxu2 %v4998_v26  ;;  %3428 = vmatpush.bf16.msra.mxu0 %v4454_v36  ;;  %v6379_v6 = vld [vmem:[#allocation2 + $0x64] sm:$0xf0] }
  0xf8   :  { %v4613_v7 = vld [vmem:[#allocation2 + $0x248] sm:$0xf]  ;;  %v4358_v15 = vor.u32 %v6379_v6, %v4357_v5 }
  0xf9   :  { %3469 = vmatpush.bf16.msra.mxu3 %v5254_v30  ;;  %3442 = vmatpush.bf16.msra.mxu1 %v4710_v37  ;;  %v6443_v9 = vld [vmem:[#allocation2 + $0x264] sm:$0xf0] }
  0xfa   :  { %v4869_v11 = vld [vmem:[#allocation2 + $0x448] sm:$0xf]  ;;  %v4614_v19 = vor.u32 %v6443_v9, %v4613_v7 }
  0xfb   :  { %3456 = vmatpush.bf16.msra.mxu2 %v4966_v38  ;;  %3429 = vmatpush.bf16.msra.mxu0 %v4422_v52  ;;  %v6507_v12 = vld [vmem:[#allocation2 + $0x464] sm:$0xf0] }
  0xfc   :  { %v5125_v13 = vld [vmem:[#allocation2 + $0x648] sm:$0xf]  ;;  %v4870_v20 = vor.u32 %v6507_v12, %v4869_v11 }
  0xfd   :  { %3470 = vmatpush.bf16.msra.mxu3 %v5222_v45  ;;  %3443 = vmatpush.bf16.msra.mxu1 %v4678_v53  ;;  %v6571_v14 = vld [vmem:[#allocation2 + $0x664] sm:$0xf0] }
  0xfe   :  { %v4325_v16 = vld [vmem:[#allocation2 + $0x8] sm:$0xf]  ;;  %v5126_v24 = vor.u32 %v6571_v14, %v5125_v13 }
  0xff   :  { %3457 = vmatpush.bf16.msra.mxu2 %v4934_v54  ;;  %3430 = vmatpush.bf16.msra.mxu0 %v4390_v2  ;;  %v6371_v18 = vld [vmem:[#allocation2 + $0x24] sm:$0xf0] }
 0x100   :  { %v4581_v21 = vld [vmem:[#allocation2 + $0x208] sm:$0xf]  ;;  %v4326_v31 = vor.u32 %v6371_v18, %v4325_v16 }
 0x101   :  { %3471 = vmatpush.bf16.msra.mxu3 %v5190_v59  ;;  %3444 = vmatpush.bf16.msra.mxu1 %v4646_v3  ;;  %v6435_v22 = vld [vmem:[#allocation2 + $0x224] sm:$0xf0] }
 0x102   :  { %v4837_v23 = vld [vmem:[#allocation2 + $0x408] sm:$0xf]  ;;  %v4582_v35 = vor.u32 %v6435_v22, %v4581_v21 }
 0x103   :  { %3458 = vmatpush.bf16.msra.mxu2 %v4902_v4  ;;  %v6499_v25 = vld [vmem:[#allocation2 + $0x424] sm:$0xf0]  ;;  %3431 = vmatpush.bf16.msra.mxu0 %v4358_v15 }
 0x104   :  { %v5093_v26 = vld [vmem:[#allocation2 + $0x608] sm:$0xf]  ;;  %v4838_v36 = vor.u32 %v6499_v25, %v4837_v23 }
 0x105   :  { %3472 = vmatpush.bf16.msra.mxu3 %v5158_v8  ;;  %v6563_v27 = vld [vmem:[#allocation2 + $0x624] sm:$0xf0]  ;;  %3445 = vmatpush.bf16.msra.mxu1 %v4614_v19 }
 0x106   :  { %v5573_v28 = vld [vmem:[#allocation2 + $0x9c8] sm:$0xf]  ;;  %v5094_v40 = vor.u32 %v6563_v27, %v5093_v26 }
 0x107   :  { %v6683_v29 = vld [vmem:[#allocation2 + $0x9e4] sm:$0xf0]  ;;  %3459 = vmatpush.bf16.msra.mxu2 %v4870_v20  ;;  %3432 = vmatpush.bf16.msra.mxu0 %v4326_v31 }
 0x108   :  { %v5829_v30 = vld [vmem:[#allocation2 + $0xbc8] sm:$0xf]  ;;  %v5574_v41 = vor.u32 %v6683_v29, %v5573_v28 }
 0x109   :  { %v6747_v32 = vld [vmem:[#allocation2 + $0xbe4] sm:$0xf0]  ;;  %3473 = vmatpush.bf16.msra.mxu3 %v5126_v24  ;;  %3446 = vmatpush.bf16.msra.mxu1 %v4582_v35 }
 0x10a   :  { %v6085_v33 = vld [vmem:[#allocation2 + $0xdc8] sm:$0xf]  ;;  %v5830_v42 = vor.u32 %v6747_v32, %v5829_v30  ;;  %3433 = vmatmul.bf16.vlgmr.msra.gmra.mxu0 %v6980_v58 }
 0x10b   :  { %v6811_v34 = vld [vmem:[#allocation2 + $0xde4] sm:$0xf0]  ;;  %3460 = vmatpush.bf16.msra.mxu2 %v4838_v36  ;;  %3481 = vmatpush.bf16.msrb.mxu0 %v5574_v41 }
 0x10c   :  { %v6341_v37 = vld [vmem:[#allocation2 + $0xfc8] sm:$0xf]  ;;  %v6086_v45 = vor.u32 %v6811_v34, %v6085_v33  ;;  %3447 = vmatmul.bf16.vlgmr.msra.gmra.mxu1 %v6998_v10 }
 0x10d   :  { %v6875_v38 = vld [vmem:[#allocation2 + $0xfe4] sm:$0xf0]  ;;  %3474 = vmatpush.bf16.msra.mxu3 %v5094_v40  ;;  %3495 = vmatpush.bf16.msrb.mxu1 %v5830_v42 }
 0x10e   :  { %v5541_v46 = vld [vmem:[#allocation2 + $0x988] sm:$0xf]  ;;  %v6342_v50 = vor.u32 %v6875_v38, %v6341_v37  ;;  %3461 = vmatmul.bf16.vlgmr.msra.gmra.mxu2 %v6985_v1 }
 0x10f   :  { %v6675_v48 = vld [vmem:[#allocation2 + $0x9a4] sm:$0xf0]  ;;  %3509 = vmatpush.bf16.msrb.mxu2 %v6086_v45 }
 0x110   :  { %v5797_v49 = vld [vmem:[#allocation2 + $0xb88] sm:$0xf]  ;;  %v5542_v56 = vor.u32 %v6675_v48, %v5541_v46  ;;  %3475 = vmatmul.bf16.vlgmr.msra.gmra.mxu3 %v7003_v17 }
 0x111   :  { %v6739_v51 = vld [vmem:[#allocation2 + $0xba4] sm:$0xf0]  ;;  %3523 = vmatpush.bf16.msrb.mxu3 %v6342_v50 }
 0x112   :  { %v6053_v52 = vld [vmem:[#allocation2 + $0xd88] sm:$0xf]  ;;  %v5798_v57 = vor.u32 %v6739_v51, %v5797_v49  ;;  %3482 = vmatpush.bf16.msrb.mxu0 %v5542_v56 }
 0x113   :  { %v6803_v53 = vld [vmem:[#allocation2 + $0xda4] sm:$0xf0] }
 0x114   :  { %v6309_v54 = vld [vmem:[#allocation2 + $0xf88] sm:$0xf]  ;;  %v6054_v59 = vor.u32 %v6803_v53, %v6053_v52  ;;  %3496 = vmatpush.bf16.msrb.mxu1 %v5798_v57 }
 0x115   :  { %v6867_v55 = vld [vmem:[#allocation2 + $0xfa4] sm:$0xf0] }
 0x116   :  { %v5509_v60 = vld [vmem:[#allocation2 + $0x948] sm:$0xf]  ;;  %v6310_v63 = vor.u32 %v6867_v55, %v6309_v54  ;;  %3510 = vmatpush.bf16.msrb.mxu2 %v6054_v59 }
 0x117   :  { %v6667_v61 = vld [vmem:[#allocation2 + $0x964] sm:$0xf0] }
 0x118   :  { %v5765_v62 = vld [vmem:[#allocation2 + $0xb48] sm:$0xf]  ;;  %v5510_v6 = vor.u32 %v6667_v61, %v5509_v60  ;;  %3524 = vmatpush.bf16.msrb.mxu3 %v6310_v63 }
 0x119   :  { %v6731_v0 = vld [vmem:[#allocation2 + $0xb64] sm:$0xf0] }
 0x11a   :  { %v6021_v2 = vld [vmem:[#allocation2 + $0xd48] sm:$0xf]  ;;  %v5766_v7 = vor.u32 %v6731_v0, %v5765_v62  ;;  %3483 = vmatpush.bf16.msrb.mxu0 %v5510_v6 }
 0x11b   :  { %v6795_v3 = vld [vmem:[#allocation2 + $0xd64] sm:$0xf0] }
 0x11c   :  { %v6277_v4 = vld [vmem:[#allocation2 + $0xf48] sm:$0xf]  ;;  %v6022_v8 = vor.u32 %v6795_v3, %v6021_v2  ;;  %3497 = vmatpush.bf16.msrb.mxu1 %v5766_v7 }
 0x11d   :  { %v6859_v5 = vld [vmem:[#allocation2 + $0xf64] sm:$0xf0] }
 0x11e   :  { %v5477_v9 = vld [vmem:[#allocation2 + $0x908] sm:$0xf]  ;;  %v6278_v13 = vor.u32 %v6859_v5, %v6277_v4  ;;  %3511 = vmatpush.bf16.msrb.mxu2 %v6022_v8 }
 0x11f   :  { %v6659_v11 = vld [vmem:[#allocation2 + $0x924] sm:$0xf0] }
 0x120   :  { %v5733_v12 = vld [vmem:[#allocation2 + $0xb08] sm:$0xf]  ;;  %v5478_v20 = vor.u32 %v6659_v11, %v5477_v9  ;;  %3525 = vmatpush.bf16.msrb.mxu3 %v6278_v13  ;;  %v6423_v11 = vld [vmem:[#allocation2 + $0x1cc] sm:$0xf] }
 0x121   :  { %v6723_v14 = vld [vmem:[#allocation2 + $0xb24] sm:$0xf0]  ;;  %v6487_v13 = vld [vmem:[#allocation2 + $0x3cc] sm:$0xf] }
 0x122   :  { %v5989_v15 = vld [vmem:[#allocation2 + $0xd08] sm:$0xf]  ;;  %v5734_v21 = vor.u32 %v6723_v14, %v5733_v12  ;;  %3484 = vmatpush.bf16.msrb.mxu0 %v5478_v20  ;;  %v4551_v12 = vld [vmem:[#allocation2 + $0x1e8] sm:$0xf0] }
 0x123   :  { %v6787_v16 = vld [vmem:[#allocation2 + $0xd24] sm:$0xf0] }
 0x124   :  { %v6245_v18 = vld [vmem:[#allocation2 + $0xf08] sm:$0xf]  ;;  %v5990_v22 = vor.u32 %v6787_v16, %v5989_v15  ;;  %3498 = vmatpush.bf16.msrb.mxu1 %v5734_v21  ;;  %v4807_v15 = vld [vmem:[#allocation2 + $0x3e8] sm:$0xf0] }
 0x125   :  { %v6851_v19 = vld [vmem:[#allocation2 + $0xf24] sm:$0xf0]  ;;  %v6551_v16 = vld [vmem:[#allocation2 + $0x5cc] sm:$0xf] }
 0x126   :  { %v5445_v23 = vld [vmem:[#allocation2 + $0x8c8] sm:$0xf]  ;;  %v6246_v26 = vor.u32 %v6851_v19, %v6245_v18  ;;  %3512 = vmatpush.bf16.msrb.mxu2 %v5990_v22  ;;  %v5063_v18 = vld [vmem:[#allocation2 + $0x5e8] sm:$0xf0] }
 0x127   :  { %v6651_v24 = vld [vmem:[#allocation2 + $0x8e4] sm:$0xf0]  ;;  %v6615_v21 = vld [vmem:[#allocation2 + $0x7cc] sm:$0xf] }
 0x128   :  { %v5701_v25 = vld [vmem:[#allocation2 + $0xac8] sm:$0xf]  ;;  %v5446_v32 = vor.u32 %v6651_v24, %v5445_v23  ;;  %3526 = vmatpush.bf16.msrb.mxu3 %v6246_v26  ;;  %v5319_v22 = vld [vmem:[#allocation2 + $0x7e8] sm:$0xf0]  ;;  %v4554_v24 = vor.u32 %v6423_v11, %v4551_v12  ;;  %v5066_v26 = vor.u32 %v6551_v16, %v5063_v18 }
 0x129   :  { %v6715_v27 = vld [vmem:[#allocation2 + $0xae4] sm:$0xf0]  ;;  %v4679_v12 = vld [vmem:[#allocation2 + $0x2e8] sm:$0xf0] }
 0x12a   :  { %v5957_v28 = vld [vmem:[#allocation2 + $0xcc8] sm:$0xf]  ;;  %v5702_v33 = vor.u32 %v6715_v27, %v5701_v25  ;;  %3485 = vmatpush.bf16.msrb.mxu0 %v5446_v32  ;;  %v4810_v25 = vor.u32 %v6487_v13, %v4807_v15  ;;  %v6415_v27 = vld [vmem:[#allocation2 + $0x18c] sm:$0xf] }
 0x12b   :  { %v6779_v29 = vld [vmem:[#allocation2 + $0xce4] sm:$0xf0]  ;;  %v6543_v32 = vld [vmem:[#allocation2 + $0x58c] sm:$0xf] }
 0x12c   :  { %v6213_v30 = vld [vmem:[#allocation2 + $0xec8] sm:$0xf]  ;;  %v5958_v34 = vor.u32 %v6779_v29, %v5957_v28  ;;  %3499 = vmatpush.bf16.msrb.mxu1 %v5702_v33  ;;  %v4519_v28 = vld [vmem:[#allocation2 + $0x1a8] sm:$0xf0] }
 0x12d   :  { %v6843_v31 = vld [vmem:[#allocation2 + $0xee4] sm:$0xf0]  ;;  %v6479_v29 = vld [vmem:[#allocation2 + $0x38c] sm:$0xf] }
 0x12e   :  { %v5413_v35 = vld [vmem:[#allocation2 + $0x888] sm:$0xf]  ;;  %v6214_v38 = vor.u32 %v6843_v31, %v6213_v30  ;;  %3513 = vmatpush.bf16.msrb.mxu2 %v5958_v34  ;;  %v5322_v30 = vor.u32 %v6615_v21, %v5319_v22  ;;  %v4775_v31 = vld [vmem:[#allocation2 + $0x3a8] sm:$0xf0] }
 0x12f   :  { %v6643_v36 = vld [vmem:[#allocation2 + $0x8a4] sm:$0xf0]  ;;  %v5031_v33 = vld [vmem:[#allocation2 + $0x5a8] sm:$0xf0] }
 0x130   :  { %v5669_v37 = vld [vmem:[#allocation2 + $0xa88] sm:$0xf]  ;;  %v5414_v48 = vor.u32 %v6643_v36, %v5413_v35  ;;  %3527 = vmatpush.bf16.msrb.mxu3 %v6214_v38  ;;  %v6607_v34 = vld [vmem:[#allocation2 + $0x78c] sm:$0xf]  ;;  %v4522_v36 = vor.u32 %v6415_v27, %v4519_v28  ;;  %v5034_v38 = vor.u32 %v6543_v32, %v5031_v33  ;;  %v7065_v32 = vpop.f32.mrf.mxu3 }
 0x131   :  { %v6707_v40 = vld [vmem:[#allocation2 + $0xaa4] sm:$0xf0]  ;;  %v5287_v35 = vld [vmem:[#allocation2 + $0x7a8] sm:$0xf0] }
 0x132   :  { %v5925_v41 = vld [vmem:[#allocation2 + $0xc88] sm:$0xf]  ;;  %v5670_v49 = vor.u32 %v6707_v40, %v5669_v37  ;;  %3486 = vmatpush.bf16.msrb.mxu0 %v5414_v48  ;;  %v4778_v37 = vor.u32 %v6479_v29, %v4775_v31  ;;  %v6407_v40 = vld [vmem:[#allocation2 + $0x14c] sm:$0xf] }
 0x133   :  { %v6771_v42 = vld [vmem:[#allocation2 + $0xca4] sm:$0xf0]  ;;  %v6535_v48 = vld [vmem:[#allocation2 + $0x54c] sm:$0xf] }
 0x134   :  { %v6181_v45 = vld [vmem:[#allocation2 + $0xe88] sm:$0xf]  ;;  %v5926_v50 = vor.u32 %v6771_v42, %v5925_v41  ;;  %3500 = vmatpush.bf16.msrb.mxu1 %v5670_v49  ;;  %v4487_v41 = vld [vmem:[#allocation2 + $0x168] sm:$0xf0] }
 0x135   :  { %v6835_v46 = vld [vmem:[#allocation2 + $0xea4] sm:$0xf0]  ;;  %v6471_v42 = vld [vmem:[#allocation2 + $0x34c] sm:$0xf] }
 0x136   :  { %v5381_v51 = vld [vmem:[#allocation2 + $0x848] sm:$0xf]  ;;  %v6182_v54 = vor.u32 %v6835_v46, %v6181_v45  ;;  %3514 = vmatpush.bf16.msrb.mxu2 %v5926_v50  ;;  %v5290_v45 = vor.u32 %v6607_v34, %v5287_v35  ;;  %v4743_v46 = vld [vmem:[#allocation2 + $0x368] sm:$0xf0] }
 0x137   :  { %v6635_v52 = vld [vmem:[#allocation2 + $0x864] sm:$0xf0]  ;;  %v4999_v49 = vld [vmem:[#allocation2 + $0x568] sm:$0xf0] }
 0x138   :  { %v5637_v53 = vld [vmem:[#allocation2 + $0xa48] sm:$0xf]  ;;  %v5382_v61 = vor.u32 %v6635_v52, %v5381_v51  ;;  %3528 = vmatpush.bf16.msrb.mxu3 %v6182_v54  ;;  %v6599_v50 = vld [vmem:[#allocation2 + $0x74c] sm:$0xf]  ;;  %v4490_v52 = vor.u32 %v6407_v40, %v4487_v41  ;;  %v5002_v54 = vor.u32 %v6535_v48, %v4999_v49 }
 0x139   :  { %v6699_v55 = vld [vmem:[#allocation2 + $0xa64] sm:$0xf0]  ;;  %v5255_v51 = vld [vmem:[#allocation2 + $0x768] sm:$0xf0] }
 0x13a   :  { %v5893_v56 = vld [vmem:[#allocation2 + $0xc48] sm:$0xf]  ;;  %v5638_v0 = vor.u32 %v6699_v55, %v5637_v53  ;;  %3487 = vmatpush.bf16.msrb.mxu0 %v5382_v61  ;;  %v4746_v53 = vor.u32 %v6471_v42, %v4743_v46  ;;  %v6399_v55 = vld [vmem:[#allocation2 + $0x10c] sm:$0xf] }
 0x13b   :  { %v6763_v57 = vld [vmem:[#allocation2 + $0xc64] sm:$0xf0]  ;;  %v6527_v61 = vld [vmem:[#allocation2 + $0x50c] sm:$0xf] }
 0x13c   :  { %v6149_v59 = vld [vmem:[#allocation2 + $0xe48] sm:$0xf]  ;;  %v5894_v2 = vor.u32 %v6763_v57, %v5893_v56  ;;  %3501 = vmatpush.bf16.msrb.mxu1 %v5638_v0  ;;  %v4455_v56 = vld [vmem:[#allocation2 + $0x128] sm:$0xf0] }
 0x13d   :  { %v6827_v60 = vld [vmem:[#allocation2 + $0xe64] sm:$0xf0]  ;;  %v6463_v57 = vld [vmem:[#allocation2 + $0x30c] sm:$0xf] }
 0x13e   :  { %v5349_v62 = vld [vmem:[#allocation2 + $0x808] sm:$0xf]  ;;  %v6150_v6 = vor.u32 %v6827_v60, %v6149_v59  ;;  %3515 = vmatpush.bf16.msrb.mxu2 %v5894_v2  ;;  %v5258_v59 = vor.u32 %v6599_v50, %v5255_v51  ;;  %v4711_v60 = vld [vmem:[#allocation2 + $0x328] sm:$0xf0]  ;;  %v4458_v2 = vor.u32 %v6399_v55, %v4455_v56 }
 0x13f   :  { %v6627_v63 = vld [vmem:[#allocation2 + $0x824] sm:$0xf0]  ;;  %v5223_v0 = vld [vmem:[#allocation2 + $0x728] sm:$0xf0] }
 0x140   :  { %v5605_v3 = vld [vmem:[#allocation2 + $0xa08] sm:$0xf]  ;;  %v5350_v14 = vor.u32 %v6627_v63, %v5349_v62  ;;  %3529 = vmatpush.bf16.msrb.mxu3 %v6150_v6  ;;  %v4967_v62 = vld [vmem:[#allocation2 + $0x528] sm:$0xf0] }
 0x141   :  { %v6691_v4 = vld [vmem:[#allocation2 + $0xa24] sm:$0xf0]  ;;  %v6591_v63 = vld [vmem:[#allocation2 + $0x70c] sm:$0xf] }
 0x142   :  { %v5861_v5 = vld [vmem:[#allocation2 + $0xc08] sm:$0xf]  ;;  %v5606_v19 = vor.u32 %v6691_v4, %v5605_v3  ;;  %3488 = vmatpush.bf16.msrb.mxu0 %v5350_v14  ;;  %v7059_v3 = vpop.f32.mrf.mxu0  ;;  %v4714_v4 = vor.u32 %v6463_v57, %v4711_v60  ;;  %v6391_v6 = vld [vmem:[#allocation2 + $0xcc] sm:$0xf]  ;;  %v5226_v11 = vor.u32 %v6591_v63, %v5223_v0 }
 0x143   :  { %v6755_v7 = vld [vmem:[#allocation2 + $0xc24] sm:$0xf0]  ;;  %v6519_v13 = vld [vmem:[#allocation2 + $0x4cc] sm:$0xf] }
 0x144   :  { %v6117_v8 = vld [vmem:[#allocation2 + $0xe08] sm:$0xf]  ;;  %v5862_v20 = vor.u32 %v6755_v7, %v5861_v5  ;;  %3502 = vmatpush.bf16.msrb.mxu1 %v5606_v19  ;;  %v4970_v5 = vor.u32 %v6527_v61, %v4967_v62  ;;  %v4423_v7 = vld [vmem:[#allocation2 + $0xe8] sm:$0xf0] }
 0x145   :  { %v6819_v9 = vld [vmem:[#allocation2 + $0xe24] sm:$0xf0]  ;;  %3489 = vmatmul.bf16.vlgmr.msrb.gmra.mxu0 %v7031_v39  ;;  %v4935_v14 = vld [vmem:[#allocation2 + $0x4e8] sm:$0xf0]  ;;  %v4426_v18 = vor.u32 %v6391_v6, %v4423_v7 }
 0x146   :  { %v6118_v23 = vor.u32 %v6819_v9, %v6117_v8  ;;  %3516 = vmatpush.bf16.msrb.mxu2 %v5862_v20  ;;  %3537 = vmatpush.bf16.msra.mxu0 %v4554_v24  ;;  %v6455_v8 = vld [vmem:[#allocation2 + $0x2cc] sm:$0xf]  ;;  %v7061_v9 = vpop.f32.mrf.mxu1  ;;  %v4938_v20 = vor.u32 %v6519_v13, %v4935_v14 }
 0x147   :  { %3503 = vmatmul.bf16.vlgmr.msrb.gmra.mxu1 %v7035_v44  ;;  %v6583_v15 = vld [vmem:[#allocation2 + $0x6cc] sm:$0xf]  ;;  %v4682_v19 = vor.u32 %v6455_v8, %v4679_v12 }
 0x148   :  { %3530 = vmatpush.bf16.msrb.mxu3 %v6118_v23  ;;  %3551 = vmatpush.bf16.msra.mxu1 %v4810_v25  ;;  %v5191_v16 = vld [vmem:[#allocation2 + $0x6e8] sm:$0xf0] }
 0x149   :  { %3517 = vmatmul.bf16.vlgmr.msrb.gmra.mxu2 %v7033_v43  ;;  %v6383_v21 = vld [vmem:[#allocation2 + $0x8c] sm:$0xf]  ;;  %v5194_v24 = vor.u32 %v6583_v15, %v5191_v16 }
 0x14a   :  { %3565 = vmatpush.bf16.msra.mxu2 %v5066_v26  ;;  %3538 = vmatpush.bf16.msra.mxu0 %v4522_v36  ;;  %v4391_v22 = vld [vmem:[#allocation2 + $0xa8] sm:$0xf0] }
 0x14b   :  { %3531 = vmatmul.bf16.vlgmr.msrb.gmra.mxu3 %v7037_v47  ;;  %v6447_v23 = vld [vmem:[#allocation2 + $0x28c] sm:$0xf]  ;;  %v4394_v31 = vor.u32 %v6383_v21, %v4391_v22 }
 0x14c   :  { %3579 = vmatpush.bf16.msra.mxu3 %v5322_v30  ;;  %3552 = vmatpush.bf16.msra.mxu1 %v4778_v37  ;;  %v4647_v25 = vld [vmem:[#allocation2 + $0x2a8] sm:$0xf0]  ;;  %v7063_v30 = vpop.f32.mrf.mxu2 }
 0x14d   :  { %v6511_v26 = vld [vmem:[#allocation2 + $0x48c] sm:$0xf]  ;;  %v4650_v33 = vor.u32 %v6447_v23, %v4647_v25 }
 0x14e   :  { %3566 = vmatpush.bf16.msra.mxu2 %v5034_v38  ;;  %3539 = vmatpush.bf16.msra.mxu0 %v4490_v52  ;;  %v4903_v27 = vld [vmem:[#allocation2 + $0x4a8] sm:$0xf0]  ;;  %v7069_v49 = vpop.f32.mrf.mxu1 }
 0x14f   :  { %v6575_v28 = vld [vmem:[#allocation2 + $0x68c] sm:$0xf]  ;;  %v4906_v34 = vor.u32 %v6511_v26, %v4903_v27 }
 0x150   :  { %3580 = vmatpush.bf16.msra.mxu3 %v5290_v45  ;;  %3553 = vmatpush.bf16.msra.mxu1 %v4746_v53  ;;  %v5159_v29 = vld [vmem:[#allocation2 + $0x6a8] sm:$0xf0]  ;;  %v7067_v45 = vpop.f32.mrf.mxu0  ;;  %v7071_v53 = vld [vmem:[#allocation4] sm:$0xff] }
 0x151   :  { %v6375_v35 = vld [vmem:[#allocation2 + $0x4c] sm:$0xf]  ;;  %v5162_v38 = vor.u32 %v6575_v28, %v5159_v29  ;;  %v625_v15 = vperm.slane %v7071_v53, 0 }
 0x152   :  { %3567 = vmatpush.bf16.msra.mxu2 %v5002_v54  ;;  %3540 = vmatpush.bf16.msra.mxu0 %v4458_v2  ;;  %v4359_v36 = vld [vmem:[#allocation2 + $0x68] sm:$0xf0] }
 0x153   :  { %v6439_v37 = vld [vmem:[#allocation2 + $0x24c] sm:$0xf]  ;;  %v4362_v50 = vor.u32 %v6375_v35, %v4359_v36 }
 0x154   :  { %3581 = vmatpush.bf16.msra.mxu3 %v5258_v59  ;;  %3554 = vmatpush.bf16.msra.mxu1 %v4714_v4  ;;  %v4615_v40 = vld [vmem:[#allocation2 + $0x268] sm:$0xf0]  ;;  %v7074_v16 = vpop.f32.mrf.mxu2 }
 0x155   :  { %v6503_v41 = vld [vmem:[#allocation2 + $0x44c] sm:$0xf]  ;;  %v4618_v54 = vor.u32 %v6439_v37, %v4615_v40 }
 0x156   :  { %3568 = vmatpush.bf16.msra.mxu2 %v4970_v5  ;;  %3541 = vmatpush.bf16.msra.mxu0 %v4426_v18  ;;  %v4871_v42 = vld [vmem:[#allocation2 + $0x468] sm:$0xf0]  ;;  %v7080_v35 = vpop.f32.mrf.mxu1 }
 0x157   :  { %v6567_v46 = vld [vmem:[#allocation2 + $0x64c] sm:$0xf]  ;;  %v4874_v55 = vor.u32 %v6503_v41, %v4871_v42 }
 0x158   :  { %3582 = vmatpush.bf16.msra.mxu3 %v5226_v11  ;;  %3555 = vmatpush.bf16.msra.mxu1 %v4682_v19  ;;  %v5127_v48 = vld [vmem:[#allocation2 + $0x668] sm:$0xf0] }
 0x159   :  { %v6367_v51 = vld [vmem:[#allocation2 + $0xc] sm:$0xf]  ;;  %v5130_v60 = vor.u32 %v6567_v46, %v5127_v48  ;;  %v3211_v46 = vadd.f32 %v7059_v3, %v625_v15 }
 0x15a   :  { %3569 = vmatpush.bf16.msra.mxu2 %v4938_v20  ;;  %3542 = vmatpush.bf16.msra.mxu0 %v4394_v31  ;;  %v4327_v52 = vld [vmem:[#allocation2 + $0x28] sm:$0xf0]  ;;  %v7076_v20 = vpop.f32.mrf.mxu3  ;;  %v7078_v31 = vpop.f32.mrf.mxu0 }
 0x15b   :  { %v6431_v56 = vld [vmem:[#allocation2 + $0x20c] sm:$0xf]  ;;  %v4330_v5 = vor.u32 %v6367_v51, %v4327_v52 }
 0x15c   :  { %3583 = vmatpush.bf16.msra.mxu3 %v5194_v24  ;;  %3556 = vmatpush.bf16.msra.mxu1 %v4650_v33  ;;  %v4583_v57 = vld [vmem:[#allocation2 + $0x228] sm:$0xf0] }
 0x15d   :  { %v6495_v59 = vld [vmem:[#allocation2 + $0x40c] sm:$0xf]  ;;  %v4586_v11 = vor.u32 %v6431_v56, %v4583_v57 }
 0x15e   :  { %3570 = vmatpush.bf16.msra.mxu2 %v4906_v34  ;;  %v4839_v61 = vld [vmem:[#allocation2 + $0x428] sm:$0xf0]  ;;  %3543 = vmatpush.bf16.msra.mxu0 %v4362_v50 }
 0x15f   :  { %v6559_v62 = vld [vmem:[#allocation2 + $0x60c] sm:$0xf]  ;;  %v4842_v12 = vor.u32 %v6495_v59, %v4839_v61 }
 0x160   :  { %3584 = vmatpush.bf16.msra.mxu3 %v5162_v38  ;;  %v5095_v63 = vld [vmem:[#allocation2 + $0x628] sm:$0xf0]  ;;  %3557 = vmatpush.bf16.msra.mxu1 %v4618_v54 }
 0x161   :  { %v6679_v0 = vld [vmem:[#allocation2 + $0x9cc] sm:$0xf]  ;;  %v5098_v18 = vor.u32 %v6559_v62, %v5095_v63  ;;  %v3225_v62 = vadd.f32 %v7061_v9, %v3211_v46  ;;  %v7090_v63 = vpop.f32.mrf.mxu2 }
 0x162   :  { %v5575_v2 = vld [vmem:[#allocation2 + $0x9e8] sm:$0xf0]  ;;  %3571 = vmatpush.bf16.msra.mxu2 %v4874_v55  ;;  %3544 = vmatpush.bf16.msra.mxu0 %v4330_v5 }
 0x163   :  { %v6743_v4 = vld [vmem:[#allocation2 + $0xbcc] sm:$0xf]  ;;  %v5578_v19 = vor.u32 %v6679_v0, %v5575_v2 }
 0x164   :  { %v5831_v6 = vld [vmem:[#allocation2 + $0xbe8] sm:$0xf0]  ;;  %3585 = vmatpush.bf16.msra.mxu3 %v5130_v60  ;;  %3558 = vmatpush.bf16.msra.mxu1 %v4586_v11 }
 0x165   :  { %v6807_v7 = vld [vmem:[#allocation2 + $0xdcc] sm:$0xf]  ;;  %v5834_v21 = vor.u32 %v6743_v4, %v5831_v6  ;;  %3545 = vmatmul.bf16.vlgmr.msra.gmra.mxu0 %v6980_v58  ;;  %v7092_v6 = vpop.f32.mrf.mxu3 }
 0x166   :  { %v6087_v8 = vld [vmem:[#allocation2 + $0xde8] sm:$0xf0]  ;;  %3572 = vmatpush.bf16.msra.mxu2 %v4842_v12  ;;  %3593 = vmatpush.bf16.msrb.mxu0 %v5578_v19  ;;  %v7094_v12 = vpop.f32.mrf.mxu0 }
 0x167   :  { %v6871_v13 = vld [vmem:[#allocation2 + $0xfcc] sm:$0xf]  ;;  %v6090_v22 = vor.u32 %v6807_v7, %v6087_v8  ;;  %3559 = vmatmul.bf16.vlgmr.msra.gmra.mxu1 %v6998_v10 }
 0x168   :  { %v6343_v14 = vld [vmem:[#allocation2 + $0xfe8] sm:$0xf0]  ;;  %3586 = vmatpush.bf16.msra.mxu3 %v5098_v18  ;;  %3607 = vmatpush.bf16.msrb.mxu1 %v5834_v21  ;;  %v3239_v21 = vadd.f32 %v7063_v30, %v3225_v62 }
 0x169   :  { %v6671_v23 = vld [vmem:[#allocation2 + $0x98c] sm:$0xf]  ;;  %v6346_v26 = vor.u32 %v6871_v13, %v6343_v14  ;;  %3573 = vmatmul.bf16.vlgmr.msra.gmra.mxu2 %v6985_v1 }
 0x16a   :  { %v5543_v24 = vld [vmem:[#allocation2 + $0x9a8] sm:$0xf0]  ;;  %3621 = vmatpush.bf16.msrb.mxu2 %v6090_v22  ;;  %v7097_v22 = vpop.f32.mrf.mxu1  ;;  %v3253_v30 = vadd.f32 %v7065_v32, %v3239_v21 }
 0x16b   :  { %v6735_v25 = vld [vmem:[#allocation2 + $0xb8c] sm:$0xf]  ;;  %v5546_v36 = vor.u32 %v6671_v23, %v5543_v24  ;;  %3587 = vmatmul.bf16.vlgmr.msra.gmra.mxu3 %v7003_v17 }
 0x16c   :  { %v5799_v27 = vld [vmem:[#allocation2 + $0xba8] sm:$0xf0]  ;;  %3635 = vmatpush.bf16.msrb.mxu3 %v6346_v26 }
 0x16d   :  { %v6799_v28 = vld [vmem:[#allocation2 + $0xd8c] sm:$0xf]  ;;  %v5802_v37 = vor.u32 %v6735_v25, %v5799_v27  ;;  %3594 = vmatpush.bf16.msrb.mxu0 %v5546_v36 }
 0x16e   :  { %v6055_v29 = vld [vmem:[#allocation2 + $0xda8] sm:$0xf0]  ;;  %v3322_v32 = vpop.f32.mrf.mxu0 }
 0x16f   :  { %v6863_v33 = vld [vmem:[#allocation2 + $0xf8c] sm:$0xf]  ;;  %v6058_v38 = vor.u32 %v6799_v28, %v6055_v29  ;;  %3608 = vmatpush.bf16.msrb.mxu1 %v5802_v37 }
 0x170   :  { %v6311_v34 = vld [vmem:[#allocation2 + $0xfa8] sm:$0xf0] }
 0x171   :  { %v6663_v40 = vld [vmem:[#allocation2 + $0x94c] sm:$0xf]  ;;  %v6314_v48 = vor.u32 %v6863_v33, %v6311_v34  ;;  %3622 = vmatpush.bf16.msrb.mxu2 %v6058_v38 }
 0x172   :  { %v5511_v41 = vld [vmem:[#allocation2 + $0x968] sm:$0xf0] }
 0x173   :  { %v6727_v42 = vld [vmem:[#allocation2 + $0xb4c] sm:$0xf]  ;;  %v5514_v56 = vor.u32 %v6663_v40, %v5511_v41  ;;  %3636 = vmatpush.bf16.msrb.mxu3 %v6314_v48 }
 0x174   :  { %v5767_v50 = vld [vmem:[#allocation2 + $0xb68] sm:$0xf0] }
 0x175   :  { %v6791_v51 = vld [vmem:[#allocation2 + $0xd4c] sm:$0xf]  ;;  %v5770_v3 = vor.u32 %v6727_v42, %v5767_v50  ;;  %3595 = vmatpush.bf16.msrb.mxu0 %v5514_v56 }
 0x176   :  { %v6023_v52 = vld [vmem:[#allocation2 + $0xd68] sm:$0xf0] }
 0x177   :  { %v6855_v54 = vld [vmem:[#allocation2 + $0xf4c] sm:$0xf]  ;;  %v6026_v57 = vor.u32 %v6791_v51, %v6023_v52  ;;  %3609 = vmatpush.bf16.msrb.mxu1 %v5770_v3  ;;  %v7100_v51 = vpop.f32.mrf.mxu2 }
 0x178   :  { %v6279_v55 = vld [vmem:[#allocation2 + $0xf68] sm:$0xf0] }
 0x179   :  { %v6655_v59 = vld [vmem:[#allocation2 + $0x90c] sm:$0xf]  ;;  %v6282_v0 = vor.u32 %v6855_v54, %v6279_v55  ;;  %3623 = vmatpush.bf16.msrb.mxu2 %v6026_v57  ;;  %v626_v54 = vperm.slane %v7071_v53, 1  ;;  %v7103_v55 = vpop.f32.mrf.mxu3  ;;  %v5261_v53 = vld [vmem:[#allocation2 + $0x750] sm:$0xf] }
 0x17a   :  { %v5479_v60 = vld [vmem:[#allocation2 + $0x928] sm:$0xf0] }
 0x17b   :  { %v6719_v61 = vld [vmem:[#allocation2 + $0xb0c] sm:$0xf]  ;;  %v5482_v11 = vor.u32 %v6655_v59, %v5479_v60  ;;  %3637 = vmatpush.bf16.msrb.mxu3 %v6282_v0 }
 0x17c   :  { %v5735_v2 = vld [vmem:[#allocation2 + $0xb28] sm:$0xf0] }
 0x17d   :  { %v6783_v4 = vld [vmem:[#allocation2 + $0xd0c] sm:$0xf]  ;;  %v5738_v13 = vor.u32 %v6719_v61, %v5735_v2  ;;  %3596 = vmatpush.bf16.msrb.mxu0 %v5482_v11  ;;  %v3267_v61 = vadd.f32 %v7078_v31, %v3253_v30  ;;  %v6556_v30 = vld [vmem:[#allocation2 + $0x5ec] sm:$0xf0] }
 0x17e   :  { %v5991_v5 = vld [vmem:[#allocation2 + $0xd28] sm:$0xf0] }
 0x17f   :  { %v6847_v7 = vld [vmem:[#allocation2 + $0xf0c] sm:$0xf]  ;;  %v5994_v14 = vor.u32 %v6783_v4, %v5991_v5  ;;  %3610 = vmatpush.bf16.msrb.mxu1 %v5738_v13  ;;  %v3336_v5 = vpop.f32.mrf.mxu1  ;;  %v3281_v31 = vadd.f32 %v7080_v35, %v3267_v61  ;;  %v3213_v35 = vadd.f32 %v7067_v45, %v625_v15  ;;  %v4525_v61 = vld [vmem:[#allocation2 + $0x190] sm:$0xf] }
 0x180   :  { %v6247_v8 = vld [vmem:[#allocation2 + $0xf28] sm:$0xf0]  ;;  %v6484_v15 = vld [vmem:[#allocation2 + $0x3ac] sm:$0xf0] }
 0x181   :  { %v6647_v9 = vld [vmem:[#allocation2 + $0x8cc] sm:$0xf]  ;;  %v6250_v23 = vor.u32 %v6847_v7, %v6247_v8  ;;  %3624 = vmatpush.bf16.msrb.mxu2 %v5994_v14 }
 0x182   :  { %v5447_v18 = vld [vmem:[#allocation2 + $0x8e8] sm:$0xf0] }
 0x183   :  { %v6711_v19 = vld [vmem:[#allocation2 + $0xacc] sm:$0xf]  ;;  %v5450_v29 = vor.u32 %v6647_v9, %v5447_v18  ;;  %3638 = vmatpush.bf16.msrb.mxu3 %v6250_v23 }
 0x184   :  { %v5703_v24 = vld [vmem:[#allocation2 + $0xae8] sm:$0xf0] }
 0x185   :  { %v6775_v25 = vld [vmem:[#allocation2 + $0xccc] sm:$0xf]  ;;  %v5706_v33 = vor.u32 %v6711_v19, %v5703_v24  ;;  %3597 = vmatpush.bf16.msrb.mxu0 %v5450_v29  ;;  %v3323_v24 = vadd.f32 %v3322_v32, %v626_v54  ;;  %v4557_v29 = vld [vmem:[#allocation2 + $0x1d0] sm:$0xf] }
 0x186   :  { %v5959_v26 = vld [vmem:[#allocation2 + $0xce8] sm:$0xf0] }
 0x187   :  { %v6839_v27 = vld [vmem:[#allocation2 + $0xecc] sm:$0xf]  ;;  %v5962_v34 = vor.u32 %v6775_v25, %v5959_v26  ;;  %3611 = vmatpush.bf16.msrb.mxu1 %v5706_v33  ;;  %v6428_v33 = vld [vmem:[#allocation2 + $0x1ec] sm:$0xf0] }
 0x188   :  { %v6215_v28 = vld [vmem:[#allocation2 + $0xee8] sm:$0xf0]  ;;  %v4558_v32 = vor.u32 %v6428_v33, %v4557_v29 }
 0x189   :  { %v6639_v36 = vld [vmem:[#allocation2 + $0x88c] sm:$0xf]  ;;  %v6218_v40 = vor.u32 %v6839_v27, %v6215_v28  ;;  %3625 = vmatpush.bf16.msrb.mxu2 %v5962_v34  ;;  %v4813_v34 = vld [vmem:[#allocation2 + $0x3d0] sm:$0xf] }
 0x18a   :  { %v5415_v37 = vld [vmem:[#allocation2 + $0x8a8] sm:$0xf0] }
 0x18b   :  { %v6703_v38 = vld [vmem:[#allocation2 + $0xa8c] sm:$0xf]  ;;  %v5418_v52 = vor.u32 %v6639_v36, %v5415_v37  ;;  %3639 = vmatpush.bf16.msrb.mxu3 %v6218_v40  ;;  %v6492_v37 = vld [vmem:[#allocation2 + $0x3ec] sm:$0xf0]  ;;  %v3350_v40 = vpop.f32.mrf.mxu2 }
 0x18c   :  { %v5671_v41 = vld [vmem:[#allocation2 + $0xaa8] sm:$0xf0] }
 0x18d   :  { %v6767_v42 = vld [vmem:[#allocation2 + $0xc8c] sm:$0xf]  ;;  %v5674_v56 = vor.u32 %v6703_v38, %v5671_v41  ;;  %3598 = vmatpush.bf16.msrb.mxu0 %v5418_v52  ;;  %v5069_v38 = vld [vmem:[#allocation2 + $0x5d0] sm:$0xf]  ;;  %v3295_v52 = vadd.f32 %v7090_v63, %v3281_v31 }
 0x18e   :  { %v5927_v46 = vld [vmem:[#allocation2 + $0xca8] sm:$0xf0]  ;;  %v5293_v63 = vld [vmem:[#allocation2 + $0x790] sm:$0xf] }
 0x18f   :  { %v6831_v48 = vld [vmem:[#allocation2 + $0xe8c] sm:$0xf]  ;;  %v5930_v3 = vor.u32 %v6767_v42, %v5927_v46  ;;  %3612 = vmatpush.bf16.msrb.mxu1 %v5674_v56  ;;  %v5325_v46 = vld [vmem:[#allocation2 + $0x7d0] sm:$0xf]  ;;  %v3337_v56 = vadd.f32 %v3336_v5, %v3323_v24 }
 0x190   :  { %v6183_v50 = vld [vmem:[#allocation2 + $0xea8] sm:$0xf0]  ;;  %v6612_v5 = vld [vmem:[#allocation2 + $0x7ac] sm:$0xf0] }
 0x191   :  { %v6631_v57 = vld [vmem:[#allocation2 + $0x84c] sm:$0xf]  ;;  %v6186_v62 = vor.u32 %v6831_v48, %v6183_v50  ;;  %3626 = vmatpush.bf16.msrb.mxu2 %v5930_v3  ;;  %v6620_v48 = vld [vmem:[#allocation2 + $0x7ec] sm:$0xf0]  ;;  %v3364_v50 = vpop.f32.mrf.mxu3  ;;  %v5294_v31 = vor.u32 %v6612_v5, %v5293_v63 }
 0x192   :  { %v5383_v59 = vld [vmem:[#allocation2 + $0x868] sm:$0xf0]  ;;  %v5326_v45 = vor.u32 %v6620_v48, %v5325_v46  ;;  %v5005_v24 = vld [vmem:[#allocation2 + $0x550] sm:$0xf] }
 0x193   :  { %v6695_v60 = vld [vmem:[#allocation2 + $0xa4c] sm:$0xf]  ;;  %v5386_v11 = vor.u32 %v6631_v57, %v5383_v59  ;;  %3640 = vmatpush.bf16.msrb.mxu3 %v6186_v62  ;;  %v4814_v57 = vor.u32 %v6492_v37, %v4813_v34  ;;  %v5070_v59 = vor.u32 %v6556_v30, %v5069_v38  ;;  %v6420_v62 = vld [vmem:[#allocation2 + $0x1ac] sm:$0xf0]  ;;  %v3352_v33 = vpop.f32.mrf.mxu2 }
 0x194   :  { %v5639_v0 = vld [vmem:[#allocation2 + $0xa68] sm:$0xf0]  ;;  %v4461_v38 = vld [vmem:[#allocation2 + $0x110] sm:$0xf] }
 0x195   :  { %v6759_v2 = vld [vmem:[#allocation2 + $0xc4c] sm:$0xf]  ;;  %v5642_v9 = vor.u32 %v6695_v60, %v5639_v0  ;;  %3599 = vmatpush.bf16.msrb.mxu0 %v5386_v11  ;;  %v3324_v60 = vpop.f32.mrf.mxu0  ;;  %v4781_v0 = vld [vmem:[#allocation2 + $0x390] sm:$0xf]  ;;  %v7115_v11 = vadd.f32 %v7092_v6, %v3295_v52 }
 0x196   :  { %v5895_v4 = vld [vmem:[#allocation2 + $0xc68] sm:$0xf0]  ;;  %v6476_v6 = vld [vmem:[#allocation2 + $0x36c] sm:$0xf0] }
 0x197   :  { %v6823_v7 = vld [vmem:[#allocation2 + $0xe4c] sm:$0xf]  ;;  %v5898_v18 = vor.u32 %v6759_v2, %v5895_v4  ;;  %3613 = vmatpush.bf16.msrb.mxu1 %v5642_v9  ;;  %v5037_v2 = vld [vmem:[#allocation2 + $0x590] sm:$0xf]  ;;  %v3325_v9 = vadd.f32 %v3324_v60, %v626_v54  ;;  %v4136_v48 = vrot.slane %v7115_v11, 4 }
 0x198   :  { %v6151_v8 = vld [vmem:[#allocation2 + $0xe68] sm:$0xf0]  ;;  %v6548_v4 = vld [vmem:[#allocation2 + $0x5ac] sm:$0xf0] }
 0x199   :  { %v6623_v13 = vld [vmem:[#allocation2 + $0x80c] sm:$0xf]  ;;  %v6154_v25 = vor.u32 %v6823_v7, %v6151_v8  ;;  %3627 = vmatpush.bf16.msrb.mxu2 %v5898_v18  ;;  %v3338_v7 = vpop.f32.mrf.mxu1  ;;  %v3227_v8 = vadd.f32 %v7069_v49, %v3213_v35  ;;  %v4782_v18 = vor.u32 %v6484_v15, %v4781_v0  ;;  %v6412_v49 = vld [vmem:[#allocation2 + $0x16c] sm:$0xf0]  ;;  %v3366_v37 = vpop.f32.mrf.mxu3 }
 0x19a   :  { %v5351_v14 = vld [vmem:[#allocation2 + $0x828] sm:$0xf0]  ;;  %v6604_v54 = vld [vmem:[#allocation2 + $0x76c] sm:$0xf0]  ;;  %v3339_v34 = vadd.f32 %v3338_v7, %v3325_v9 }
 0x19b   :  { %v6687_v19 = vld [vmem:[#allocation2 + $0xa0c] sm:$0xf]  ;;  %v5354_v36 = vor.u32 %v6623_v13, %v5351_v14  ;;  %3641 = vmatpush.bf16.msrb.mxu3 %v6154_v25  ;;  %v3351_v13 = vadd.f32 %v3350_v40, %v3337_v56  ;;  %v4526_v14 = vor.u32 %v6420_v62, %v4525_v61  ;;  %v6540_v25 = vld [vmem:[#allocation2 + $0x56c] sm:$0xf0]  ;;  %v5262_v35 = vor.u32 %v6604_v54, %v5261_v53  ;;  %v3406_v53 = vpop.f32.mrf.mxu2 }
 0x19c   :  { %v5607_v21 = vld [vmem:[#allocation2 + $0xa28] sm:$0xf0]  ;;  %v6404_v30 = vld [vmem:[#allocation2 + $0x12c] sm:$0xf0]  ;;  %v3353_v61 = vadd.f32 %v3352_v33, %v3339_v34 }
 0x19d   :  { %v6751_v23 = vld [vmem:[#allocation2 + $0xc0c] sm:$0xf]  ;;  %v5610_v41 = vor.u32 %v6687_v19, %v5607_v21  ;;  %3600 = vmatpush.bf16.msrb.mxu0 %v5354_v36  ;;  %v5038_v19 = vor.u32 %v6548_v4, %v5037_v2  ;;  %v4493_v21 = vld [vmem:[#allocation2 + $0x150] sm:$0xf] }
 0x19e   :  { %v5863_v26 = vld [vmem:[#allocation2 + $0xc28] sm:$0xf0]  ;;  %v4494_v29 = vor.u32 %v6412_v49, %v4493_v21  ;;  %v4717_v40 = vld [vmem:[#allocation2 + $0x310] sm:$0xf]  ;;  %v3367_v21 = vadd.f32 %v3366_v37, %v3353_v61 }
 0x19f   :  { %v6815_v27 = vld [vmem:[#allocation2 + $0xe0c] sm:$0xf]  ;;  %v5866_v42 = vor.u32 %v6751_v23, %v5863_v26  ;;  %3614 = vmatpush.bf16.msrb.mxu1 %v5610_v41  ;;  %v4749_v23 = vld [vmem:[#allocation2 + $0x350] sm:$0xf]  ;;  %v3241_v26 = vadd.f32 %v7074_v16, %v3227_v8  ;;  %v5006_v16 = vor.u32 %v6540_v25, %v5005_v24 }
 0x1a0   :  { %v6119_v28 = vld [vmem:[#allocation2 + $0xe28] sm:$0xf0]  ;;  %3601 = vmatmul.bf16.vlgmr.msrb.gmra.mxu0 %v7031_v39  ;;  %v4750_v36 = vor.u32 %v6476_v6, %v4749_v23  ;;  %v6468_v41 = vld [vmem:[#allocation2 + $0x32c] sm:$0xf0] }
 0x1a1   :  { %v6122_v3 = vor.u32 %v6815_v27, %v6119_v28  ;;  %3628 = vmatpush.bf16.msrb.mxu2 %v5866_v42  ;;  %3649 = vmatpush.bf16.msra.mxu0 %v4558_v32  ;;  %v4163_v27 = vmul.f32 %v7115_v11, %v7115_v11  ;;  %v3365_v28 = vadd.f32 %v3364_v50, %v3351_v13  ;;  %v4973_v42 = vld [vmem:[#allocation2 + $0x510] sm:$0xf]  ;;  %v3378_v50 = vpop.f32.mrf.mxu0  ;;  %v3392_v60 = vpop.f32.mrf.mxu1 }
 0x1a2   :  { %3615 = vmatmul.bf16.vlgmr.msrb.gmra.mxu1 %v7035_v44  ;;  %v6532_v46 = vld [vmem:[#allocation2 + $0x52c] sm:$0xf0]  ;;  %v4718_v62 = vor.u32 %v6468_v41, %v4717_v40  ;;  %v3420_v34 = vpop.f32.mrf.mxu3 }
 0x1a3   :  { %3642 = vmatpush.bf16.msrb.mxu3 %v6122_v3  ;;  %3663 = vmatpush.bf16.msra.mxu1 %v4814_v57  ;;  %v5229_v52 = vld [vmem:[#allocation2 + $0x710] sm:$0xf]  ;;  %v3255_v3 = vadd.f32 %v7076_v20, %v3241_v26  ;;  %v4172_v32 = vrot.slane %v4163_v27, 4  ;;  %v3379_v57 = vadd.f32 %v3378_v50, %v3365_v28  ;;  %v4974_v0 = vor.u32 %v6532_v46, %v4973_v42 }
 0x1a4   :  { %3629 = vmatmul.bf16.vlgmr.msrb.gmra.mxu2 %v7033_v43  ;;  %v6596_v56 = vld [vmem:[#allocation2 + $0x72c] sm:$0xf0]  ;;  %v4137_v20 = vadd.f32 %v4136_v48, %v7115_v11 }
 0x1a5   :  { %3677 = vmatpush.bf16.msra.mxu2 %v5070_v59  ;;  %3650 = vmatpush.bf16.msra.mxu0 %v4526_v14  ;;  %v4462_v59 = vor.u32 %v6404_v30, %v4461_v38  ;;  %v6396_v15 = vld [vmem:[#allocation2 + $0xec] sm:$0xf0]  ;;  %v5230_v4 = vor.u32 %v6596_v56, %v5229_v52  ;;  %v3393_v5 = vadd.f32 %v3392_v60, %v3379_v57 }
 0x1a6   :  { %3643 = vmatmul.bf16.vlgmr.msrb.gmra.mxu3 %v7037_v47  ;;  %v4685_v2 = vld [vmem:[#allocation2 + $0x2d0] sm:$0xf]  ;;  %v3269_v9 = vadd.f32 %v7094_v12, %v3255_v3  ;;  %v4173_v25 = vadd.f32 %v4172_v32, %v4163_v27 }
 0x1a7   :  { %3691 = vmatpush.bf16.msra.mxu3 %v5326_v45  ;;  %3664 = vmatpush.bf16.msra.mxu1 %v4782_v18  ;;  %v4429_v45 = vld [vmem:[#allocation2 + $0xd0] sm:$0xf]  ;;  %v3407_v33 = vadd.f32 %v3406_v53, %v3393_v5 }
 0x1a8   :  { %v6460_v7 = vld [vmem:[#allocation2 + $0x2ec] sm:$0xf0]  ;;  %v4430_v18 = vor.u32 %v6396_v15, %v4429_v45  ;;  %v3283_v37 = vadd.f32 %v7097_v22, %v3269_v9  ;;  %v4174_v56 = vrot.slane %v4173_v25, 2 }
 0x1a9   :  { %3678 = vmatpush.bf16.msra.mxu2 %v5038_v19  ;;  %3651 = vmatpush.bf16.msra.mxu0 %v4494_v29  ;;  %v4941_v8 = vld [vmem:[#allocation2 + $0x4d0] sm:$0xf]  ;;  %v4686_v49 = vor.u32 %v6460_v7, %v4685_v2  ;;  %v4138_v29 = vrot.slane %v4137_v20, 2  ;;  %v3380_v12 = vpop.f32.mrf.mxu0  ;;  %v3421_v42 = vadd.f32 %v3420_v34, %v3407_v33  ;;  %v3394_v32 = vpop.f32.mrf.mxu1 }
 0x1aa   :  { %v6524_v63 = vld [vmem:[#allocation2 + $0x4ec] sm:$0xf0]  ;;  %v3381_v27 = vadd.f32 %v3380_v12, %v3367_v21 }
 0x1ab   :  { %3692 = vmatpush.bf16.msra.mxu3 %v5294_v31  ;;  %3665 = vmatpush.bf16.msra.mxu1 %v4750_v36  ;;  %v5197_v13 = vld [vmem:[#allocation2 + $0x6d0] sm:$0xf]  ;;  %v4942_v23 = vor.u32 %v6524_v63, %v4941_v8  ;;  %v4097_v60 = vpack.c.bf16 %v3421_v42, %v7115_v11  ;;  %v4143_v61 = vrot.slane %v3421_v42, 4  ;;  %v7133_v15 = vadd.f32 %v4138_v29, %v4137_v20 }
 0x1ac   :  { %v6588_v14 = vld [vmem:[#allocation2 + $0x6ec] sm:$0xf0]  ;;  %v3395_v11 = vadd.f32 %v3394_v32, %v3381_v27  ;;  %v7138_v20 = vadd.f32 %v4174_v56, %v4173_v25 }
 0x1ad   :  { %3679 = vmatpush.bf16.msra.mxu2 %v5006_v16  ;;  %3652 = vmatpush.bf16.msra.mxu0 %v4462_v59  ;;  %v4397_v19 = vld [vmem:[#allocation2 + $0x90] sm:$0xf]  ;;  %v5198_v26 = vor.u32 %v6588_v14, %v5197_v13  ;;  %v3297_v59 = vadd.f32 %v7100_v51, %v3283_v37  ;;  %4105 = vst [vmem:[%s7358_s3] sm:$0xff] %v4097_v60 }
 0x1ae   :  { %v6388_v31 = vld [vmem:[#allocation2 + $0xac] sm:$0xf0]  ;;  %v4144_v51 = vadd.f32 %v4143_v61, %v3421_v42 }
 0x1af   :  { %3693 = vmatpush.bf16.msra.mxu3 %v5262_v35  ;;  %3666 = vmatpush.bf16.msra.mxu1 %v4718_v62  ;;  %v4653_v6 = vld [vmem:[#allocation2 + $0x290] sm:$0xf]  ;;  %v4398_v38 = vor.u32 %v6388_v31, %v4397_v19  ;;  %v4164_v62 = vmul.f32 %v3421_v42, %v3421_v42  ;;  %v3408_v19 = vpop.f32.mrf.mxu2  ;;  %v3311_v29 = vadd.f32 %v7103_v55, %v3297_v59 }
 0x1b0   :  { %v6452_v24 = vld [vmem:[#allocation2 + $0x2ac] sm:$0xf0]  ;;  %v4145_v31 = vrot.slane %v4144_v51, 2 }
 0x1b1   :  { %3680 = vmatpush.bf16.msra.mxu2 %v4974_v0  ;;  %v4909_v54 = vld [vmem:[#allocation2 + $0x490] sm:$0xf]  ;;  %3653 = vmatpush.bf16.msra.mxu0 %v4430_v18  ;;  %v4654_v30 = vor.u32 %v6452_v24, %v4653_v6  ;;  %v4179_v13 = vrot.slane %v4164_v62, 4  ;;  %v3409_v24 = vadd.f32 %v3408_v19, %v3395_v11 }
 0x1b2   :  { %v6516_v28 = vld [vmem:[#allocation2 + $0x4ac] sm:$0xf0] }
 0x1b3   :  { %3694 = vmatpush.bf16.msra.mxu3 %v5230_v4  ;;  %v5165_v36 = vld [vmem:[#allocation2 + $0x690] sm:$0xf]  ;;  %3667 = vmatpush.bf16.msra.mxu1 %v4686_v49  ;;  %v4910_v46 = vor.u32 %v6516_v28, %v4909_v54  ;;  %v4180_v6 = vadd.f32 %v4179_v13, %v4164_v62  ;;  %v4140_v28 = vrot.slane %v7133_v15, 1 }
 0x1b4   :  { %v6580_v16 = vld [vmem:[#allocation2 + $0x6ac] sm:$0xf0] }
 0x1b5   :  { %v4365_v40 = vld [vmem:[#allocation2 + $0x50] sm:$0xf]  ;;  %3681 = vmatpush.bf16.msra.mxu2 %v4942_v23  ;;  %v5166_v3 = vor.u32 %v6580_v16, %v5165_v36  ;;  %3654 = vmatpush.bf16.msra.mxu0 %v4398_v38  ;;  %v4146_v36 = vadd.f32 %v4145_v31, %v4144_v51  ;;  %v4181_v16 = vrot.slane %v4180_v6, 2 }
 0x1b6   :  { %v6380_v35 = vld [vmem:[#allocation2 + $0x6c] sm:$0xf0] }
 0x1b7   :  { %v4621_v41 = vld [vmem:[#allocation2 + $0x250] sm:$0xf]  ;;  %3695 = vmatpush.bf16.msra.mxu3 %v5198_v26  ;;  %v4366_v2 = vor.u32 %v6380_v35, %v4365_v40  ;;  %3668 = vmatpush.bf16.msra.mxu1 %v4654_v30  ;;  %v3422_v26 = vpop.f32.mrf.mxu3  ;;  %v4176_v35 = vrot.slane %v7138_v20, 1 }
 0x1b8   :  { %v6444_v48 = vld [vmem:[#allocation2 + $0x26c] sm:$0xf0]  ;;  %v3423_v37 = vadd.f32 %v3422_v26, %v3409_v24 }
 0x1b9   :  { %v4877_v50 = vld [vmem:[#allocation2 + $0x450] sm:$0xf]  ;;  %v4622_v4 = vor.u32 %v6444_v48, %v4621_v41  ;;  %3682 = vmatpush.bf16.msra.mxu2 %v4910_v46  ;;  %3655 = vmatpush.bf16.msra.mxu0 %v4366_v2  ;;  %v4147_v46 = vrot.slane %v4146_v36, 1  ;;  %v4182_v48 = vadd.f32 %v4181_v16, %v4180_v6 }
 0x1ba   :  { %v6508_v52 = vld [vmem:[#allocation2 + $0x46c] sm:$0xf0] }
 0x1bb   :  { %v5133_v57 = vld [vmem:[#allocation2 + $0x650] sm:$0xf]  ;;  %v4878_v7 = vor.u32 %v6508_v52, %v4877_v50  ;;  %3696 = vmatpush.bf16.msra.mxu3 %v5166_v3  ;;  %3669 = vmatpush.bf16.msra.mxu1 %v4622_v4  ;;  %v4101_v50 = vpack.c.bf16 %v3423_v37, %v3311_v29  ;;  %v4148_v60 = vadd.f32 %v4147_v46, %v4146_v36  ;;  %v4183_v61 = vrot.slane %v4182_v48, 1 }
 0x1bc   :  { %v6572_v22 = vld [vmem:[#allocation2 + $0x66c] sm:$0xf0] }
 0x1bd   :  { %v4333_v0 = vld [vmem:[#allocation2 + $0x10] sm:$0xf]  ;;  %v5134_v18 = vor.u32 %v6572_v22, %v5133_v57  ;;  %3683 = vmatpush.bf16.msra.mxu2 %v4878_v7  ;;  %4109 = vst [vmem:[%s7358_s3 + $0x20] sm:$0xff] %v4101_v50  ;;  %v4184_v7 = vadd.f32 %v4183_v61, %v4182_v48 }
 0x1be   :  { %v6372_v45 = vld [vmem:[#allocation2 + $0x2c] sm:$0xf0] }
 0x1bf   :  { %v4589_v8 = vld [vmem:[#allocation2 + $0x210] sm:$0xf]  ;;  %v4334_v33 = vor.u32 %v6372_v45, %v4333_v0  ;;  %3697 = vmatpush.bf16.msra.mxu3 %v5134_v18  ;;  %v4141_v45 = vadd.f32 %v4140_v28, %v7133_v15  ;;  %v4177_v15 = vadd.f32 %v4176_v35, %v7138_v20 }
 0x1c0   :  { %v6436_v63 = vld [vmem:[#allocation2 + $0x22c] sm:$0xf0] }
 0x1c1   :  { %v4845_v5 = vld [vmem:[#allocation2 + $0x410] sm:$0xf]  ;;  %v4590_v25 = vor.u32 %v6436_v63, %v4589_v8  ;;  %3656 = vmatpush.bf16.msra.mxu0 %v4334_v33  ;;  %v4207_v8 = vrot.slane %v4148_v60, 7 }
 0x1c2   :  { %v6500_v14 = vld [vmem:[#allocation2 + $0x42c] sm:$0xf0] }
 0x1c3   :  { %v5101_v9 = vld [vmem:[#allocation2 + $0x610] sm:$0xf]  ;;  %v4846_v38 = vor.u32 %v6500_v14, %v4845_v5  ;;  %3670 = vmatpush.bf16.msra.mxu1 %v4590_v25  ;;  %v7150_v19 = vsel %vm4210_vm0, %v4141_v45, %v4207_v8 }
 0x1c4   :  { %v6564_v21 = vld [vmem:[#allocation2 + $0x62c] sm:$0xf0]  ;;  %3657 = vmatmul.bf16.vlgmr.msra.gmra.mxu0 %v6980_v58 }
 0x1c5   :  { %v5581_v49 = vld [vmem:[#allocation2 + $0x9d0] sm:$0xf]  ;;  %v5102_v41 = vor.u32 %v6564_v21, %v5101_v9  ;;  %3684 = vmatpush.bf16.msra.mxu2 %v4846_v38  ;;  %v4226_v21 = vrot.slane %v4184_v7, 7 }
 0x1c6   :  { %v6684_v23 = vld [vmem:[#allocation2 + $0x9ec] sm:$0xf0]  ;;  %3671 = vmatmul.bf16.vlgmr.msra.gmra.mxu1 %v6998_v10 }
 0x1c7   :  { %v5837_v53 = vld [vmem:[#allocation2 + $0xbd0] sm:$0xf]  ;;  %v5582_v27 = vor.u32 %v6684_v23, %v5581_v49  ;;  %3698 = vmatpush.bf16.msra.mxu3 %v5102_v41  ;;  %v7156_v6 = vsel %vm4210_vm0, %v4177_v15, %v4226_v21 }
 0x1c8   :  { %v6748_v54 = vld [vmem:[#allocation2 + $0xbec] sm:$0xf0]  ;;  %3685 = vmatmul.bf16.vlgmr.msra.gmra.mxu2 %v6985_v1 }
 0x1c9   :  { %v6093_v12 = vld [vmem:[#allocation2 + $0xdd0] sm:$0xf]  ;;  %v5838_v42 = vor.u32 %v6748_v54, %v5837_v53  ;;  %3705 = vmatpush.bf16.msrb.mxu0 %v5582_v27 }
 0x1ca   :  { %v6812_v34 = vld [vmem:[#allocation2 + $0xdec] sm:$0xf0]  ;;  %3699 = vmatmul.bf16.vlgmr.msra.gmra.mxu3 %v7003_v17 }
 0x1cb   :  { %v6349_v30 = vld [vmem:[#allocation2 + $0xfd0] sm:$0xf]  ;;  %v6094_v52 = vor.u32 %v6812_v34, %v6093_v12  ;;  %3719 = vmatpush.bf16.msrb.mxu1 %v5838_v42 }
 0x1cc   :  { %v6876_v40 = vld [vmem:[#allocation2 + $0xfec] sm:$0xf0] }
 0x1cd   :  { %v5549_v55 = vld [vmem:[#allocation2 + $0x990] sm:$0xf]  ;;  %v6350_v32 = vor.u32 %v6876_v40, %v6349_v30  ;;  %3733 = vmatpush.bf16.msrb.mxu2 %v6094_v52 }
 0x1ce   :  { %v6676_v56 = vld [vmem:[#allocation2 + $0x9ac] sm:$0xf0] }
 0x1cf   :  { %v5805_v3 = vld [vmem:[#allocation2 + $0xb90] sm:$0xf]  ;;  %v5550_v2 = vor.u32 %v6676_v56, %v5549_v55  ;;  %3747 = vmatpush.bf16.msrb.mxu3 %v6350_v32 }
 0x1d0   :  { %v6740_v57 = vld [vmem:[#allocation2 + $0xbac] sm:$0xf0] }
 0x1d1   :  { %v6061_v22 = vld [vmem:[#allocation2 + $0xd90] sm:$0xf]  ;;  %v5806_v63 = vor.u32 %v6740_v57, %v5805_v3  ;;  %3706 = vmatpush.bf16.msrb.mxu0 %v5550_v2 }
 0x1d2   :  { %v6804_v59 = vld [vmem:[#allocation2 + $0xdac] sm:$0xf0] }
 0x1d3   :  { %v6317_v62 = vld [vmem:[#allocation2 + $0xf90] sm:$0xf]  ;;  %v6062_v5 = vor.u32 %v6804_v59, %v6061_v22  ;;  %3720 = vmatpush.bf16.msrb.mxu1 %v5806_v63 }
 0x1d4   :  { %v6868_v0 = vld [vmem:[#allocation2 + $0xfac] sm:$0xf0] }
 0x1d5   :  { %v5517_v4 = vld [vmem:[#allocation2 + $0x950] sm:$0xf]  ;;  %v6318_v11 = vor.u32 %v6868_v0, %v6317_v62  ;;  %3734 = vmatpush.bf16.msrb.mxu2 %v6062_v5 }
 0x1d6   :  { %v6668_v51 = vld [vmem:[#allocation2 + $0x96c] sm:$0xf0] }
 0x1d7   :  { %v5773_v13 = vld [vmem:[#allocation2 + $0xb50] sm:$0xf]  ;;  %v5518_v31 = vor.u32 %v6668_v51, %v5517_v4  ;;  %3748 = vmatpush.bf16.msrb.mxu3 %v6318_v11 }
 0x1d8   :  { %v6732_v14 = vld [vmem:[#allocation2 + $0xb6c] sm:$0xf0] }
 0x1d9   :  { %v6029_v9 = vld [vmem:[#allocation2 + $0xd50] sm:$0xf]  ;;  %v5774_v20 = vor.u32 %v6732_v14, %v5773_v13  ;;  %3707 = vmatpush.bf16.msrb.mxu0 %v5518_v31 }
 0x1da   :  { %v6796_v18 = vld [vmem:[#allocation2 + $0xd6c] sm:$0xf0] }
 0x1db   :  { %v6285_v49 = vld [vmem:[#allocation2 + $0xf50] sm:$0xf]  ;;  %v6030_v24 = vor.u32 %v6796_v18, %v6029_v9  ;;  %3721 = vmatpush.bf16.msrb.mxu1 %v5774_v20 }
 0x1dc   :  { %v6860_v23 = vld [vmem:[#allocation2 + $0xf6c] sm:$0xf0] }
 0x1dd   :  { %v5485_v26 = vld [vmem:[#allocation2 + $0x910] sm:$0xf]  ;;  %v6286_v28 = vor.u32 %v6860_v23, %v6285_v49  ;;  %3735 = vmatpush.bf16.msrb.mxu2 %v6030_v24 }
 0x1de   :  { %v6660_v53 = vld [vmem:[#allocation2 + $0x92c] sm:$0xf0] }
 0x1df   :  { %v5741_v54 = vld [vmem:[#allocation2 + $0xb10] sm:$0xf]  ;;  %v5486_v36 = vor.u32 %v6660_v53, %v5485_v26  ;;  %3749 = vmatpush.bf16.msrb.mxu3 %v6286_v28  ;;  %v6424_v28 = vld [vmem:[#allocation2 + $0x1d4] sm:$0xf] }
 0x1e0   :  { %v6724_v29 = vld [vmem:[#allocation2 + $0xb2c] sm:$0xf0] }
 0x1e1   :  { %v5997_v33 = vld [vmem:[#allocation2 + $0xd10] sm:$0xf]  ;;  %v5742_v16 = vor.u32 %v6724_v29, %v5741_v54  ;;  %3708 = vmatpush.bf16.msrb.mxu0 %v5486_v36  ;;  %v4559_v29 = vld [vmem:[#allocation2 + $0x1f0] sm:$0xf0] }
 0x1e2   :  { %v6788_v25 = vld [vmem:[#allocation2 + $0xd2c] sm:$0xf0]  ;;  %v5071_v36 = vld [vmem:[#allocation2 + $0x5f0] sm:$0xf0] }
 0x1e3   :  { %v6253_v12 = vld [vmem:[#allocation2 + $0xf10] sm:$0xf]  ;;  %v5998_v37 = vor.u32 %v6788_v25, %v5997_v33  ;;  %3722 = vmatpush.bf16.msrb.mxu1 %v5742_v16  ;;  %v6488_v33 = vld [vmem:[#allocation2 + $0x3d4] sm:$0xf] }
 0x1e4   :  { %v6852_v34 = vld [vmem:[#allocation2 + $0xf2c] sm:$0xf0] }
 0x1e5   :  { %v5453_v38 = vld [vmem:[#allocation2 + $0x8d0] sm:$0xf]  ;;  %v6254_v35 = vor.u32 %v6852_v34, %v6253_v12  ;;  %3736 = vmatpush.bf16.msrb.mxu2 %v5998_v37  ;;  %v4815_v12 = vld [vmem:[#allocation2 + $0x3f0] sm:$0xf0] }
 0x1e6   :  { %v6652_v30 = vld [vmem:[#allocation2 + $0x8ec] sm:$0xf0]  ;;  %v6552_v34 = vld [vmem:[#allocation2 + $0x5d4] sm:$0xf] }
 0x1e7   :  { %v5709_v40 = vld [vmem:[#allocation2 + $0xad0] sm:$0xf]  ;;  %v5454_v48 = vor.u32 %v6652_v30, %v5453_v38  ;;  %3750 = vmatpush.bf16.msrb.mxu3 %v6254_v35  ;;  %v6616_v38 = vld [vmem:[#allocation2 + $0x7d4] sm:$0xf]  ;;  %v4562_v35 = vor.u32 %v6424_v28, %v4559_v29  ;;  %v7164_v29 = vpop.f32.mrf.mxu1 }
 0x1e8   :  { %v6716_v41 = vld [vmem:[#allocation2 + $0xaec] sm:$0xf0]  ;;  %v5327_v30 = vld [vmem:[#allocation2 + $0x7f0] sm:$0xf0] }
 0x1e9   :  { %v5965_v27 = vld [vmem:[#allocation2 + $0xcd0] sm:$0xf]  ;;  %v5710_v50 = vor.u32 %v6716_v41, %v5709_v40  ;;  %3709 = vmatpush.bf16.msrb.mxu0 %v5454_v48  ;;  %v4818_v41 = vor.u32 %v6488_v33, %v4815_v12  ;;  %v5330_v48 = vor.u32 %v6616_v38, %v5327_v30  ;;  %v6456_v28 = vld [vmem:[#allocation2 + $0x2d4] sm:$0xf] }
 0x1ea   :  { %v6780_v42 = vld [vmem:[#allocation2 + $0xcec] sm:$0xf0]  ;;  %v6520_v12 = vld [vmem:[#allocation2 + $0x4d4] sm:$0xf] }
 0x1eb   :  { %v6221_v55 = vld [vmem:[#allocation2 + $0xed0] sm:$0xf]  ;;  %v5966_v52 = vor.u32 %v6780_v42, %v5965_v27  ;;  %3723 = vmatpush.bf16.msrb.mxu1 %v5710_v50  ;;  %v5074_v27 = vor.u32 %v6552_v34, %v5071_v36  ;;  %v6416_v42 = vld [vmem:[#allocation2 + $0x194] sm:$0xf] }
 0x1ec   :  { %v6844_v46 = vld [vmem:[#allocation2 + $0xeec] sm:$0xf0]  ;;  %v4783_v50 = vld [vmem:[#allocation2 + $0x3b0] sm:$0xf0] }
 0x1ed   :  { %v5421_v56 = vld [vmem:[#allocation2 + $0x890] sm:$0xf]  ;;  %v6222_v57 = vor.u32 %v6844_v46, %v6221_v55  ;;  %3737 = vmatpush.bf16.msrb.mxu2 %v5966_v52  ;;  %v4527_v55 = vld [vmem:[#allocation2 + $0x1b0] sm:$0xf0] }
 0x1ee   :  { %v6644_v3 = vld [vmem:[#allocation2 + $0x8ac] sm:$0xf0]  ;;  %v6480_v46 = vld [vmem:[#allocation2 + $0x394] sm:$0xf] }
 0x1ef   :  { %v5677_v32 = vld [vmem:[#allocation2 + $0xa90] sm:$0xf]  ;;  %v5422_v0 = vor.u32 %v6644_v3, %v5421_v56  ;;  %3751 = vmatpush.bf16.msrb.mxu3 %v6222_v57  ;;  %v6544_v52 = vld [vmem:[#allocation2 + $0x594] sm:$0xf]  ;;  %v4530_v57 = vor.u32 %v6416_v42, %v4527_v55 }
 0x1f0   :  { %v6708_v22 = vld [vmem:[#allocation2 + $0xaac] sm:$0xf0]  ;;  %v5039_v56 = vld [vmem:[#allocation2 + $0x5b0] sm:$0xf0] }
 0x1f1   :  { %v5933_v59 = vld [vmem:[#allocation2 + $0xc90] sm:$0xf]  ;;  %v5678_v45 = vor.u32 %v6708_v22, %v5677_v32  ;;  %3710 = vmatpush.bf16.msrb.mxu0 %v5422_v0  ;;  %v6608_v3 = vld [vmem:[#allocation2 + $0x794] sm:$0xf]  ;;  %v4786_v22 = vor.u32 %v6480_v46, %v4783_v50 }
 0x1f2   :  { %v6772_v60 = vld [vmem:[#allocation2 + $0xcac] sm:$0xf0]  ;;  %v5295_v32 = vld [vmem:[#allocation2 + $0x7b0] sm:$0xf0] }
 0x1f3   :  { %v6189_v61 = vld [vmem:[#allocation2 + $0xe90] sm:$0xf]  ;;  %v5934_v2 = vor.u32 %v6772_v60, %v5933_v59  ;;  %3724 = vmatpush.bf16.msrb.mxu1 %v5678_v45  ;;  %v5042_v59 = vor.u32 %v6544_v52, %v5039_v56  ;;  %v6408_v60 = vld [vmem:[#allocation2 + $0x154] sm:$0xf]  ;;  %v5298_v0 = vor.u32 %v6608_v3, %v5295_v32  ;;  %v7166_v52 = vpop.f32.mrf.mxu2  ;;  %v7168_v3 = vpop.f32.mrf.mxu3 }
 0x1f4   :  { %v6836_v62 = vld [vmem:[#allocation2 + $0xeac] sm:$0xf0]  ;;  %v4751_v45 = vld [vmem:[#allocation2 + $0x370] sm:$0xf0] }
 0x1f5   :  { %v5389_v4 = vld [vmem:[#allocation2 + $0x850] sm:$0xf]  ;;  %v6190_v63 = vor.u32 %v6836_v62, %v6189_v61  ;;  %3738 = vmatpush.bf16.msrb.mxu2 %v5934_v2  ;;  %v4495_v61 = vld [vmem:[#allocation2 + $0x170] sm:$0xf0] }
 0x1f6   :  { %v6636_v7 = vld [vmem:[#allocation2 + $0x86c] sm:$0xf0]  ;;  %v6472_v62 = vld [vmem:[#allocation2 + $0x354] sm:$0xf] }
 0x1f7   :  { %v5645_v8 = vld [vmem:[#allocation2 + $0xa50] sm:$0xf]  ;;  %v5390_v9 = vor.u32 %v6636_v7, %v5389_v4  ;;  %3752 = vmatpush.bf16.msrb.mxu3 %v6190_v63  ;;  %v6536_v2 = vld [vmem:[#allocation2 + $0x554] sm:$0xf]  ;;  %v4498_v63 = vor.u32 %v6408_v60, %v4495_v61 }
 0x1f8   :  { %v6700_v5 = vld [vmem:[#allocation2 + $0xa6c] sm:$0xf0]  ;;  %v5007_v4 = vld [vmem:[#allocation2 + $0x570] sm:$0xf0] }
 0x1f9   :  { %v5901_v51 = vld [vmem:[#allocation2 + $0xc50] sm:$0xf]  ;;  %v5646_v21 = vor.u32 %v6700_v5, %v5645_v8  ;;  %3711 = vmatpush.bf16.msrb.mxu0 %v5390_v9  ;;  %v6600_v7 = vld [vmem:[#allocation2 + $0x754] sm:$0xf]  ;;  %v4754_v5 = vor.u32 %v6472_v62, %v4751_v45 }
 0x1fa   :  { %v6764_v13 = vld [vmem:[#allocation2 + $0xc6c] sm:$0xf0]  ;;  %v5263_v8 = vld [vmem:[#allocation2 + $0x770] sm:$0xf0] }
 0x1fb   :  { %v6157_v11 = vld [vmem:[#allocation2 + $0xe50] sm:$0xf]  ;;  %v5902_v49 = vor.u32 %v6764_v13, %v5901_v51  ;;  %3725 = vmatpush.bf16.msrb.mxu1 %v5646_v21  ;;  %v5010_v51 = vor.u32 %v6536_v2, %v5007_v4  ;;  %v6400_v13 = vld [vmem:[#allocation2 + $0x114] sm:$0xf]  ;;  %v5266_v9 = vor.u32 %v6600_v7, %v5263_v8  ;;  %v7172_v8 = vpop.f32.mrf.mxu1 }
 0x1fc   :  { %v6828_v14 = vld [vmem:[#allocation2 + $0xe6c] sm:$0xf0]  ;;  %v4975_v21 = vld [vmem:[#allocation2 + $0x530] sm:$0xf0] }
 0x1fd   :  { %v5357_v18 = vld [vmem:[#allocation2 + $0x810] sm:$0xf]  ;;  %v6158_v24 = vor.u32 %v6828_v14, %v6157_v11  ;;  %3739 = vmatpush.bf16.msrb.mxu2 %v5902_v49  ;;  %v4463_v11 = vld [vmem:[#allocation2 + $0x130] sm:$0xf0] }
 0x1fe   :  { %v6628_v15 = vld [vmem:[#allocation2 + $0x82c] sm:$0xf0]  ;;  %v6464_v14 = vld [vmem:[#allocation2 + $0x314] sm:$0xf] }
 0x1ff   :  { %v5613_v23 = vld [vmem:[#allocation2 + $0xa10] sm:$0xf]  ;;  %v5358_v25 = vor.u32 %v6628_v15, %v5357_v18  ;;  %3753 = vmatpush.bf16.msrb.mxu3 %v6158_v24  ;;  %v4719_v18 = vld [vmem:[#allocation2 + $0x330] sm:$0xf0] }
 0x200   :  { %v6692_v31 = vld [vmem:[#allocation2 + $0xa2c] sm:$0xf0]  ;;  %v6528_v15 = vld [vmem:[#allocation2 + $0x514] sm:$0xf]  ;;  %v4722_v24 = vor.u32 %v6464_v14, %v4719_v18 }
 0x201   :  { %v5869_v20 = vld [vmem:[#allocation2 + $0xc10] sm:$0xf]  ;;  %v5614_v16 = vor.u32 %v6692_v31, %v5613_v23  ;;  %3712 = vmatpush.bf16.msrb.mxu0 %v5358_v25  ;;  %v6592_v49 = vld [vmem:[#allocation2 + $0x714] sm:$0xf]  ;;  %v4466_v31 = vor.u32 %v6400_v13, %v4463_v11 }
 0x202   :  { %v6756_v26 = vld [vmem:[#allocation2 + $0xc2c] sm:$0xf0]  ;;  %v5231_v23 = vld [vmem:[#allocation2 + $0x730] sm:$0xf0] }
 0x203   :  { %v6125_v53 = vld [vmem:[#allocation2 + $0xe10] sm:$0xf]  ;;  %v5870_v37 = vor.u32 %v6756_v26, %v5869_v20  ;;  %3726 = vmatpush.bf16.msrb.mxu1 %v5614_v16  ;;  %v7162_v20 = vpop.f32.mrf.mxu0  ;;  %v4978_v26 = vor.u32 %v6528_v15, %v4975_v21  ;;  %v5234_v33 = vor.u32 %v6592_v49, %v5231_v23  ;;  %v4687_v25 = vld [vmem:[#allocation2 + $0x2f0] sm:$0xf0] }
 0x204   :  { %v6820_v54 = vld [vmem:[#allocation2 + $0xe2c] sm:$0xf0]  ;;  %3713 = vmatmul.bf16.vlgmr.msrb.gmra.mxu0 %v7031_v39  ;;  %v4943_v34 = vld [vmem:[#allocation2 + $0x4f0] sm:$0xf0]  ;;  %v4690_v38 = vor.u32 %v6456_v28, %v4687_v25 }
 0x205   :  { %v6126_v40 = vor.u32 %v6820_v54, %v6125_v53  ;;  %3740 = vmatpush.bf16.msrb.mxu2 %v5870_v37  ;;  %3761 = vmatpush.bf16.msra.mxu0 %v4562_v35  ;;  %v6392_v53 = vld [vmem:[#allocation2 + $0xd4] sm:$0xf]  ;;  %v4946_v30 = vor.u32 %v6520_v12, %v4943_v34 }
 0x206   :  { %3727 = vmatmul.bf16.vlgmr.msrb.gmra.mxu1 %v7035_v44  ;;  %v4431_v54 = vld [vmem:[#allocation2 + $0xf0] sm:$0xf0] }
 0x207   :  { %3754 = vmatpush.bf16.msrb.mxu3 %v6126_v40  ;;  %3775 = vmatpush.bf16.msra.mxu1 %v4818_v41  ;;  %v6584_v36 = vld [vmem:[#allocation2 + $0x6d4] sm:$0xf]  ;;  %v4434_v37 = vor.u32 %v6392_v53, %v4431_v54 }
 0x208   :  { %3741 = vmatmul.bf16.vlgmr.msrb.gmra.mxu2 %v7033_v43  ;;  %v5199_v16 = vld [vmem:[#allocation2 + $0x6f0] sm:$0xf0] }
 0x209   :  { %3789 = vmatpush.bf16.msra.mxu2 %v5074_v27  ;;  %3762 = vmatpush.bf16.msra.mxu0 %v4530_v57  ;;  %v6384_v40 = vld [vmem:[#allocation2 + $0x94] sm:$0xf]  ;;  %v5202_v27 = vor.u32 %v6584_v36, %v5199_v16  ;;  %v7174_v16 = vld [vmem:[#allocation4] sm:$0xff] }
 0x20a   :  { %3755 = vmatmul.bf16.vlgmr.msrb.gmra.mxu3 %v7037_v47  ;;  %v4399_v35 = vld [vmem:[#allocation2 + $0xb0] sm:$0xf0] }
 0x20b   :  { %3803 = vmatpush.bf16.msra.mxu3 %v5330_v48  ;;  %3776 = vmatpush.bf16.msra.mxu1 %v4786_v22  ;;  %v6448_v41 = vld [vmem:[#allocation2 + $0x294] sm:$0xf]  ;;  %v4402_v56 = vor.u32 %v6384_v40, %v4399_v35  ;;  %v7170_v2 = vpop.f32.mrf.mxu0  ;;  %v7179_v35 = vpop.f32.mrf.mxu3 }
 0x20c   :  { %v4655_v42 = vld [vmem:[#allocation2 + $0x2b0] sm:$0xf0] }
 0x20d   :  { %3790 = vmatpush.bf16.msra.mxu2 %v5042_v59  ;;  %3763 = vmatpush.bf16.msra.mxu0 %v4498_v63  ;;  %v6512_v55 = vld [vmem:[#allocation2 + $0x494] sm:$0xf]  ;;  %v4658_v32 = vor.u32 %v6448_v41, %v4655_v42 }
 0x20e   :  { %v4911_v46 = vld [vmem:[#allocation2 + $0x4b0] sm:$0xf0] }
 0x20f   :  { %3804 = vmatpush.bf16.msra.mxu3 %v5298_v0  ;;  %3777 = vmatpush.bf16.msra.mxu1 %v4754_v5  ;;  %v6576_v48 = vld [vmem:[#allocation2 + $0x694] sm:$0xf]  ;;  %v4914_v57 = vor.u32 %v6512_v55, %v4911_v46 }
 0x210   :  { %v5167_v50 = vld [vmem:[#allocation2 + $0x6b0] sm:$0xf0] }
 0x211   :  { %3791 = vmatpush.bf16.msra.mxu2 %v5010_v51  ;;  %3764 = vmatpush.bf16.msra.mxu0 %v4466_v31  ;;  %v6376_v22 = vld [vmem:[#allocation2 + $0x54] sm:$0xf]  ;;  %v5170_v61 = vor.u32 %v6576_v48, %v5167_v50 }
 0x212   :  { %v4367_v59 = vld [vmem:[#allocation2 + $0x70] sm:$0xf0] }
 0x213   :  { %3805 = vmatpush.bf16.msra.mxu3 %v5266_v9  ;;  %3778 = vmatpush.bf16.msra.mxu1 %v4722_v24  ;;  %v6440_v60 = vld [vmem:[#allocation2 + $0x254] sm:$0xf]  ;;  %v4370_v63 = vor.u32 %v6376_v22, %v4367_v59 }
 0x214   :  { %v4623_v62 = vld [vmem:[#allocation2 + $0x270] sm:$0xf0] }
 0x215   :  { %3792 = vmatpush.bf16.msra.mxu2 %v4978_v26  ;;  %3765 = vmatpush.bf16.msra.mxu0 %v4434_v37  ;;  %v6504_v0 = vld [vmem:[#allocation2 + $0x454] sm:$0xf]  ;;  %v4626_v13 = vor.u32 %v6440_v60, %v4623_v62  ;;  %v627_v37 = vperm.slane %v7174_v16, 2  ;;  %v7183_v60 = vpop.f32.mrf.mxu1 }
 0x216   :  { %v4879_v45 = vld [vmem:[#allocation2 + $0x470] sm:$0xf0] }
 0x217   :  { %3806 = vmatpush.bf16.msra.mxu3 %v5234_v33  ;;  %3779 = vmatpush.bf16.msra.mxu1 %v4690_v38  ;;  %v6568_v4 = vld [vmem:[#allocation2 + $0x654] sm:$0xf]  ;;  %v4882_v11 = vor.u32 %v6504_v0, %v4879_v45  ;;  %v7177_v38 = vpop.f32.mrf.mxu2  ;;  %v3435_v62 = vadd.f32 %v7162_v20, %v627_v37 }
 0x218   :  { %v5135_v7 = vld [vmem:[#allocation2 + $0x670] sm:$0xf0] }
 0x219   :  { %3793 = vmatpush.bf16.msra.mxu2 %v4946_v30  ;;  %3766 = vmatpush.bf16.msra.mxu0 %v4402_v56  ;;  %v6368_v5 = vld [vmem:[#allocation2 + $0x14] sm:$0xf]  ;;  %v5138_v15 = vor.u32 %v6568_v4, %v5135_v7 }
 0x21a   :  { %v4335_v51 = vld [vmem:[#allocation2 + $0x30] sm:$0xf0] }
 0x21b   :  { %3807 = vmatpush.bf16.msra.mxu3 %v5202_v27  ;;  %3780 = vmatpush.bf16.msra.mxu1 %v4658_v32  ;;  %v6432_v14 = vld [vmem:[#allocation2 + $0x214] sm:$0xf]  ;;  %v4338_v53 = vor.u32 %v6368_v5, %v4335_v51 }
 0x21c   :  { %v4591_v9 = vld [vmem:[#allocation2 + $0x230] sm:$0xf0] }
 0x21d   :  { %3794 = vmatpush.bf16.msra.mxu2 %v4914_v57  ;;  %v6496_v18 = vld [vmem:[#allocation2 + $0x414] sm:$0xf]  ;;  %3767 = vmatpush.bf16.msra.mxu0 %v4370_v63  ;;  %v4594_v25 = vor.u32 %v6432_v14, %v4591_v9  ;;  %v7181_v57 = vpop.f32.mrf.mxu0 }
 0x21e   :  { %v4847_v21 = vld [vmem:[#allocation2 + $0x430] sm:$0xf0] }
 0x21f   :  { %3808 = vmatpush.bf16.msra.mxu3 %v5170_v61  ;;  %v6560_v49 = vld [vmem:[#allocation2 + $0x614] sm:$0xf]  ;;  %3781 = vmatpush.bf16.msra.mxu1 %v4626_v13  ;;  %v4850_v12 = vor.u32 %v6496_v18, %v4847_v21  ;;  %v3449_v18 = vadd.f32 %v7164_v29, %v3435_v62 }
 0x220   :  { %v5103_v23 = vld [vmem:[#allocation2 + $0x630] sm:$0xf0] }
 0x221   :  { %v6680_v31 = vld [vmem:[#allocation2 + $0x9d4] sm:$0xf]  ;;  %3795 = vmatpush.bf16.msra.mxu2 %v4882_v11  ;;  %v5106_v30 = vor.u32 %v6560_v49, %v5103_v23  ;;  %3768 = vmatpush.bf16.msra.mxu0 %v4338_v53 }
 0x222   :  { %v5583_v24 = vld [vmem:[#allocation2 + $0x9f0] sm:$0xf0] }
 0x223   :  { %v6744_v26 = vld [vmem:[#allocation2 + $0xbd4] sm:$0xf]  ;;  %3809 = vmatpush.bf16.msra.mxu3 %v5138_v15  ;;  %v5586_v40 = vor.u32 %v6680_v31, %v5583_v24  ;;  %3782 = vmatpush.bf16.msra.mxu1 %v4594_v25  ;;  %v7193_v24 = vpop.f32.mrf.mxu2 }
 0x224   :  { %v5839_v54 = vld [vmem:[#allocation2 + $0xbf0] sm:$0xf0]  ;;  %3769 = vmatmul.bf16.vlgmr.msra.gmra.mxu0 %v6980_v58 }
 0x225   :  { %v6808_v28 = vld [vmem:[#allocation2 + $0xdd4] sm:$0xf]  ;;  %v5842_v41 = vor.u32 %v6744_v26, %v5839_v54  ;;  %3796 = vmatpush.bf16.msra.mxu2 %v4850_v12  ;;  %3817 = vmatpush.bf16.msrb.mxu0 %v5586_v40 }
 0x226   :  { %v6095_v33 = vld [vmem:[#allocation2 + $0xdf0] sm:$0xf0]  ;;  %3783 = vmatmul.bf16.vlgmr.msra.gmra.mxu1 %v6998_v10 }
 0x227   :  { %v6872_v34 = vld [vmem:[#allocation2 + $0xfd4] sm:$0xf]  ;;  %v6098_v27 = vor.u32 %v6808_v28, %v6095_v33  ;;  %3810 = vmatpush.bf16.msra.mxu3 %v5106_v30  ;;  %3831 = vmatpush.bf16.msrb.mxu1 %v5842_v41  ;;  %v7195_v33 = vpop.f32.mrf.mxu3 }
 0x228   :  { %v6351_v36 = vld [vmem:[#allocation2 + $0xff0] sm:$0xf0]  ;;  %3797 = vmatmul.bf16.vlgmr.msra.gmra.mxu2 %v6985_v1 }
 0x229   :  { %v6672_v42 = vld [vmem:[#allocation2 + $0x994] sm:$0xf]  ;;  %v6354_v48 = vor.u32 %v6872_v34, %v6351_v36  ;;  %3845 = vmatpush.bf16.msrb.mxu2 %v6098_v27  ;;  %v3463_v34 = vadd.f32 %v7166_v52, %v3449_v18  ;;  %v7198_v36 = vpop.f32.mrf.mxu0 }
 0x22a   :  { %v5551_v55 = vld [vmem:[#allocation2 + $0x9b0] sm:$0xf0]  ;;  %3811 = vmatmul.bf16.vlgmr.msra.gmra.mxu3 %v7003_v17 }
 0x22b   :  { %v6736_v46 = vld [vmem:[#allocation2 + $0xb94] sm:$0xf]  ;;  %v5554_v61 = vor.u32 %v6672_v42, %v5551_v55  ;;  %3859 = vmatpush.bf16.msrb.mxu3 %v6354_v48  ;;  %v7200_v55 = vpop.f32.mrf.mxu1 }
 0x22c   :  { %v5807_v50 = vld [vmem:[#allocation2 + $0xbb0] sm:$0xf0] }
 0x22d   :  { %v6800_v56 = vld [vmem:[#allocation2 + $0xd94] sm:$0xf]  ;;  %v5810_v0 = vor.u32 %v6736_v46, %v5807_v50  ;;  %3818 = vmatpush.bf16.msrb.mxu0 %v5554_v61 }
 0x22e   :  { %v6063_v32 = vld [vmem:[#allocation2 + $0xdb0] sm:$0xf0] }
 0x22f   :  { %v6864_v22 = vld [vmem:[#allocation2 + $0xf94] sm:$0xf]  ;;  %v6066_v45 = vor.u32 %v6800_v56, %v6063_v32  ;;  %3832 = vmatpush.bf16.msrb.mxu1 %v5810_v0  ;;  %v7207_v18 = vpop.f32.mrf.mxu3 }
 0x230   :  { %v6319_v59 = vld [vmem:[#allocation2 + $0xfb0] sm:$0xf0] }
 0x231   :  { %v6664_v4 = vld [vmem:[#allocation2 + $0x954] sm:$0xf]  ;;  %v6322_v5 = vor.u32 %v6864_v22, %v6319_v59  ;;  %3846 = vmatpush.bf16.msrb.mxu2 %v6066_v45  ;;  %v3477_v59 = vadd.f32 %v7168_v3, %v3463_v34  ;;  %v628_v3 = vperm.slane %v7174_v16, 3  ;;  %v5269_v16 = vld [vmem:[#allocation2 + $0x758] sm:$0xf] }
 0x232   :  { %v5519_v7 = vld [vmem:[#allocation2 + $0x970] sm:$0xf0] }
 0x233   :  { %v6728_v63 = vld [vmem:[#allocation2 + $0xb54] sm:$0xf]  ;;  %v5522_v20 = vor.u32 %v6664_v4, %v5519_v7  ;;  %3860 = vmatpush.bf16.msrb.mxu3 %v6322_v5 }
 0x234   :  { %v5775_v51 = vld [vmem:[#allocation2 + $0xb70] sm:$0xf0] }
 0x235   :  { %v6792_v13 = vld [vmem:[#allocation2 + $0xd54] sm:$0xf]  ;;  %v5778_v15 = vor.u32 %v6728_v63, %v5775_v51  ;;  %3819 = vmatpush.bf16.msrb.mxu0 %v5522_v20  ;;  %v3491_v20 = vadd.f32 %v7181_v57, %v3477_v59 }
 0x236   :  { %v6031_v11 = vld [vmem:[#allocation2 + $0xd70] sm:$0xf0] }
 0x237   :  { %v6856_v14 = vld [vmem:[#allocation2 + $0xf54] sm:$0xf]  ;;  %v6034_v21 = vor.u32 %v6792_v13, %v6031_v11  ;;  %3833 = vmatpush.bf16.msrb.mxu1 %v5778_v15 }
 0x238   :  { %v6287_v9 = vld [vmem:[#allocation2 + $0xf70] sm:$0xf0] }
 0x239   :  { %v6656_v49 = vld [vmem:[#allocation2 + $0x914] sm:$0xf]  ;;  %v6290_v26 = vor.u32 %v6856_v14, %v6287_v9  ;;  %3847 = vmatpush.bf16.msrb.mxu2 %v6034_v21  ;;  %v7203_v14 = vpop.f32.mrf.mxu2 }
 0x23a   :  { %v5487_v23 = vld [vmem:[#allocation2 + $0x930] sm:$0xf0] }
 0x23b   :  { %v6720_v31 = vld [vmem:[#allocation2 + $0xb14] sm:$0xf]  ;;  %v5490_v29 = vor.u32 %v6656_v49, %v5487_v23  ;;  %3861 = vmatpush.bf16.msrb.mxu3 %v6290_v26  ;;  %v3546_v49 = vpop.f32.mrf.mxu0 }
 0x23c   :  { %v5743_v53 = vld [vmem:[#allocation2 + $0xb30] sm:$0xf0] }
 0x23d   :  { %v6784_v54 = vld [vmem:[#allocation2 + $0xd14] sm:$0xf]  ;;  %v5746_v30 = vor.u32 %v6720_v31, %v5743_v53  ;;  %3820 = vmatpush.bf16.msrb.mxu0 %v5490_v29 }
 0x23e   :  { %v5999_v28 = vld [vmem:[#allocation2 + $0xd30] sm:$0xf0] }
 0x23f   :  { %v6848_v25 = vld [vmem:[#allocation2 + $0xf14] sm:$0xf]  ;;  %v6002_v40 = vor.u32 %v6784_v54, %v5999_v28  ;;  %3834 = vmatpush.bf16.msrb.mxu1 %v5746_v30 }
 0x240   :  { %v6255_v12 = vld [vmem:[#allocation2 + $0xf30] sm:$0xf0] }
 0x241   :  { %v6648_v41 = vld [vmem:[#allocation2 + $0x8d4] sm:$0xf]  ;;  %v6258_v46 = vor.u32 %v6848_v25, %v6255_v12  ;;  %3848 = vmatpush.bf16.msrb.mxu2 %v6002_v40  ;;  %v3560_v12 = vpop.f32.mrf.mxu1 }
 0x242   :  { %v5455_v27 = vld [vmem:[#allocation2 + $0x8f0] sm:$0xf0] }
 0x243   :  { %v6712_v42 = vld [vmem:[#allocation2 + $0xad4] sm:$0xf]  ;;  %v5458_v52 = vor.u32 %v6648_v41, %v5455_v27  ;;  %3862 = vmatpush.bf16.msrb.mxu3 %v6258_v46  ;;  %v3505_v41 = vadd.f32 %v7183_v60, %v3491_v20  ;;  %v3588_v20 = vpop.f32.mrf.mxu3 }
 0x244   :  { %v5711_v48 = vld [vmem:[#allocation2 + $0xaf0] sm:$0xf0] }
 0x245   :  { %v6776_v50 = vld [vmem:[#allocation2 + $0xcd4] sm:$0xf]  ;;  %v5714_v61 = vor.u32 %v6712_v42, %v5711_v48  ;;  %3821 = vmatpush.bf16.msrb.mxu0 %v5458_v52 }
 0x246   :  { %v5967_v56 = vld [vmem:[#allocation2 + $0xcf0] sm:$0xf0] }
 0x247   :  { %v6840_v32 = vld [vmem:[#allocation2 + $0xed4] sm:$0xf]  ;;  %v5970_v62 = vor.u32 %v6776_v50, %v5967_v56  ;;  %3835 = vmatpush.bf16.msrb.mxu1 %v5714_v61  ;;  %v3547_v56 = vadd.f32 %v3546_v49, %v628_v3  ;;  %v4565_v61 = vld [vmem:[#allocation2 + $0x1d8] sm:$0xf] }
 0x248   :  { %v6223_v22 = vld [vmem:[#allocation2 + $0xef0] sm:$0xf0] }
 0x249   :  { %v6640_v0 = vld [vmem:[#allocation2 + $0x894] sm:$0xf]  ;;  %v6226_v7 = vor.u32 %v6840_v32, %v6223_v22  ;;  %3849 = vmatpush.bf16.msrb.mxu2 %v5970_v62  ;;  %v6429_v62 = vld [vmem:[#allocation2 + $0x1f4] sm:$0xf0] }
 0x24a   :  { %v5423_v45 = vld [vmem:[#allocation2 + $0x8b0] sm:$0xf0] }
 0x24b   :  { %v6704_v4 = vld [vmem:[#allocation2 + $0xa94] sm:$0xf]  ;;  %v5426_v9 = vor.u32 %v6640_v0, %v5423_v45  ;;  %3863 = vmatpush.bf16.msrb.mxu3 %v6226_v7  ;;  %v4821_v0 = vld [vmem:[#allocation2 + $0x3d8] sm:$0xf] }
 0x24c   :  { %v5679_v63 = vld [vmem:[#allocation2 + $0xab0] sm:$0xf0]  ;;  %v6493_v45 = vld [vmem:[#allocation2 + $0x3f4] sm:$0xf0] }
 0x24d   :  { %v6768_v5 = vld [vmem:[#allocation2 + $0xc94] sm:$0xf]  ;;  %v5682_v15 = vor.u32 %v6704_v4, %v5679_v63  ;;  %3822 = vmatpush.bf16.msrb.mxu0 %v5426_v9  ;;  %v5077_v4 = vld [vmem:[#allocation2 + $0x5d8] sm:$0xf]  ;;  %v3574_v63 = vpop.f32.mrf.mxu2 }
 0x24e   :  { %v5935_v51 = vld [vmem:[#allocation2 + $0xcb0] sm:$0xf0]  ;;  %v6557_v7 = vld [vmem:[#allocation2 + $0x5f4] sm:$0xf0] }
 0x24f   :  { %v6832_v13 = vld [vmem:[#allocation2 + $0xe94] sm:$0xf]  ;;  %v5938_v21 = vor.u32 %v6768_v5, %v5935_v51  ;;  %3836 = vmatpush.bf16.msrb.mxu1 %v5682_v15  ;;  %v3519_v5 = vadd.f32 %v7193_v24, %v3505_v41  ;;  %v6621_v9 = vld [vmem:[#allocation2 + $0x7f4] sm:$0xf0]  ;;  %v3437_v15 = vadd.f32 %v7170_v2, %v627_v37 }
 0x250   :  { %v6191_v11 = vld [vmem:[#allocation2 + $0xeb0] sm:$0xf0]  ;;  %v6421_v24 = vld [vmem:[#allocation2 + $0x1b4] sm:$0xf0] }
 0x251   :  { %v6632_v23 = vld [vmem:[#allocation2 + $0x854] sm:$0xf]  ;;  %v6194_v53 = vor.u32 %v6832_v13, %v6191_v11  ;;  %3850 = vmatpush.bf16.msrb.mxu2 %v5938_v21  ;;  %v5333_v11 = vld [vmem:[#allocation2 + $0x7d8] sm:$0xf]  ;;  %v3561_v21 = vadd.f32 %v3560_v12, %v3547_v56  ;;  %v3451_v12 = vadd.f32 %v7172_v8, %v3437_v15 }
 0x252   :  { %v5391_v31 = vld [vmem:[#allocation2 + $0x870] sm:$0xf0]  ;;  %v5301_v2 = vld [vmem:[#allocation2 + $0x798] sm:$0xf] }
 0x253   :  { %v6696_v26 = vld [vmem:[#allocation2 + $0xa54] sm:$0xf]  ;;  %v5394_v57 = vor.u32 %v6632_v23, %v5391_v31  ;;  %3864 = vmatpush.bf16.msrb.mxu3 %v6194_v53  ;;  %v4566_v23 = vor.u32 %v6429_v62, %v4565_v61  ;;  %v4822_v31 = vor.u32 %v6493_v45, %v4821_v0  ;;  %v3548_v53 = vpop.f32.mrf.mxu0  ;;  %v6613_v37 = vld [vmem:[#allocation2 + $0x7b4] sm:$0xf0]  ;;  %v3575_v41 = vadd.f32 %v3574_v63, %v3561_v21 }
 0x254   :  { %v5647_v54 = vld [vmem:[#allocation2 + $0xa70] sm:$0xf0]  ;;  %v4757_v56 = vld [vmem:[#allocation2 + $0x358] sm:$0xf]  ;;  %v3465_v62 = vadd.f32 %v7177_v38, %v3451_v12 }
 0x255   :  { %v6760_v28 = vld [vmem:[#allocation2 + $0xc54] sm:$0xf]  ;;  %v5650_v27 = vor.u32 %v6696_v26, %v5647_v54  ;;  %3823 = vmatpush.bf16.msrb.mxu0 %v5394_v57  ;;  %v5078_v26 = vor.u32 %v6557_v7, %v5077_v4  ;;  %v4533_v54 = vld [vmem:[#allocation2 + $0x198] sm:$0xf]  ;;  %v3589_v0 = vadd.f32 %v3588_v20, %v3575_v41  ;;  %v3576_v45 = vpop.f32.mrf.mxu2 }
 0x256   :  { %v5903_v25 = vld [vmem:[#allocation2 + $0xc70] sm:$0xf0]  ;;  %v6549_v57 = vld [vmem:[#allocation2 + $0x5b4] sm:$0xf0] }
 0x257   :  { %v6824_v29 = vld [vmem:[#allocation2 + $0xe54] sm:$0xf]  ;;  %v5906_v42 = vor.u32 %v6760_v28, %v5903_v25  ;;  %3837 = vmatpush.bf16.msrb.mxu1 %v5650_v27  ;;  %v4789_v28 = vld [vmem:[#allocation2 + $0x398] sm:$0xf]  ;;  %v5334_v25 = vor.u32 %v6621_v9, %v5333_v11  ;;  %v4534_v27 = vor.u32 %v6421_v24, %v4533_v54 }
 0x258   :  { %v6159_v34 = vld [vmem:[#allocation2 + $0xe70] sm:$0xf0]  ;;  %v5013_v8 = vld [vmem:[#allocation2 + $0x558] sm:$0xf] }
 0x259   :  { %v6624_v30 = vld [vmem:[#allocation2 + $0x814] sm:$0xf]  ;;  %v6162_v32 = vor.u32 %v6824_v29, %v6159_v34  ;;  %3851 = vmatpush.bf16.msrb.mxu2 %v5906_v42  ;;  %v6485_v29 = vld [vmem:[#allocation2 + $0x3b4] sm:$0xf0]  ;;  %v3549_v42 = vadd.f32 %v3548_v53, %v628_v3  ;;  %v3479_v53 = vadd.f32 %v7179_v35, %v3465_v62 }
 0x25a   :  { %v5359_v40 = vld [vmem:[#allocation2 + $0x830] sm:$0xf0]  ;;  %v5045_v34 = vld [vmem:[#allocation2 + $0x598] sm:$0xf] }
 0x25b   :  { %v6688_v46 = vld [vmem:[#allocation2 + $0xa14] sm:$0xf]  ;;  %v5362_v60 = vor.u32 %v6624_v30, %v5359_v40  ;;  %3865 = vmatpush.bf16.msrb.mxu3 %v6162_v32  ;;  %v3562_v30 = vpop.f32.mrf.mxu1  ;;  %v7217_v40 = vadd.f32 %v7195_v33, %v3519_v5  ;;  %v6413_v33 = vld [vmem:[#allocation2 + $0x174] sm:$0xf0]  ;;  %v5302_v32 = vor.u32 %v6613_v37, %v5301_v2  ;;  %v3590_v5 = vpop.f32.mrf.mxu3 }
 0x25c   :  { %v5615_v48 = vld [vmem:[#allocation2 + $0xa30] sm:$0xf0]  ;;  %v6605_v3 = vld [vmem:[#allocation2 + $0x774] sm:$0xf0]  ;;  %v3563_v4 = vadd.f32 %v3562_v30, %v3549_v42 }
 0x25d   :  { %v6752_v50 = vld [vmem:[#allocation2 + $0xc14] sm:$0xf]  ;;  %v5618_v51 = vor.u32 %v6688_v46, %v5615_v48  ;;  %3824 = vmatpush.bf16.msrb.mxu0 %v5362_v60  ;;  %v4790_v46 = vor.u32 %v6485_v29, %v4789_v28  ;;  %v5046_v48 = vor.u32 %v6549_v57, %v5045_v34  ;;  %v4165_v61 = vmul.f32 %v7217_v40, %v7217_v40  ;;  %v4725_v11 = vld [vmem:[#allocation2 + $0x318] sm:$0xf] }
 0x25e   :  { %v5871_v22 = vld [vmem:[#allocation2 + $0xc30] sm:$0xf0]  ;;  %v5270_v9 = vor.u32 %v6605_v3, %v5269_v16  ;;  %v6469_v15 = vld [vmem:[#allocation2 + $0x334] sm:$0xf0] }
 0x25f   :  { %v6816_v52 = vld [vmem:[#allocation2 + $0xe14] sm:$0xf]  ;;  %v5874_v13 = vor.u32 %v6752_v50, %v5871_v22  ;;  %3838 = vmatpush.bf16.msrb.mxu1 %v5618_v51  ;;  %v4501_v50 = vld [vmem:[#allocation2 + $0x158] sm:$0xf]  ;;  %v4726_v29 = vor.u32 %v6469_v15, %v4725_v11 }
 0x260   :  { %v6127_v59 = vld [vmem:[#allocation2 + $0xe30] sm:$0xf0]  ;;  %3825 = vmatmul.bf16.vlgmr.msrb.gmra.mxu0 %v7031_v39  ;;  %v6477_v22 = vld [vmem:[#allocation2 + $0x374] sm:$0xf0]  ;;  %v4502_v60 = vor.u32 %v6413_v33, %v4501_v50  ;;  %v3493_v33 = vadd.f32 %v7198_v36, %v3479_v53 }
 0x261   :  { %v6130_v49 = vor.u32 %v6816_v52, %v6127_v59  ;;  %3852 = vmatpush.bf16.msrb.mxu2 %v5874_v13  ;;  %3873 = vmatpush.bf16.msra.mxu0 %v4566_v23  ;;  %v6541_v52 = vld [vmem:[#allocation2 + $0x574] sm:$0xf0]  ;;  %v4150_v59 = vrot.slane %v7217_v40, 4  ;;  %v4758_v7 = vor.u32 %v6477_v22, %v4757_v56  ;;  %v3602_v23 = vpop.f32.mrf.mxu0 }
 0x262   :  { %3839 = vmatmul.bf16.vlgmr.msrb.gmra.mxu1 %v7035_v44  ;;  %v5014_v63 = vor.u32 %v6541_v52, %v5013_v8  ;;  %v4469_v51 = vld [vmem:[#allocation2 + $0x118] sm:$0xf]  ;;  %v3603_v54 = vadd.f32 %v3602_v23, %v3589_v0  ;;  %v3630_v0 = vpop.f32.mrf.mxu2 }
 0x263   :  { %3866 = vmatpush.bf16.msrb.mxu3 %v6130_v49  ;;  %3887 = vmatpush.bf16.msra.mxu1 %v4822_v31  ;;  %v6405_v13 = vld [vmem:[#allocation2 + $0x134] sm:$0xf0]  ;;  %v4151_v20 = vadd.f32 %v4150_v59, %v7217_v40  ;;  %v4186_v49 = vrot.slane %v4165_v61, 4  ;;  %v3616_v28 = vpop.f32.mrf.mxu1 }
 0x264   :  { %3853 = vmatmul.bf16.vlgmr.msrb.gmra.mxu2 %v7033_v43  ;;  %v4981_v21 = vld [vmem:[#allocation2 + $0x518] sm:$0xf]  ;;  %v4470_v24 = vor.u32 %v6405_v13, %v4469_v51  ;;  %v3617_v35 = vadd.f32 %v3616_v28, %v3603_v54  ;;  %v3507_v13 = vadd.f32 %v7200_v55, %v3493_v33 }
 0x265   :  { %3901 = vmatpush.bf16.msra.mxu2 %v5078_v26  ;;  %3874 = vmatpush.bf16.msra.mxu0 %v4534_v27  ;;  %v6533_v38 = vld [vmem:[#allocation2 + $0x534] sm:$0xf0]  ;;  %v4152_v42 = vrot.slane %v4151_v20, 2 }
 0x266   :  { %3867 = vmatmul.bf16.vlgmr.msrb.gmra.mxu3 %v7037_v47  ;;  %v5237_v31 = vld [vmem:[#allocation2 + $0x718] sm:$0xf]  ;;  %v4982_v34 = vor.u32 %v6533_v38, %v4981_v21  ;;  %v3631_v36 = vadd.f32 %v3630_v0, %v3617_v35  ;;  %v3521_v54 = vadd.f32 %v7203_v14, %v3507_v13 }
 0x267   :  { %3915 = vmatpush.bf16.msra.mxu3 %v5334_v25  ;;  %3888 = vmatpush.bf16.msra.mxu1 %v4790_v46  ;;  %v6597_v26 = vld [vmem:[#allocation2 + $0x734] sm:$0xf0]  ;;  %v3577_v25 = vadd.f32 %v3576_v45, %v3563_v4  ;;  %v4187_v46 = vadd.f32 %v4186_v49, %v4165_v61  ;;  %v7233_v45 = vadd.f32 %v4152_v42, %v4151_v20 }
 0x268   :  { %v4437_v57 = vld [vmem:[#allocation2 + $0xd8] sm:$0xf]  ;;  %v5238_v37 = vor.u32 %v6597_v26, %v5237_v31 }
 0x269   :  { %3902 = vmatpush.bf16.msra.mxu2 %v5046_v48  ;;  %3875 = vmatpush.bf16.msra.mxu0 %v4502_v60  ;;  %v6397_v30 = vld [vmem:[#allocation2 + $0xf4] sm:$0xf0]  ;;  %v3591_v22 = vadd.f32 %v3590_v5, %v3577_v25  ;;  %v4188_v4 = vrot.slane %v4187_v46, 2 }
 0x26a   :  { %v4693_v2 = vld [vmem:[#allocation2 + $0x2d8] sm:$0xf]  ;;  %v4438_v56 = vor.u32 %v6397_v30, %v4437_v57 }
 0x26b   :  { %3916 = vmatpush.bf16.msra.mxu3 %v5302_v32  ;;  %3889 = vmatpush.bf16.msra.mxu1 %v4758_v7  ;;  %v6461_v12 = vld [vmem:[#allocation2 + $0x2f4] sm:$0xf0]  ;;  %v3604_v7 = vpop.f32.mrf.mxu0  ;;  %v3618_v28 = vpop.f32.mrf.mxu1 }
 0x26c   :  { %v4949_v41 = vld [vmem:[#allocation2 + $0x4d8] sm:$0xf]  ;;  %v4694_v8 = vor.u32 %v6461_v12, %v4693_v2  ;;  %v3605_v49 = vadd.f32 %v3604_v7, %v3591_v22 }
 0x26d   :  { %3903 = vmatpush.bf16.msra.mxu2 %v5014_v63  ;;  %v6525_v27 = vld [vmem:[#allocation2 + $0x4f4] sm:$0xf0]  ;;  %3876 = vmatpush.bf16.msra.mxu0 %v4470_v24  ;;  %v3644_v63 = vpop.f32.mrf.mxu3 }
 0x26e   :  { %v5205_v48 = vld [vmem:[#allocation2 + $0x6d8] sm:$0xf]  ;;  %v4950_v52 = vor.u32 %v6525_v27, %v4949_v41  ;;  %v3645_v23 = vadd.f32 %v3644_v63, %v3631_v36  ;;  %v4189_v41 = vadd.f32 %v4188_v4, %v4187_v46 }
 0x26f   :  { %3917 = vmatpush.bf16.msra.mxu3 %v5270_v9  ;;  %v6589_v50 = vld [vmem:[#allocation2 + $0x6f4] sm:$0xf0]  ;;  %3890 = vmatpush.bf16.msra.mxu1 %v4726_v29  ;;  %v4154_v29 = vrot.slane %v7233_v45, 1 }
 0x270   :  { %v4405_v32 = vld [vmem:[#allocation2 + $0x98] sm:$0xf]  ;;  %v5206_v62 = vor.u32 %v6589_v50, %v5205_v48  ;;  %v4157_v57 = vrot.slane %v3645_v23, 4  ;;  %v4166_v30 = vmul.f32 %v3645_v23, %v3645_v23 }
 0x271   :  { %3904 = vmatpush.bf16.msra.mxu2 %v4982_v34  ;;  %v6389_v59 = vld [vmem:[#allocation2 + $0xb4] sm:$0xf0]  ;;  %3877 = vmatpush.bf16.msra.mxu0 %v4438_v56  ;;  %v4098_v34 = vpack.c.bf16 %v3645_v23, %v7217_v40  ;;  %v3619_v56 = vadd.f32 %v3618_v28, %v3605_v49  ;;  %v7246_v63 = vadd.f32 %v4154_v29, %v7233_v45 }
 0x272   :  { %v4661_v16 = vld [vmem:[#allocation2 + $0x298] sm:$0xf]  ;;  %v4406_v11 = vor.u32 %v6389_v59, %v4405_v32  ;;  %v4158_v33 = vadd.f32 %v4157_v57, %v3645_v23  ;;  %v4193_v40 = vrot.slane %v4166_v30, 4 }
 0x273   :  { %v6453_v3 = vld [vmem:[#allocation2 + $0x2b4] sm:$0xf0]  ;;  %3918 = vmatpush.bf16.msra.mxu3 %v5238_v37  ;;  %3891 = vmatpush.bf16.msra.mxu1 %v4694_v8  ;;  %4106 = vst [vmem:[%s7358_s3 + $0x8] sm:$0xff] %v4098_v34  ;;  %v4208_v29 = vrot.slane %v7246_v63, 6 }
 0x274   :  { %v4917_v61 = vld [vmem:[#allocation2 + $0x498] sm:$0xf]  ;;  %v4662_v9 = vor.u32 %v6453_v3, %v4661_v16  ;;  %v4159_v0 = vrot.slane %v4158_v33, 2 }
 0x275   :  { %v6517_v60 = vld [vmem:[#allocation2 + $0x4b4] sm:$0xf0]  ;;  %3905 = vmatpush.bf16.msra.mxu2 %v4950_v52  ;;  %3878 = vmatpush.bf16.msra.mxu0 %v4406_v11  ;;  %v3632_v52 = vpop.f32.mrf.mxu2  ;;  %v3646_v4 = vpop.f32.mrf.mxu3 }
 0x276   :  { %v5173_v51 = vld [vmem:[#allocation2 + $0x698] sm:$0xf]  ;;  %v4918_v20 = vor.u32 %v6517_v60, %v4917_v61  ;;  %v4194_v61 = vadd.f32 %v4193_v40, %v4166_v30  ;;  %v3633_v60 = vadd.f32 %v3632_v52, %v3619_v56  ;;  %v4160_v11 = vadd.f32 %v4159_v0, %v4158_v33 }
 0x277   :  { %v6581_v5 = vld [vmem:[#allocation2 + $0x6b4] sm:$0xf0]  ;;  %3919 = vmatpush.bf16.msra.mxu3 %v5206_v62  ;;  %3892 = vmatpush.bf16.msra.mxu1 %v4662_v9  ;;  %v3535_v62 = vadd.f32 %v7207_v18, %v3521_v54 }
 0x278   :  { %v4373_v15 = vld [vmem:[#allocation2 + $0x58] sm:$0xf]  ;;  %v5174_v24 = vor.u32 %v6581_v5, %v5173_v51  ;;  %v4190_v51 = vrot.slane %v4189_v41, 1  ;;  %v4195_v9 = vrot.slane %v4194_v61, 2 }
 0x279   :  { %v6381_v21 = vld [vmem:[#allocation2 + $0x74] sm:$0xf0]  ;;  %3906 = vmatpush.bf16.msra.mxu2 %v4918_v20 }
 0x27a   :  { %v4629_v38 = vld [vmem:[#allocation2 + $0x258] sm:$0xf]  ;;  %v4374_v27 = vor.u32 %v6381_v21, %v4373_v15  ;;  %v3647_v15 = vadd.f32 %v3646_v4, %v3633_v60  ;;  %v4196_v54 = vadd.f32 %v4195_v9, %v4194_v61 }
 0x27b   :  { %v6445_v31 = vld [vmem:[#allocation2 + $0x274] sm:$0xf0]  ;;  %3920 = vmatpush.bf16.msra.mxu3 %v5174_v24  ;;  %v4217_v24 = vlaneseq }
 0x27c   :  { %v4885_v26 = vld [vmem:[#allocation2 + $0x458] sm:$0xf]  ;;  %v4630_v42 = vor.u32 %v6445_v31, %v4629_v38  ;;  %3879 = vmatpush.bf16.msra.mxu0 %v4374_v27  ;;  %v4102_v28 = vpack.c.bf16 %v3647_v15, %v3535_v62 }
 0x27d   :  { %v6509_v53 = vld [vmem:[#allocation2 + $0x474] sm:$0xf0]  ;;  %vm7253_vm3 = vcmp.lt.s32.totalorder %v4217_v24, 512 }
 0x27e   :  { %v5141_v55 = vld [vmem:[#allocation2 + $0x658] sm:$0xf]  ;;  %v4886_v14 = vor.u32 %v6509_v53, %v4885_v26  ;;  %3893 = vmatpush.bf16.msra.mxu1 %v4630_v42  ;;  %v4161_v53 = vrot.slane %v4160_v11, 1  ;;  %4110 = vst [vmem:[%s7358_s3 + $0x28] sm:$0xff] %v4102_v28 }
 0x27f   :  { %v6573_v25 = vld [vmem:[#allocation2 + $0x674] sm:$0xf0] }
 0x280   :  { %v4341_v2 = vld [vmem:[#allocation2 + $0x18] sm:$0xf]  ;;  %v5142_v46 = vor.u32 %v6573_v25, %v5141_v55  ;;  %3907 = vmatpush.bf16.msra.mxu2 %v4886_v14 }
 0x281   :  { %v6373_v37 = vld [vmem:[#allocation2 + $0x34] sm:$0xf0] }
 0x282   :  { %v7239_v12 = vld [vmem:[#allocation2 + $0x218] sm:$0xf]  ;;  %v4342_v5 = vor.u32 %v6373_v37, %v4341_v2  ;;  %3921 = vmatpush.bf16.msra.mxu3 %v5142_v46  ;;  %v4191_v2 = vadd.f32 %v4190_v51, %v4189_v41  ;;  %v4162_v37 = vadd.f32 %v4161_v53, %v4160_v11 }
 0x283   :  { %v6437_v35 = vld [vmem:[#allocation2 + $0x234] sm:$0xf0] }
 0x284   :  { %v4853_v48 = vld [vmem:[#allocation2 + $0x418] sm:$0xf]  ;;  %v4598_v13 = vor.u32 %v6437_v35, %v7239_v12  ;;  %3880 = vmatpush.bf16.msra.mxu0 %v4342_v5  ;;  %v4197_v12 = vrot.slane %v4196_v54, 1  ;;  %v4209_v33 = vrot.slane %v4162_v37, 5 }
 0x285   :  { %v6501_v50 = vld [vmem:[#allocation2 + $0x434] sm:$0xf0] }
 0x286   :  { %v5109_v32 = vld [vmem:[#allocation2 + $0x618] sm:$0xf]  ;;  %v4854_v18 = vor.u32 %v6501_v50, %v4853_v48  ;;  %3894 = vmatpush.bf16.msra.mxu1 %v4598_v13  ;;  %v4198_v50 = vadd.f32 %v4197_v12, %v4196_v54 }
 0x287   :  { %v6565_v22 = vld [vmem:[#allocation2 + $0x634] sm:$0xf0]  ;;  %3881 = vmatmul.bf16.vlgmr.msra.gmra.mxu0 %v6980_v58 }
 0x288   :  { %v5589_v8 = vld [vmem:[#allocation2 + $0x9d8] sm:$0xf]  ;;  %v5110_v49 = vor.u32 %v6565_v22, %v5109_v32  ;;  %3908 = vmatpush.bf16.msra.mxu2 %v4854_v18 }
 0x289   :  { %v6685_v59 = vld [vmem:[#allocation2 + $0x9f4] sm:$0xf0]  ;;  %3895 = vmatmul.bf16.vlgmr.msra.gmra.mxu1 %v6998_v10 }
 0x28a   :  { %v5845_v16 = vld [vmem:[#allocation2 + $0xbd8] sm:$0xf]  ;;  %v5590_v23 = vor.u32 %v6685_v59, %v5589_v8  ;;  %3922 = vmatpush.bf16.msra.mxu3 %v5110_v49  ;;  %v4227_v59 = vrot.slane %v4191_v2, 6 }
 0x28b   :  { %v6749_v3 = vld [vmem:[#allocation2 + $0xbf4] sm:$0xf0]  ;;  %3909 = vmatmul.bf16.vlgmr.msra.gmra.mxu2 %v6985_v1 }
 0x28c   :  { %v6101_v36 = vld [vmem:[#allocation2 + $0xdd8] sm:$0xf]  ;;  %v5846_v20 = vor.u32 %v6749_v3, %v5845_v16  ;;  %3929 = vmatpush.bf16.msrb.mxu0 %v5590_v23  ;;  %v4213_v16 = vsel %vm4212_vm1, %v4208_v29, %v4209_v33  ;;  %v4228_v3 = vrot.slane %v4198_v50, 5 }
 0x28d   :  { %v6813_v7 = vld [vmem:[#allocation2 + $0xdf4] sm:$0xf0]  ;;  %v4215_v61 = vsel %vm4214_vm2, %v7150_v19, %v4213_v16  ;;  %3923 = vmatmul.bf16.vlgmr.msra.gmra.mxu3 %v7003_v17 }
 0x28e   :  { %v6357_v21 = vld [vmem:[#allocation2 + $0xfd8] sm:$0xf]  ;;  %v6102_v31 = vor.u32 %v6813_v7, %v6101_v36  ;;  %3943 = vmatpush.bf16.msrb.mxu1 %v5846_v20  ;;  %4221 = vst.msk [vmem:[%s7359_s4] ss:$2 sm:$0xf] %vm7253_vm3, %v4215_v61  ;;  %v4230_v63 = vsel %vm4212_vm1, %v4227_v59, %v4228_v3 }
 0x28f   :  { %v6877_v38 = vld [vmem:[#allocation2 + $0xff4] sm:$0xf0]  ;;  %v4231_v13 = vsel %vm4214_vm2, %v7156_v6, %v4230_v63 }
 0x290   :  { %v5557_v45 = vld [vmem:[#allocation2 + $0x998] sm:$0xf]  ;;  %v6358_v34 = vor.u32 %v6877_v38, %v6357_v21  ;;  %3957 = vmatpush.bf16.msrb.mxu2 %v6102_v31  ;;  %6363 = vst.msk [vmem:[%s7359_s4 + $0x1] ss:$2 sm:$0xf] %vm7253_vm3, %v4231_v13 }
 0x291   :  { %v6677_v26 = vld [vmem:[#allocation2 + $0x9b4] sm:$0xf0]  ;;  %v6489_v13 = vld [vmem:[#allocation2 + $0x3dc] sm:$0xf] }
 0x292   :  { %v5813_v55 = vld [vmem:[#allocation2 + $0xb98] sm:$0xf]  ;;  %v5558_v14 = vor.u32 %v6677_v26, %v5557_v45  ;;  %3971 = vmatpush.bf16.msrb.mxu3 %v6358_v34 }
 0x293   :  { %v6741_v25 = vld [vmem:[#allocation2 + $0xbb4] sm:$0xf0] }
 0x294   :  { %v6069_v57 = vld [vmem:[#allocation2 + $0xd98] sm:$0xf]  ;;  %v5814_v35 = vor.u32 %v6741_v25, %v5813_v55  ;;  %3930 = vmatpush.bf16.msrb.mxu0 %v5558_v14 }
 0x295   :  { %v6805_v30 = vld [vmem:[#allocation2 + $0xdb4] sm:$0xf0] }
 0x296   :  { %v6325_v27 = vld [vmem:[#allocation2 + $0xf98] sm:$0xf]  ;;  %v6070_v40 = vor.u32 %v6805_v30, %v6069_v57  ;;  %3944 = vmatpush.bf16.msrb.mxu1 %v5814_v35 }
 0x297   :  { %v6869_v42 = vld [vmem:[#allocation2 + $0xfb4] sm:$0xf0] }
 0x298   :  { %v5525_v48 = vld [vmem:[#allocation2 + $0x958] sm:$0xf]  ;;  %v6326_v22 = vor.u32 %v6869_v42, %v6325_v27  ;;  %3958 = vmatpush.bf16.msrb.mxu2 %v6070_v40 }
 0x299   :  { %v6669_v56 = vld [vmem:[#allocation2 + $0x974] sm:$0xf0] }
 0x29a   :  { %v5781_v32 = vld [vmem:[#allocation2 + $0xb58] sm:$0xf]  ;;  %v5526_v60 = vor.u32 %v6669_v56, %v5525_v48  ;;  %3972 = vmatpush.bf16.msrb.mxu3 %v6326_v22 }
 0x29b   :  { %v6733_v8 = vld [vmem:[#allocation2 + $0xb74] sm:$0xf0] }
 0x29c   :  { %v6037_v46 = vld [vmem:[#allocation2 + $0xd58] sm:$0xf]  ;;  %v5782_v51 = vor.u32 %v6733_v8, %v5781_v32  ;;  %3931 = vmatpush.bf16.msrb.mxu0 %v5526_v60 }
 0x29d   :  { %v6797_v52 = vld [vmem:[#allocation2 + $0xd74] sm:$0xf0] }
 0x29e   :  { %v6293_v62 = vld [vmem:[#allocation2 + $0xf58] sm:$0xf]  ;;  %v6038_v5 = vor.u32 %v6797_v52, %v6037_v46  ;;  %3945 = vmatpush.bf16.msrb.mxu1 %v5782_v51 }
 0x29f   :  { %v6861_v0 = vld [vmem:[#allocation2 + $0xf74] sm:$0xf0] }
 0x2a0   :  { %v5493_v4 = vld [vmem:[#allocation2 + $0x918] sm:$0xf]  ;;  %v6294_v11 = vor.u32 %v6861_v0, %v6293_v62  ;;  %3959 = vmatpush.bf16.msrb.mxu2 %v6038_v5  ;;  %v6425_v5 = vld [vmem:[#allocation2 + $0x1dc] sm:$0xf] }
 0x2a1   :  { %v6661_v36 = vld [vmem:[#allocation2 + $0x934] sm:$0xf0] }
 0x2a2   :  { %v5749_v7 = vld [vmem:[#allocation2 + $0xb18] sm:$0xf]  ;;  %v5494_v38 = vor.u32 %v6661_v36, %v5493_v4  ;;  %3973 = vmatpush.bf16.msrb.mxu3 %v6294_v11 }
 0x2a3   :  { %v6725_v19 = vld [vmem:[#allocation2 + $0xb34] sm:$0xf0] }
 0x2a4   :  { %v6005_v9 = vld [vmem:[#allocation2 + $0xd18] sm:$0xf]  ;;  %v5750_v49 = vor.u32 %v6725_v19, %v5749_v7  ;;  %3932 = vmatpush.bf16.msrb.mxu0 %v5494_v38  ;;  %v4567_v19 = vld [vmem:[#allocation2 + $0x1f8] sm:$0xf0] }
 0x2a5   :  { %v6789_v15 = vld [vmem:[#allocation2 + $0xd34] sm:$0xf0] }
 0x2a6   :  { %v6261_v18 = vld [vmem:[#allocation2 + $0xf18] sm:$0xf]  ;;  %v6006_v23 = vor.u32 %v6789_v15, %v6005_v9  ;;  %3946 = vmatpush.bf16.msrb.mxu1 %v5750_v49  ;;  %v4823_v9 = vld [vmem:[#allocation2 + $0x3f8] sm:$0xf0] }
 0x2a7   :  { %v6853_v21 = vld [vmem:[#allocation2 + $0xf34] sm:$0xf0]  ;;  %v6553_v15 = vld [vmem:[#allocation2 + $0x5dc] sm:$0xf] }
 0x2a8   :  { %v5461_v20 = vld [vmem:[#allocation2 + $0x8d8] sm:$0xf]  ;;  %v6262_v45 = vor.u32 %v6853_v21, %v6261_v18  ;;  %3960 = vmatpush.bf16.msrb.mxu2 %v6006_v23  ;;  %v5079_v18 = vld [vmem:[#allocation2 + $0x5f8] sm:$0xf0] }
 0x2a9   :  { %v6653_v6 = vld [vmem:[#allocation2 + $0x8f4] sm:$0xf0]  ;;  %v6617_v49 = vld [vmem:[#allocation2 + $0x7dc] sm:$0xf] }
 0x2aa   :  { %v5717_v31 = vld [vmem:[#allocation2 + $0xad8] sm:$0xf]  ;;  %v5462_v55 = vor.u32 %v6653_v6, %v5461_v20  ;;  %3974 = vmatpush.bf16.msrb.mxu3 %v6262_v45  ;;  %v5335_v23 = vld [vmem:[#allocation2 + $0x7f8] sm:$0xf0]  ;;  %v4570_v6 = vor.u32 %v6425_v5, %v4567_v19  ;;  %v5082_v45 = vor.u32 %v6553_v15, %v5079_v18 }
 0x2ab   :  { %v6717_v26 = vld [vmem:[#allocation2 + $0xaf4] sm:$0xf0]  ;;  %v4695_v19 = vld [vmem:[#allocation2 + $0x2f8] sm:$0xf0] }
 0x2ac   :  { %v5973_v53 = vld [vmem:[#allocation2 + $0xcd8] sm:$0xf]  ;;  %v5718_v25 = vor.u32 %v6717_v26, %v5717_v31  ;;  %3933 = vmatpush.bf16.msrb.mxu0 %v5462_v55  ;;  %v4826_v31 = vor.u32 %v6489_v13, %v4823_v9  ;;  %v6417_v26 = vld [vmem:[#allocation2 + $0x19c] sm:$0xf] }
 0x2ad   :  { %v6781_v54 = vld [vmem:[#allocation2 + $0xcf4] sm:$0xf0]  ;;  %v6545_v55 = vld [vmem:[#allocation2 + $0x59c] sm:$0xf] }
 0x2ae   :  { %v6229_v24 = vld [vmem:[#allocation2 + $0xed8] sm:$0xf]  ;;  %v5974_v29 = vor.u32 %v6781_v54, %v5973_v53  ;;  %3947 = vmatpush.bf16.msrb.mxu1 %v5718_v25  ;;  %v4535_v53 = vld [vmem:[#allocation2 + $0x1b8] sm:$0xf0] }
 0x2af   :  { %v6845_v28 = vld [vmem:[#allocation2 + $0xef4] sm:$0xf0]  ;;  %v6481_v54 = vld [vmem:[#allocation2 + $0x39c] sm:$0xf] }
 0x2b0   :  { %v5429_v34 = vld [vmem:[#allocation2 + $0x898] sm:$0xf]  ;;  %v6230_v2 = vor.u32 %v6845_v28, %v6229_v24  ;;  %3961 = vmatpush.bf16.msrb.mxu2 %v5974_v29  ;;  %v5338_v24 = vor.u32 %v6617_v49, %v5335_v23  ;;  %v4791_v28 = vld [vmem:[#allocation2 + $0x3b8] sm:$0xf0] }
 0x2b1   :  { %v6645_v57 = vld [vmem:[#allocation2 + $0x8b4] sm:$0xf0]  ;;  %v5047_v25 = vld [vmem:[#allocation2 + $0x5b8] sm:$0xf0] }
 0x2b2   :  { %v5685_v30 = vld [vmem:[#allocation2 + $0xa98] sm:$0xf]  ;;  %v5430_v35 = vor.u32 %v6645_v57, %v5429_v34  ;;  %3975 = vmatpush.bf16.msrb.mxu3 %v6230_v2  ;;  %v6609_v29 = vld [vmem:[#allocation2 + $0x79c] sm:$0xf]  ;;  %v4538_v57 = vor.u32 %v6417_v26, %v4535_v53  ;;  %v5050_v2 = vor.u32 %v6545_v55, %v5047_v25  ;;  %v7287_v55 = vpop.f32.mrf.mxu3 }
 0x2b3   :  { %v6709_v37 = vld [vmem:[#allocation2 + $0xab4] sm:$0xf0]  ;;  %v5303_v34 = vld [vmem:[#allocation2 + $0x7b8] sm:$0xf0] }
 0x2b4   :  { %v5941_v12 = vld [vmem:[#allocation2 + $0xc98] sm:$0xf]  ;;  %v5686_v48 = vor.u32 %v6709_v37, %v5685_v30  ;;  %3934 = vmatpush.bf16.msrb.mxu0 %v5430_v35  ;;  %v4794_v30 = vor.u32 %v6481_v54, %v4791_v28  ;;  %v6409_v37 = vld [vmem:[#allocation2 + $0x15c] sm:$0xf] }
 0x2b5   :  { %v6773_v27 = vld [vmem:[#allocation2 + $0xcb4] sm:$0xf0]  ;;  %v6537_v35 = vld [vmem:[#allocation2 + $0x55c] sm:$0xf] }
 0x2b6   :  { %v6197_v42 = vld [vmem:[#allocation2 + $0xe98] sm:$0xf]  ;;  %v5942_v50 = vor.u32 %v6773_v27, %v5941_v12  ;;  %3948 = vmatpush.bf16.msrb.mxu1 %v5686_v48  ;;  %v4503_v12 = vld [vmem:[#allocation2 + $0x178] sm:$0xf0] }
 0x2b7   :  { %v6837_v14 = vld [vmem:[#allocation2 + $0xeb4] sm:$0xf0]  ;;  %v6473_v27 = vld [vmem:[#allocation2 + $0x35c] sm:$0xf] }
 0x2b8   :  { %v5397_v33 = vld [vmem:[#allocation2 + $0x858] sm:$0xf]  ;;  %v6198_v56 = vor.u32 %v6837_v14, %v6197_v42  ;;  %3962 = vmatpush.bf16.msrb.mxu2 %v5942_v50  ;;  %v5306_v42 = vor.u32 %v6609_v29, %v5303_v34  ;;  %v4759_v14 = vld [vmem:[#allocation2 + $0x378] sm:$0xf0] }
 0x2b9   :  { %v6637_v41 = vld [vmem:[#allocation2 + $0x874] sm:$0xf0]  ;;  %v5015_v48 = vld [vmem:[#allocation2 + $0x578] sm:$0xf0] }
 0x2ba   :  { %v5653_v40 = vld [vmem:[#allocation2 + $0xa58] sm:$0xf]  ;;  %v5398_v59 = vor.u32 %v6637_v41, %v5397_v33  ;;  %3976 = vmatpush.bf16.msrb.mxu3 %v6198_v56  ;;  %v6601_v50 = vld [vmem:[#allocation2 + $0x75c] sm:$0xf]  ;;  %v4506_v41 = vor.u32 %v6409_v37, %v4503_v12  ;;  %v5018_v56 = vor.u32 %v6537_v35, %v5015_v48 }
 0x2bb   :  { %v6701_v32 = vld [vmem:[#allocation2 + $0xa74] sm:$0xf0]  ;;  %v5271_v33 = vld [vmem:[#allocation2 + $0x778] sm:$0xf0] }
 0x2bc   :  { %v5909_v22 = vld [vmem:[#allocation2 + $0xc58] sm:$0xf]  ;;  %v5654_v62 = vor.u32 %v6701_v32, %v5653_v40  ;;  %3935 = vmatpush.bf16.msrb.mxu0 %v5398_v59  ;;  %v4762_v40 = vor.u32 %v6473_v27, %v4759_v14  ;;  %v6401_v32 = vld [vmem:[#allocation2 + $0x11c] sm:$0xf] }
 0x2bd   :  { %v6765_v8 = vld [vmem:[#allocation2 + $0xc74] sm:$0xf0]  ;;  %v6529_v59 = vld [vmem:[#allocation2 + $0x51c] sm:$0xf] }
 0x2be   :  { %v6165_v46 = vld [vmem:[#allocation2 + $0xe58] sm:$0xf]  ;;  %v5910_v0 = vor.u32 %v6765_v8, %v5909_v22  ;;  %3949 = vmatpush.bf16.msrb.mxu1 %v5654_v62  ;;  %v4471_v22 = vld [vmem:[#allocation2 + $0x138] sm:$0xf0] }
 0x2bf   :  { %v6829_v52 = vld [vmem:[#allocation2 + $0xe74] sm:$0xf0]  ;;  %v6465_v8 = vld [vmem:[#allocation2 + $0x31c] sm:$0xf] }
 0x2c0   :  { %v5365_v16 = vld [vmem:[#allocation2 + $0x818] sm:$0xf]  ;;  %v6166_v36 = vor.u32 %v6829_v52, %v6165_v46  ;;  %3963 = vmatpush.bf16.msrb.mxu2 %v5910_v0  ;;  %v5274_v46 = vor.u32 %v6601_v50, %v5271_v33  ;;  %v4727_v52 = vld [vmem:[#allocation2 + $0x338] sm:$0xf0]  ;;  %v4474_v0 = vor.u32 %v6401_v32, %v4471_v22 }
 0x2c1   :  { %v6629_v3 = vld [vmem:[#allocation2 + $0x834] sm:$0xf0]  ;;  %v5239_v62 = vld [vmem:[#allocation2 + $0x738] sm:$0xf0] }
 0x2c2   :  { %v5621_v61 = vld [vmem:[#allocation2 + $0xa18] sm:$0xf]  ;;  %v5366_v11 = vor.u32 %v6629_v3, %v5365_v16  ;;  %3977 = vmatpush.bf16.msrb.mxu3 %v6166_v36  ;;  %v4983_v16 = vld [vmem:[#allocation2 + $0x538] sm:$0xf0] }
 0x2c3   :  { %v6693_v60 = vld [vmem:[#allocation2 + $0xa34] sm:$0xf0]  ;;  %v6593_v3 = vld [vmem:[#allocation2 + $0x71c] sm:$0xf] }
 0x2c4   :  { %v5877_v4 = vld [vmem:[#allocation2 + $0xc18] sm:$0xf]  ;;  %v5622_v21 = vor.u32 %v6693_v60, %v5621_v61  ;;  %3936 = vmatpush.bf16.msrb.mxu0 %v5366_v11  ;;  %v7281_v61 = vpop.f32.mrf.mxu0  ;;  %v4730_v60 = vor.u32 %v6465_v8, %v4727_v52  ;;  %v6393_v36 = vld [vmem:[#allocation2 + $0xdc] sm:$0xf]  ;;  %v5242_v5 = vor.u32 %v6593_v3, %v5239_v62 }
 0x2c5   :  { %v6757_v7 = vld [vmem:[#allocation2 + $0xc34] sm:$0xf0]  ;;  %v6521_v13 = vld [vmem:[#allocation2 + $0x4dc] sm:$0xf] }
 0x2c6   :  { %v6133_v63 = vld [vmem:[#allocation2 + $0xe18] sm:$0xf]  ;;  %v5878_v38 = vor.u32 %v6757_v7, %v5877_v4  ;;  %3950 = vmatpush.bf16.msrb.mxu1 %v5622_v21  ;;  %v4986_v4 = vor.u32 %v6529_v59, %v4983_v16  ;;  %v4439_v7 = vld [vmem:[#allocation2 + $0xf8] sm:$0xf0] }
 0x2c7   :  { %v6821_v51 = vld [vmem:[#allocation2 + $0xe34] sm:$0xf0]  ;;  %3937 = vmatmul.bf16.vlgmr.msrb.gmra.mxu0 %v7031_v39  ;;  %v4951_v11 = vld [vmem:[#allocation2 + $0x4f8] sm:$0xf0]  ;;  %v4442_v18 = vor.u32 %v6393_v36, %v4439_v7 }
 0x2c8   :  { %v6134_v20 = vor.u32 %v6821_v51, %v6133_v63  ;;  %3964 = vmatpush.bf16.msrb.mxu2 %v5878_v38  ;;  %3985 = vmatpush.bf16.msra.mxu0 %v4570_v6  ;;  %v6457_v63 = vld [vmem:[#allocation2 + $0x2dc] sm:$0xf]  ;;  %v7283_v51 = vpop.f32.mrf.mxu1  ;;  %v4954_v38 = vor.u32 %v6521_v13, %v4951_v11 }
 0x2c9   :  { %3951 = vmatmul.bf16.vlgmr.msrb.gmra.mxu1 %v7035_v44  ;;  %v6585_v9 = vld [vmem:[#allocation2 + $0x6dc] sm:$0xf]  ;;  %v4698_v21 = vor.u32 %v6457_v63, %v4695_v19 }
 0x2ca   :  { %3978 = vmatpush.bf16.msrb.mxu3 %v6134_v20  ;;  %3999 = vmatpush.bf16.msra.mxu1 %v4826_v31  ;;  %v5207_v15 = vld [vmem:[#allocation2 + $0x6f8] sm:$0xf0] }
 0x2cb   :  { %3965 = vmatmul.bf16.vlgmr.msrb.gmra.mxu2 %v7033_v43  ;;  %v6385_v49 = vld [vmem:[#allocation2 + $0x9c] sm:$0xf]  ;;  %v5210_v6 = vor.u32 %v6585_v9, %v5207_v15 }
 0x2cc   :  { %4013 = vmatpush.bf16.msra.mxu2 %v5082_v45  ;;  %3986 = vmatpush.bf16.msra.mxu0 %v4538_v57  ;;  %v4407_v23 = vld [vmem:[#allocation2 + $0xb8] sm:$0xf0] }
 0x2cd   :  { %3979 = vmatmul.bf16.vlgmr.msrb.gmra.mxu3 %v7037_v47  ;;  %v6449_v20 = vld [vmem:[#allocation2 + $0x29c] sm:$0xf]  ;;  %v4410_v28 = vor.u32 %v6385_v49, %v4407_v23 }
 0x2ce   :  { %4027 = vmatpush.bf16.msra.mxu3 %v5338_v24  ;;  %4000 = vmatpush.bf16.msra.mxu1 %v4794_v30  ;;  %v4663_v31 = vld [vmem:[#allocation2 + $0x2b8] sm:$0xf0]  ;;  %v7285_v24 = vpop.f32.mrf.mxu2 }
 0x2cf   :  { %v6513_v45 = vld [vmem:[#allocation2 + $0x49c] sm:$0xf]  ;;  %v4666_v25 = vor.u32 %v6449_v20, %v4663_v31 }
 0x2d0   :  { %4014 = vmatpush.bf16.msra.mxu2 %v5050_v2  ;;  %3987 = vmatpush.bf16.msra.mxu0 %v4506_v41  ;;  %v4919_v26 = vld [vmem:[#allocation2 + $0x4b8] sm:$0xf0]  ;;  %v7291_v48 = vpop.f32.mrf.mxu1 }
 0x2d1   :  { %v6577_v53 = vld [vmem:[#allocation2 + $0x69c] sm:$0xf]  ;;  %v4922_v29 = vor.u32 %v6513_v45, %v4919_v26 }
 0x2d2   :  { %4028 = vmatpush.bf16.msra.mxu3 %v5306_v42  ;;  %4001 = vmatpush.bf16.msra.mxu1 %v4762_v40  ;;  %v5175_v54 = vld [vmem:[#allocation2 + $0x6b8] sm:$0xf0]  ;;  %v7289_v42 = vpop.f32.mrf.mxu0 }
 0x2d3   :  { %v6377_v34 = vld [vmem:[#allocation2 + $0x5c] sm:$0xf]  ;;  %v5178_v2 = vor.u32 %v6577_v53, %v5175_v54 }
 0x2d4   :  { %4015 = vmatpush.bf16.msra.mxu2 %v5018_v56  ;;  %3988 = vmatpush.bf16.msra.mxu0 %v4474_v0  ;;  %v4375_v57 = vld [vmem:[#allocation2 + $0x78] sm:$0xf0] }
 0x2d5   :  { %v6441_v30 = vld [vmem:[#allocation2 + $0x25c] sm:$0xf]  ;;  %v4378_v50 = vor.u32 %v6377_v34, %v4375_v57 }
 0x2d6   :  { %4029 = vmatpush.bf16.msra.mxu3 %v5274_v46  ;;  %4002 = vmatpush.bf16.msra.mxu1 %v4730_v60  ;;  %v4631_v37 = vld [vmem:[#allocation2 + $0x278] sm:$0xf0]  ;;  %v7293_v11 = vpop.f32.mrf.mxu2 }
 0x2d7   :  { %v6505_v12 = vld [vmem:[#allocation2 + $0x45c] sm:$0xf]  ;;  %v4634_v40 = vor.u32 %v6441_v30, %v4631_v37 }
 0x2d8   :  { %4016 = vmatpush.bf16.msra.mxu2 %v4986_v4  ;;  %3989 = vmatpush.bf16.msra.mxu0 %v4442_v18  ;;  %v4887_v27 = vld [vmem:[#allocation2 + $0x478] sm:$0xf0]  ;;  %v7295_v18 = vpop.f32.mrf.mxu3 }
 0x2d9   :  { %v6569_v14 = vld [vmem:[#allocation2 + $0x65c] sm:$0xf]  ;;  %v4890_v56 = vor.u32 %v6505_v12, %v4887_v27 }
 0x2da   :  { %4030 = vmatpush.bf16.msra.mxu3 %v5242_v5  ;;  %4003 = vmatpush.bf16.msra.mxu1 %v4698_v21  ;;  %v5143_v35 = vld [vmem:[#allocation2 + $0x678] sm:$0xf0]  ;;  %v7297_v53 = vpop.f32.mrf.mxu0 }
 0x2db   :  { %v6369_v33 = vld [vmem:[#allocation2 + $0x1c] sm:$0xf]  ;;  %v5146_v46 = vor.u32 %v6569_v14, %v5143_v35 }
 0x2dc   :  { %4017 = vmatpush.bf16.msra.mxu2 %v4954_v38  ;;  %3990 = vmatpush.bf16.msra.mxu0 %v4410_v28  ;;  %v4343_v41 = vld [vmem:[#allocation2 + $0x38] sm:$0xf0] }
 0x2dd   :  { %v6433_v32 = vld [vmem:[#allocation2 + $0x21c] sm:$0xf]  ;;  %v4346_v60 = vor.u32 %v6369_v33, %v4343_v41 }
 0x2de   :  { %4031 = vmatpush.bf16.msra.mxu3 %v5210_v6  ;;  %4004 = vmatpush.bf16.msra.mxu1 %v4666_v25  ;;  %v4599_v22 = vld [vmem:[#allocation2 + $0x238] sm:$0xf0]  ;;  %v7299_v25 = vpop.f32.mrf.mxu1 }
 0x2df   :  { %v6497_v8 = vld [vmem:[#allocation2 + $0x41c] sm:$0xf]  ;;  %v4602_v63 = vor.u32 %v6433_v32, %v4599_v22 }
 0x2e0   :  { %4018 = vmatpush.bf16.msra.mxu2 %v4922_v29  ;;  %v4855_v52 = vld [vmem:[#allocation2 + $0x438] sm:$0xf0]  ;;  %3991 = vmatpush.bf16.msra.mxu0 %v4378_v50 }
 0x2e1   :  { %v6561_v59 = vld [vmem:[#allocation2 + $0x61c] sm:$0xf]  ;;  %v4858_v5 = vor.u32 %v6497_v8, %v4855_v52  ;;  %v7305_v8 = vpop.f32.mrf.mxu2 }
 0x2e2   :  { %4032 = vmatpush.bf16.msra.mxu3 %v5178_v2  ;;  %v5111_v16 = vld [vmem:[#allocation2 + $0x638] sm:$0xf0]  ;;  %4005 = vmatpush.bf16.msra.mxu1 %v4634_v40 }
 0x2e3   :  { %v6681_v3 = vld [vmem:[#allocation2 + $0x9dc] sm:$0xf]  ;;  %v5114_v9 = vor.u32 %v6561_v59, %v5111_v16  ;;  %v7307_v16 = vpop.f32.mrf.mxu3 }
 0x2e4   :  { %v5591_v62 = vld [vmem:[#allocation2 + $0x9f8] sm:$0xf0]  ;;  %4019 = vmatpush.bf16.msra.mxu2 %v4890_v56  ;;  %3992 = vmatpush.bf16.msra.mxu0 %v4346_v60 }
 0x2e5   :  { %v6745_v0 = vld [vmem:[#allocation2 + $0xbdc] sm:$0xf]  ;;  %v5594_v15 = vor.u32 %v6681_v3, %v5591_v62  ;;  %v7309_v62 = vpop.f32.mrf.mxu0 }
 0x2e6   :  { %v5847_v4 = vld [vmem:[#allocation2 + $0xbf8] sm:$0xf0]  ;;  %4033 = vmatpush.bf16.msra.mxu3 %v5146_v46  ;;  %4006 = vmatpush.bf16.msra.mxu1 %v4602_v63  ;;  %v7311_v63 = vpop.f32.mrf.mxu1 }
 0x2e7   :  { %v6809_v36 = vld [vmem:[#allocation2 + $0xddc] sm:$0xf]  ;;  %v5850_v21 = vor.u32 %v6745_v0, %v5847_v4  ;;  %3993 = vmatmul.bf16.vlgmr.msra.gmra.mxu0 %v6980_v58 }
 0x2e8   :  { %v6103_v7 = vld [vmem:[#allocation2 + $0xdf8] sm:$0xf0]  ;;  %4020 = vmatpush.bf16.msra.mxu2 %v4858_v5  ;;  %4041 = vmatpush.bf16.msrb.mxu0 %v5594_v15 }
 0x2e9   :  { %v6873_v19 = vld [vmem:[#allocation2 + $0xfdc] sm:$0xf]  ;;  %v6106_v38 = vor.u32 %v6809_v36, %v6103_v7  ;;  %4007 = vmatmul.bf16.vlgmr.msra.gmra.mxu1 %v6998_v10 }
 0x2ea   :  { %v6359_v13 = vld [vmem:[#allocation2 + $0xff8] sm:$0xf0]  ;;  %4034 = vmatpush.bf16.msra.mxu3 %v5114_v9  ;;  %4055 = vmatpush.bf16.msrb.mxu1 %v5850_v21 }
 0x2eb   :  { %v6673_v49 = vld [vmem:[#allocation2 + $0x99c] sm:$0xf]  ;;  %v6362_v6 = vor.u32 %v6873_v19, %v6359_v13  ;;  %4021 = vmatmul.bf16.vlgmr.msra.gmra.mxu2 %v6985_v1 }
 0x2ec   :  { %v5559_v23 = vld [vmem:[#allocation2 + $0x9b8] sm:$0xf0]  ;;  %4069 = vmatpush.bf16.msrb.mxu2 %v6106_v38 }
 0x2ed   :  { %v6737_v20 = vld [vmem:[#allocation2 + $0xb9c] sm:$0xf]  ;;  %v5562_v29 = vor.u32 %v6673_v49, %v5559_v23  ;;  %4035 = vmatmul.bf16.vlgmr.msra.gmra.mxu3 %v7003_v17 }
 0x2ee   :  { %v5815_v31 = vld [vmem:[#allocation2 + $0xbb8] sm:$0xf0]  ;;  %4083 = vmatpush.bf16.msrb.mxu3 %v6362_v6 }
 0x2ef   :  { %v6801_v45 = vld [vmem:[#allocation2 + $0xd9c] sm:$0xf]  ;;  %v5818_v34 = vor.u32 %v6737_v20, %v5815_v31  ;;  %4042 = vmatpush.bf16.msrb.mxu0 %v5562_v29  ;;  %v7313_v29 = vld [vmem:[#allocation4] sm:$0xff] }
 0x2f0   :  { %v6071_v26 = vld [vmem:[#allocation2 + $0xdb8] sm:$0xf0] }
 0x2f1   :  { %v6865_v54 = vld [vmem:[#allocation2 + $0xf9c] sm:$0xf]  ;;  %v6074_v57 = vor.u32 %v6801_v45, %v6071_v26  ;;  %4056 = vmatpush.bf16.msrb.mxu1 %v5818_v34  ;;  %v629_v34 = vperm.slane %v7313_v29, 4 }
 0x2f2   :  { %v6327_v28 = vld [vmem:[#allocation2 + $0xfb8] sm:$0xf0] }
 0x2f3   :  { %v6665_v30 = vld [vmem:[#allocation2 + $0x95c] sm:$0xf]  ;;  %v6330_v12 = vor.u32 %v6865_v54, %v6327_v28  ;;  %4070 = vmatpush.bf16.msrb.mxu2 %v6074_v57 }
 0x2f4   :  { %v5527_v2 = vld [vmem:[#allocation2 + $0x978] sm:$0xf0] }
 0x2f5   :  { %v6729_v37 = vld [vmem:[#allocation2 + $0xb5c] sm:$0xf]  ;;  %v5530_v41 = vor.u32 %v6665_v30, %v5527_v2  ;;  %4084 = vmatpush.bf16.msrb.mxu3 %v6330_v12  ;;  %v7316_v2 = vpop.f32.mrf.mxu2  ;;  %v630_v12 = vperm.slane %v7313_v29, 5 }
 0x2f6   :  { %v5783_v27 = vld [vmem:[#allocation2 + $0xb78] sm:$0xf0] }
 0x2f7   :  { %v6793_v14 = vld [vmem:[#allocation2 + $0xd5c] sm:$0xf]  ;;  %v5786_v40 = vor.u32 %v6729_v37, %v5783_v27  ;;  %4043 = vmatpush.bf16.msrb.mxu0 %v5530_v41  ;;  %v7319_v27 = vpop.f32.mrf.mxu3 }
 0x2f8   :  { %v6039_v35 = vld [vmem:[#allocation2 + $0xd78] sm:$0xf0] }
 0x2f9   :  { %v6857_v50 = vld [vmem:[#allocation2 + $0xf5c] sm:$0xf]  ;;  %v6042_v56 = vor.u32 %v6793_v14, %v6039_v35  ;;  %4057 = vmatpush.bf16.msrb.mxu1 %v5786_v40 }
 0x2fa   :  { %v6295_v33 = vld [vmem:[#allocation2 + $0xf78] sm:$0xf0] }
 0x2fb   :  { %v6657_v32 = vld [vmem:[#allocation2 + $0x91c] sm:$0xf]  ;;  %v6298_v46 = vor.u32 %v6857_v50, %v6295_v33  ;;  %4071 = vmatpush.bf16.msrb.mxu2 %v6042_v56  ;;  %v3770_v50 = vpop.f32.mrf.mxu0 }
 0x2fc   :  { %v5495_v22 = vld [vmem:[#allocation2 + $0x938] sm:$0xf0] }
 0x2fd   :  { %v6721_v1 = vld [vmem:[#allocation2 + $0xb1c] sm:$0xf]  ;;  %v5498_v10 = vor.u32 %v6657_v32, %v5495_v22  ;;  %4085 = vmatpush.bf16.msrb.mxu3 %v6298_v46  ;;  %v3784_v46 = vpop.f32.mrf.mxu1 }
 0x2fe   :  { %v5751_v52 = vld [vmem:[#allocation2 + $0xb38] sm:$0xf0] }
 0x2ff   :  { %v6785_v59 = vld [vmem:[#allocation2 + $0xd1c] sm:$0xf]  ;;  %v5754_v0 = vor.u32 %v6721_v1, %v5751_v52  ;;  %4044 = vmatpush.bf16.msrb.mxu0 %v5498_v10  ;;  %v3659_v52 = vadd.f32 %v7281_v61, %v629_v34 }
 0x300   :  { %v6007_v58 = vld [vmem:[#allocation2 + $0xd38] sm:$0xf0] }
 0x301   :  { %v6849_v17 = vld [vmem:[#allocation2 + $0xf1c] sm:$0xf]  ;;  %v6010_v60 = vor.u32 %v6785_v59, %v6007_v58  ;;  %4058 = vmatpush.bf16.msrb.mxu1 %v5754_v0 }
 0x302   :  { %v6263_v3 = vld [vmem:[#allocation2 + $0xf38] sm:$0xf0] }
 0x303   :  { %v6649_v4 = vld [vmem:[#allocation2 + $0x8dc] sm:$0xf]  ;;  %v6266_v5 = vor.u32 %v6849_v17, %v6263_v3  ;;  %4072 = vmatpush.bf16.msrb.mxu2 %v6010_v60 }
 0x304   :  { %v5463_v36 = vld [vmem:[#allocation2 + $0x8f8] sm:$0xf0] }
 0x305   :  { %v6713_v7 = vld [vmem:[#allocation2 + $0xadc] sm:$0xf]  ;;  %v5466_v38 = vor.u32 %v6649_v4, %v5463_v36  ;;  %4086 = vmatpush.bf16.msrb.mxu3 %v6266_v5  ;;  %v3771_v36 = vadd.f32 %v3770_v50, %v630_v12 }
 0x306   :  { %v5719_v19 = vld [vmem:[#allocation2 + $0xaf8] sm:$0xf0] }
 0x307   :  { %v6777_v13 = vld [vmem:[#allocation2 + $0xcdc] sm:$0xf]  ;;  %v5722_v49 = vor.u32 %v6713_v7, %v5719_v19  ;;  %4045 = vmatpush.bf16.msrb.mxu0 %v5466_v38  ;;  %v3798_v38 = vpop.f32.mrf.mxu2 }
 0x308   :  { %v5975_v9 = vld [vmem:[#allocation2 + $0xcf8] sm:$0xf0] }
 0x309   :  { %v6841_v15 = vld [vmem:[#allocation2 + $0xedc] sm:$0xf]  ;;  %v5978_v23 = vor.u32 %v6777_v13, %v5975_v9  ;;  %4059 = vmatpush.bf16.msrb.mxu1 %v5722_v49  ;;  %v3673_v9 = vadd.f32 %v7283_v51, %v3659_v52  ;;  %v3661_v51 = vadd.f32 %v7289_v42, %v629_v34 }
 0x30a   :  { %v6231_v21 = vld [vmem:[#allocation2 + $0xef8] sm:$0xf0] }
 0x30b   :  { %v6641_v20 = vld [vmem:[#allocation2 + $0x89c] sm:$0xf]  ;;  %v6234_v45 = vor.u32 %v6841_v15, %v6231_v21  ;;  %4073 = vmatpush.bf16.msrb.mxu2 %v5978_v23 }
 0x30c   :  { %v5431_v6 = vld [vmem:[#allocation2 + $0x8b8] sm:$0xf0] }
 0x30d   :  { %v6705_v31 = vld [vmem:[#allocation2 + $0xa9c] sm:$0xf]  ;;  %v5434_v37 = vor.u32 %v6641_v20, %v5431_v6  ;;  %4087 = vmatpush.bf16.msrb.mxu3 %v6234_v45  ;;  %v3812_v20 = vpop.f32.mrf.mxu3  ;;  %v3785_v6 = vadd.f32 %v3784_v46, %v3771_v36  ;;  %v3687_v45 = vadd.f32 %v7285_v24, %v3673_v9  ;;  %v3675_v24 = vadd.f32 %v7291_v48, %v3661_v51 }
 0x30e   :  { %v5687_v26 = vld [vmem:[#allocation2 + $0xab8] sm:$0xf0] }
 0x30f   :  { %v6769_v54 = vld [vmem:[#allocation2 + $0xc9c] sm:$0xf]  ;;  %v5690_v14 = vor.u32 %v6705_v31, %v5687_v26  ;;  %4046 = vmatpush.bf16.msrb.mxu0 %v5434_v37  ;;  %v3772_v26 = vpop.f32.mrf.mxu0  ;;  %v3689_v50 = vadd.f32 %v7293_v11, %v3675_v24 }
 0x310   :  { %v5943_v28 = vld [vmem:[#allocation2 + $0xcb8] sm:$0xf0] }
 0x311   :  { %v6833_v57 = vld [vmem:[#allocation2 + $0xe9c] sm:$0xf]  ;;  %v5946_v35 = vor.u32 %v6769_v54, %v5943_v28  ;;  %4060 = vmatpush.bf16.msrb.mxu1 %v5690_v14  ;;  %v3786_v54 = vpop.f32.mrf.mxu1  ;;  %v3799_v28 = vadd.f32 %v3798_v38, %v3785_v6  ;;  %v3800_v14 = vpop.f32.mrf.mxu2  ;;  %v632_v6 = vperm.slane %v7313_v29, 7 }
 0x312   :  { %v6199_v30 = vld [vmem:[#allocation2 + $0xeb8] sm:$0xf0] }
 0x313   :  { %v6633_v33 = vld [vmem:[#allocation2 + $0x85c] sm:$0xf]  ;;  %v6202_v56 = vor.u32 %v6833_v57, %v6199_v30  ;;  %4074 = vmatpush.bf16.msrb.mxu2 %v5946_v35  ;;  %v3701_v57 = vadd.f32 %v7287_v55, %v3687_v45  ;;  %v3773_v30 = vadd.f32 %v3772_v26, %v630_v12  ;;  %v3813_v37 = vadd.f32 %v3812_v20, %v3799_v28 }
 0x314   :  { %v5399_v41 = vld [vmem:[#allocation2 + $0x878] sm:$0xf0] }
 0x315   :  { %v6697_v40 = vld [vmem:[#allocation2 + $0xa5c] sm:$0xf]  ;;  %v5402_v17 = vor.u32 %v6633_v33, %v5399_v41  ;;  %4088 = vmatpush.bf16.msrb.mxu3 %v6202_v56  ;;  %v3715_v42 = vadd.f32 %v7297_v53, %v3701_v57  ;;  %v3787_v34 = vadd.f32 %v3786_v54, %v3773_v30  ;;  %v3814_v35 = vpop.f32.mrf.mxu3 }
 0x316   :  { %v5655_v32 = vld [vmem:[#allocation2 + $0xa78] sm:$0xf0] }
 0x317   :  { %v6761_v22 = vld [vmem:[#allocation2 + $0xc5c] sm:$0xf]  ;;  %v5658_v3 = vor.u32 %v6697_v40, %v5655_v32  ;;  %4047 = vmatpush.bf16.msrb.mxu0 %v5402_v17  ;;  %v3826_v55 = vpop.f32.mrf.mxu0  ;;  %v3729_v12 = vadd.f32 %v7299_v25, %v3715_v42 }
 0x318   :  { %v5911_v1 = vld [vmem:[#allocation2 + $0xc78] sm:$0xf0]  ;;  %v3827_v33 = vadd.f32 %v3826_v55, %v3813_v37 }
 0x319   :  { %v6825_v59 = vld [vmem:[#allocation2 + $0xe5c] sm:$0xf]  ;;  %v5914_v10 = vor.u32 %v6761_v22, %v5911_v1  ;;  %4061 = vmatpush.bf16.msrb.mxu1 %v5658_v3  ;;  %v3743_v48 = vadd.f32 %v7305_v8, %v3729_v12  ;;  %v3854_v40 = vpop.f32.mrf.mxu2 }
 0x31a   :  { %v6167_v58 = vld [vmem:[#allocation2 + $0xe78] sm:$0xf0] }
 0x31b   :  { %v6625_v0 = vld [vmem:[#allocation2 + $0x81c] sm:$0xf]  ;;  %v6170_v7 = vor.u32 %v6825_v59, %v6167_v58  ;;  %4075 = vmatpush.bf16.msrb.mxu2 %v5914_v10  ;;  %v3757_v11 = vadd.f32 %v7307_v16, %v3743_v48 }
 0x31c   :  { %v5367_v60 = vld [vmem:[#allocation2 + $0x838] sm:$0xf0] }
 0x31d   :  { %v6689_v4 = vld [vmem:[#allocation2 + $0xa1c] sm:$0xf]  ;;  %v5370_v21 = vor.u32 %v6625_v0, %v5367_v60  ;;  %4089 = vmatpush.bf16.msrb.mxu3 %v6170_v7  ;;  %v3868_v22 = vpop.f32.mrf.mxu3 }
 0x31e   :  { %v5623_v5 = vld [vmem:[#allocation2 + $0xa38] sm:$0xf0] }
 0x31f   :  { %v6753_v19 = vld [vmem:[#allocation2 + $0xc1c] sm:$0xf]  ;;  %v5626_v49 = vor.u32 %v6689_v4, %v5623_v5  ;;  %4048 = vmatpush.bf16.msrb.mxu0 %v5370_v21  ;;  %v3828_v32 = vpop.f32.mrf.mxu0  ;;  %v631_v21 = vperm.slane %v7313_v29, 6 }
 0x320   :  { %v5879_v13 = vld [vmem:[#allocation2 + $0xc38] sm:$0xf0] }
 0x321   :  { %v6817_v61 = vld [vmem:[#allocation2 + $0xe1c] sm:$0xf]  ;;  %v5882_v23 = vor.u32 %v6753_v19, %v5879_v13  ;;  %4062 = vmatpush.bf16.msrb.mxu1 %v5626_v49  ;;  %v3856_v58 = vpop.f32.mrf.mxu2 }
 0x322   :  { %v6135_v15 = vld [vmem:[#allocation2 + $0xe38] sm:$0xf0]  ;;  %4049 = vmatmul.bf16.vlgmr.msrb.gmra.mxu0 %v7031_v39  ;;  %v3840_v39 = vpop.f32.mrf.mxu1 }
 0x323   :  { %v6138_v31 = vor.u32 %v6817_v61, %v6135_v15  ;;  %4076 = vmatpush.bf16.msrb.mxu2 %v5882_v23  ;;  %v3841_v41 = vadd.f32 %v3840_v39, %v3827_v33 }
 0x324   :  { %4063 = vmatmul.bf16.vlgmr.msrb.gmra.mxu1 %v7035_v44  ;;  %v3801_v44 = vadd.f32 %v3800_v14, %v3787_v34 }
 0x325   :  { %4090 = vmatpush.bf16.msrb.mxu3 %v6138_v31  ;;  %v3855_v53 = vadd.f32 %v3854_v40, %v3841_v41  ;;  %v3870_v17 = vpop.f32.mrf.mxu3 }
 0x326   :  { %4077 = vmatmul.bf16.vlgmr.msrb.gmra.mxu2 %v7033_v43  ;;  %v3703_v43 = vadd.f32 %v7295_v18, %v3689_v50 }
 0x327   :  { %v3869_v46 = vadd.f32 %v3868_v22, %v3855_v53 }
 0x328   :  { %4091 = vmatmul.bf16.vlgmr.msrb.gmra.mxu3 %v7037_v47  ;;  %v3815_v47 = vadd.f32 %v3814_v35, %v3801_v44  ;;  %v3717_v56 = vadd.f32 %v7309_v62, %v3703_v43 }
 0x329   :  { %v4099_v59 = vpack.c.bf16 %v3869_v46, %v3757_v11  ;;  %v3910_v60 = vpop.f32.mrf.mxu2 }
 0x32a   :  { %v3829_v1 = vadd.f32 %v3828_v32, %v3815_v47  ;;  %v3842_v52 = vpop.f32.mrf.mxu1  ;;  %v3731_v25 = vadd.f32 %v7311_v63, %v3717_v56  ;;  %v3882_v63 = vpop.f32.mrf.mxu0 }
 0x32b   :  { %4107 = vst [vmem:[%s7358_s3 + $0x10] sm:$0xff] %v4099_v59  ;;  %v3883_v49 = vadd.f32 %v3882_v63, %v631_v21 }
 0x32c   :  { %v3745_v18 = vadd.f32 %v7316_v2, %v3731_v25  ;;  %v3843_v8 = vadd.f32 %v3842_v52, %v3829_v1 }
 0x32d   :  { %v3924_v2 = vpop.f32.mrf.mxu3 }
 0x32e   :  { %v3857_v62 = vadd.f32 %v3856_v58, %v3843_v8  ;;  %v3759_v3 = vadd.f32 %v7319_v27, %v3745_v18 }
 0x330   :  { %v3871_v10 = vadd.f32 %v3870_v17, %v3857_v62 }
 0x331   :  { %v3912_v7 = vpop.f32.mrf.mxu2 }
 0x332   :  { %v4103_v16 = vpack.c.bf16 %v3871_v10, %v3759_v3  ;;  %v3896_v0 = vpop.f32.mrf.mxu1  ;;  %v3884_v4 = vpop.f32.mrf.mxu0 }
 0x333   :  { %v3897_v45 = vadd.f32 %v3896_v0, %v3883_v49  ;;  %v3885_v57 = vadd.f32 %v3884_v4, %v631_v21 }
 0x334   :  { %4111 = vst [vmem:[%s7358_s3 + $0x30] sm:$0xff] %v4103_v16 }
 0x335   :  { %v3926_v5 = vpop.f32.mrf.mxu3  ;;  %v3911_v51 = vadd.f32 %v3910_v60, %v3897_v45 }
 0x337   :  { %v3925_v37 = vadd.f32 %v3924_v2, %v3911_v51 }
 0x33a   :  { %v3898_v36 = vpop.f32.mrf.mxu1 }
 0x33b   :  { %v3899_v42 = vadd.f32 %v3898_v36, %v3885_v57 }
 0x33d   :  { %v3913_v33 = vadd.f32 %v3912_v7, %v3899_v42 }
 0x33f   :  { %v3927_v47 = vadd.f32 %v3926_v5, %v3913_v33 }
 0x344   :  { %v3938_v19 = vpop.f32.mrf.mxu0 }
 0x345   :  { %v3939_v50 = vadd.f32 %v3938_v19, %v3925_v37 }
 0x346   :  { %v3952_v13 = vpop.f32.mrf.mxu1 }
 0x347   :  { %v3953_v43 = vadd.f32 %v3952_v13, %v3939_v50 }
 0x34c   :  { %v3940_v15 = vpop.f32.mrf.mxu0 }
 0x34d   :  { %v3941_v22 = vadd.f32 %v3940_v15, %v3927_v47 }
 0x34e   :  { %v3966_v9 = vpop.f32.mrf.mxu2  ;;  %v3954_v27 = vpop.f32.mrf.mxu1 }
 0x34f   :  { %v3967_v56 = vadd.f32 %v3966_v9, %v3953_v43  ;;  %v3955_v8 = vadd.f32 %v3954_v27, %v3941_v22 }
 0x350   :  { %v3980_v61 = vpop.f32.mrf.mxu3 }
 0x351   :  { %v3981_v25 = vadd.f32 %v3980_v61, %v3967_v56 }
 0x356   :  { %v3968_v38 = vpop.f32.mrf.mxu2 }
 0x357   :  { %v3969_v17 = vadd.f32 %v3968_v38, %v3955_v8 }
 0x358   :  { %v3982_v23 = vpop.f32.mrf.mxu3 }
 0x359   :  { %v3983_v0 = vadd.f32 %v3982_v23, %v3969_v17 }
 0x364   :  { %v3994_v20 = vpop.f32.mrf.mxu0 }
 0x365   :  { %v3995_v26 = vadd.f32 %v3994_v20, %v632_v6 }
 0x366   :  { %v4008_v31 = vpop.f32.mrf.mxu1 }
 0x367   :  { %v4009_v30 = vadd.f32 %v4008_v31, %v3995_v26 }
 0x36c   :  { %v3996_v24 = vpop.f32.mrf.mxu0 }
 0x36d   :  { %v3997_v35 = vadd.f32 %v3996_v24, %v632_v6 }
 0x36e   :  { %v4022_v54 = vpop.f32.mrf.mxu2  ;;  %v4010_v14 = vpop.f32.mrf.mxu1 }
 0x36f   :  { %v4023_v34 = vadd.f32 %v4022_v54, %v4009_v30  ;;  %v4011_v12 = vadd.f32 %v4010_v14, %v3997_v35 }
 0x370   :  { %v4036_v28 = vpop.f32.mrf.mxu3 }
 0x371   :  { %v4037_v39 = vadd.f32 %v4036_v28, %v4023_v34 }
 0x376   :  { %v4024_v55 = vpop.f32.mrf.mxu2 }
 0x377   :  { %v4025_v40 = vadd.f32 %v4024_v55, %v4011_v12 }
 0x378   :  { %v4038_v29 = vpop.f32.mrf.mxu3 }
 0x379   :  { %v4039_v11 = vadd.f32 %v4038_v29, %v4025_v40 }
 0x39f   :  { %v4050_v44 = vpop.f32.mrf.mxu0 }
 0x3a0   :  { %v4051_v41 = vadd.f32 %v4050_v44, %v4037_v39 }
 0x3a1   :  { %v4064_v48 = vpop.f32.mrf.mxu1 }
 0x3a2   :  { %v4065_v53 = vadd.f32 %v4064_v48, %v4051_v41 }
 0x3a7   :  { %v4052_v52 = vpop.f32.mrf.mxu0 }
 0x3a8   :  { %v4053_v18 = vadd.f32 %v4052_v52, %v4039_v11 }
 0x3a9   :  { %v4078_v32 = vpop.f32.mrf.mxu2  ;;  %v4066_v62 = vpop.f32.mrf.mxu1 }
 0x3aa   :  { %v4079_v1 = vadd.f32 %v4078_v32, %v4065_v53  ;;  %v4067_v3 = vadd.f32 %v4066_v62, %v4053_v18 }
 0x3ab   :  { %v4092_v46 = vpop.f32.mrf.mxu3 }
 0x3ac   :  { %v4093_v59 = vadd.f32 %v4092_v46, %v4079_v1 }
 0x3ae   :  { %v4100_v58 = vpack.c.bf16 %v4093_v59, %v3981_v25 }
 0x3b0   :  { %4108 = vst [vmem:[%s7358_s3 + $0x18] sm:$0xff] %v4100_v58 }
 0x3b1   :  { %v4080_v10 = vpop.f32.mrf.mxu2 }
 0x3b2   :  { %v4081_v16 = vadd.f32 %v4080_v10, %v4067_v3 }
 0x3b3   :  { %v4094_v63 = vpop.f32.mrf.mxu3 }
 0x3b4   :  { %v4095_v60 = vadd.f32 %v4094_v63, %v4081_v16 }
 0x3b6   :  { %v4104_v2 = vpack.c.bf16 %v4095_v60, %v3983_v0 }
 0x3b8   :  { %4112 = vst [vmem:[%s7358_s3 + $0x38] sm:$0xff] %v4104_v2 }
 0x3b9   :  { %4299 = vsyncpa [#allocation3], 1 }
 0x3ba   :  { %4300 = vsyncpa [#allocation5], 1 }

</bundles_post_ra>
